<compile_context>
chip_gen: v7x
topology: tpu7x:2x2x1
jax: 0.10.0
libtpu: 0.0.40
codegen_flags: <defaults>
</compile_context>

<pallas_src>
import functools

import jax
import jax.numpy as jnp
from jax import lax
from jax.experimental import pallas as pl
from jax.experimental.pallas import tpu as pltpu

EPS = 1e-5


def tnet_kernel(x_ref, w1, w2, w3, w4, w5, w6, b6, out_ref, *, batch, npoints, k):
    # x_ref: (B*N, k) per-point features, channels last.

    def mm(h, w_ref):
        # MXU matmul: bf16 operands, f32 accumulation.
        return jnp.dot(h.astype(jnp.bfloat16), w_ref[...],
                       preferred_element_type=jnp.float32)

    def bn_relu(h):
        # Training-mode BatchNorm1d (gamma=1, beta=0, biased variance, eps=1e-5) + ReLU.
        # Single-traversal statistics: var = E[h^2] - mean^2, all in f32 on the VPU.
        inv_n = 1.0 / h.shape[0]
        s = jnp.sum(h, axis=0, keepdims=True)
        s2 = jnp.sum(h * h, axis=0, keepdims=True)
        mean = s * inv_n
        var = jnp.maximum(s2 * inv_n - mean * mean, 0.0)
        return jnp.maximum((h - mean) * lax.rsqrt(var + EPS), 0.0)

    x = x_ref[...]                                            # (B*N, k) f32

    # ---- point MLP: Conv1d(k->64->128->1024, kernel_size=1) + BN + ReLU ----
    # (conv biases dropped: per-channel constants are cancelled by train-mode BN)
    h = bn_relu(mm(x, w1))                                    # (B*N, 64)
    h = bn_relu(mm(h, w2))                                    # (B*N, 128)
    h = bn_relu(mm(h, w3))                                    # (B*N, 1024)

    # ---- global max pool over the points of each batch element (one fused reduce) ----
    g = jnp.max(h.reshape(batch, npoints, h.shape[-1]), axis=1)   # (B, 1024)

    # ---- FC head: 1024 -> 512 -> 256 -> k*k (fc1/fc2 biases also BN-cancelled) ----
    g = bn_relu(mm(g, w4))                                    # (B, 512)
    g = bn_relu(mm(g, w5))                                    # (B, 256)
    g = mm(g, w6) + b6[...]                                   # (B, k*k)

    # ---- add flattened k x k identity: build a single (1, k*k) row, broadcast-add ----
    idx = lax.broadcasted_iota(jnp.int32, (1, k * k), 1)
    iden = jnp.where(idx % (k + 1) == 0, 1.0, 0.0)
    out_ref[...] = g + iden


def spatial_transformer_kd(x_nkw, params, *, k):
    """x_nkw: (B, k, N) float32 (PyTorch NCW layout). Returns (B, k, k)."""
    B, kk, N = x_nkw.shape
    assert kk == k
    w1, b1, w2, b2, w3, b3, w4, b4, w5, b5, w6, b6 = params

    # Glue: NCW -> per-point channels-last slab (B*N, k).  Kept in the wrapper because the
    # point cloud is tiny here (the slab's k<128 last dim is lane-sparse); at real sizes
    # pass native (B, k, N) and grid instead (see TODO at top of file).
    x2d = jnp.transpose(x_nkw, (0, 2, 1)).reshape(B * N, k).astype(jnp.float32)

    # Weights go to the MXU in bf16 (halves the dominant weight DMA). b1..b5 are not
    # passed at all (exactly cancelled by train-mode BN with gamma=1, beta=0).
    ws = [w.astype(jnp.bfloat16) for w in (w1, w2, w3, w4, w5, w6)]
    args = [x2d] + ws + [b6.astype(jnp.float32)]

    out = pl.pallas_call(
        functools.partial(tnet_kernel, batch=B, npoints=N, k=k),
        out_shape=jax.ShapeDtypeStruct((B, k * k), jnp.float32),
        in_specs=[pl.BlockSpec(memory_space=pltpu.MemorySpace.VMEM)] * len(args),
        out_specs=pl.BlockSpec(memory_space=pltpu.MemorySpace.VMEM),
        compiler_params=pltpu.CompilerParams(vmem_limit_bytes=32 * 1024 * 1024),
    )(*args)
    return out.reshape(B, k, k)


def init_params(key, k):
    """Deterministic synthetic init, PyTorch-style U(-1/sqrt(fan_in), 1/sqrt(fan_in)).

    Weights are stored as (fan_in, fan_out) so the kernel does x @ W; biases as (1, fan_out).
    Layers: conv1 k->64, conv2 64->128, conv3 128->1024, fc1 1024->512, fc2 512->256,
    fc3 256->k*k.  (BN gamma/beta are at their init values 1/0; b1..b5 are generated for
    parity with the PyTorch module but are mathematically cancelled by train-mode BN.)
    """
    dims = [(k, 64), (64, 128), (128, 1024), (1024, 512), (512, 256), (256, k * k)]
    params = []
    for fin, fout in dims:
        key, kw, kb = jax.random.split(key, 3)
        bound = 1.0 / (fin ** 0.5)
        w = jax.random.uniform(kw, (fin, fout), jnp.float32, -bound, bound)
        b = jax.random.uniform(kb, (1, fout), jnp.float32, -bound, bound)
        params += [w, b]
    return params


if __name__ == "__main__":
    K = 16        # module's `k` (kept small; PyTorch default is 64)
    B = 2         # batch
    N = 16        # number of points

    root = jax.random.PRNGKey(0)
    kx, kp = jax.random.split(root)
    x = jax.random.normal(kx, (B, K, N), dtype=jnp.float32)   # PyTorch NCW layout
    params = init_params(kp, K)

    out = spatial_transformer_kd(x, params, k=K)
    out = jax.block_until_ready(out)
    assert out.shape == (B, K, K)
    assert bool(jnp.all(jnp.isfinite(out)))
    print("KERNEL_OK")
</pallas_src>

<mosaic_0001>
module attributes {stable_mosaic.version = 11 : i64} {
  func.func @tnet_kernel(%arg0: memref<32x16xf32, #tpu.memory_space<vmem>>, %arg1: memref<16x64xbf16, #tpu.memory_space<vmem>>, %arg2: memref<64x128xbf16, #tpu.memory_space<vmem>>, %arg3: memref<128x1024xbf16, #tpu.memory_space<vmem>>, %arg4: memref<1024x512xbf16, #tpu.memory_space<vmem>>, %arg5: memref<512x256xbf16, #tpu.memory_space<vmem>>, %arg6: memref<256x256xbf16, #tpu.memory_space<vmem>>, %arg7: memref<1x256xf32, #tpu.memory_space<vmem>>, %arg8: memref<2x256xf32, #tpu.memory_space<vmem>>) attributes {dimension_semantics = [], scalar_prefetch = 0 : i64, scratch_operands = 0 : i64, tpu.core_type = #tpu.core_type<tc>} {
    %c0 = arith.constant 0 : index
    %c0_0 = arith.constant 0 : index
    %0 = vector.load %arg0[%c0, %c0_0] : memref<32x16xf32, #tpu.memory_space<vmem>>, vector<32x16xf32>
    %1 = arith.truncf %0 : vector<32x16xf32> to vector<32x16xbf16>
    %c0_1 = arith.constant 0 : index
    %c0_2 = arith.constant 0 : index
    %2 = vector.load %arg1[%c0_1, %c0_2] : memref<16x64xbf16, #tpu.memory_space<vmem>>, vector<16x64xbf16>
    %cst = arith.constant dense<0.000000e+00> : vector<32x64xf32>
    %3 = tpu.matmul %1, %2, %cst {dimension_numbers = #tpu.dot_dimension_numbers<[1], [0], [0], [1], [0, 0, 1, 1], [], []>} : vector<32x16xbf16>, vector<16x64xbf16>, vector<32x64xf32> -> vector<32x64xf32>
    %cst_3 = arith.constant dense<0.000000e+00> : vector<64xf32>
    %4 = vector.multi_reduction <add>, %3, %cst_3 [0] : vector<32x64xf32> to vector<64xf32>
    %5 = vector.shape_cast %4 : vector<64xf32> to vector<1x64xf32>
    %6 = arith.mulf %3, %3 : vector<32x64xf32>
    %cst_4 = arith.constant dense<0.000000e+00> : vector<64xf32>
    %7 = vector.multi_reduction <add>, %6, %cst_4 [0] : vector<32x64xf32> to vector<64xf32>
    %8 = vector.shape_cast %7 : vector<64xf32> to vector<1x64xf32>
    %cst_5 = arith.constant 3.125000e-02 : f32
    %9 = vector.broadcast %cst_5 : f32 to vector<1x64xf32>
    %10 = arith.mulf %5, %9 : vector<1x64xf32>
    %cst_6 = arith.constant 3.125000e-02 : f32
    %11 = vector.broadcast %cst_6 : f32 to vector<1x64xf32>
    %12 = arith.mulf %8, %11 : vector<1x64xf32>
    %13 = arith.mulf %10, %10 : vector<1x64xf32>
    %14 = arith.subf %12, %13 : vector<1x64xf32>
    %cst_7 = arith.constant 0.000000e+00 : f32
    %15 = vector.broadcast %cst_7 : f32 to vector<1x64xf32>
    %16 = arith.maximumf %14, %15 : vector<1x64xf32>
    %17 = vector.broadcast %10 : vector<1x64xf32> to vector<32x64xf32>
    %18 = arith.subf %3, %17 : vector<32x64xf32>
    %cst_8 = arith.constant 9.99999974E-6 : f32
    %19 = vector.broadcast %cst_8 : f32 to vector<1x64xf32>
    %20 = arith.addf %16, %19 : vector<1x64xf32>
    %21 = math.rsqrt %20 : vector<1x64xf32>
    %22 = vector.broadcast %21 : vector<1x64xf32> to vector<32x64xf32>
    %23 = arith.mulf %18, %22 : vector<32x64xf32>
    %cst_9 = arith.constant 0.000000e+00 : f32
    %24 = vector.broadcast %cst_9 : f32 to vector<32x64xf32>
    %25 = arith.maximumf %23, %24 : vector<32x64xf32>
    %26 = arith.truncf %25 : vector<32x64xf32> to vector<32x64xbf16>
    %c0_10 = arith.constant 0 : index
    %c0_11 = arith.constant 0 : index
    %27 = vector.load %arg2[%c0_10, %c0_11] : memref<64x128xbf16, #tpu.memory_space<vmem>>, vector<64x128xbf16>
    %cst_12 = arith.constant dense<0.000000e+00> : vector<32x128xf32>
    %28 = tpu.matmul %26, %27, %cst_12 {dimension_numbers = #tpu.dot_dimension_numbers<[1], [0], [0], [1], [0, 0, 1, 1], [], []>} : vector<32x64xbf16>, vector<64x128xbf16>, vector<32x128xf32> -> vector<32x128xf32>
    %cst_13 = arith.constant dense<0.000000e+00> : vector<128xf32>
    %29 = vector.multi_reduction <add>, %28, %cst_13 [0] : vector<32x128xf32> to vector<128xf32>
    %30 = vector.shape_cast %29 : vector<128xf32> to vector<1x128xf32>
    %31 = arith.mulf %28, %28 : vector<32x128xf32>
    %cst_14 = arith.constant dense<0.000000e+00> : vector<128xf32>
    %32 = vector.multi_reduction <add>, %31, %cst_14 [0] : vector<32x128xf32> to vector<128xf32>
    %33 = vector.shape_cast %32 : vector<128xf32> to vector<1x128xf32>
    %cst_15 = arith.constant 3.125000e-02 : f32
    %34 = vector.broadcast %cst_15 : f32 to vector<1x128xf32>
    %35 = arith.mulf %30, %34 : vector<1x128xf32>
    %cst_16 = arith.constant 3.125000e-02 : f32
    %36 = vector.broadcast %cst_16 : f32 to vector<1x128xf32>
    %37 = arith.mulf %33, %36 : vector<1x128xf32>
    %38 = arith.mulf %35, %35 : vector<1x128xf32>
    %39 = arith.subf %37, %38 : vector<1x128xf32>
    %cst_17 = arith.constant 0.000000e+00 : f32
    %40 = vector.broadcast %cst_17 : f32 to vector<1x128xf32>
    %41 = arith.maximumf %39, %40 : vector<1x128xf32>
    %42 = vector.broadcast %35 : vector<1x128xf32> to vector<32x128xf32>
    %43 = arith.subf %28, %42 : vector<32x128xf32>
    %cst_18 = arith.constant 9.99999974E-6 : f32
    %44 = vector.broadcast %cst_18 : f32 to vector<1x128xf32>
    %45 = arith.addf %41, %44 : vector<1x128xf32>
    %46 = math.rsqrt %45 : vector<1x128xf32>
    %47 = vector.broadcast %46 : vector<1x128xf32> to vector<32x128xf32>
    %48 = arith.mulf %43, %47 : vector<32x128xf32>
    %cst_19 = arith.constant 0.000000e+00 : f32
    %49 = vector.broadcast %cst_19 : f32 to vector<32x128xf32>
    %50 = arith.maximumf %48, %49 : vector<32x128xf32>
    %51 = arith.truncf %50 : vector<32x128xf32> to vector<32x128xbf16>
    %c0_20 = arith.constant 0 : index
    %c0_21 = arith.constant 0 : index
    %52 = vector.load %arg3[%c0_20, %c0_21] : memref<128x1024xbf16, #tpu.memory_space<vmem>>, vector<128x1024xbf16>
    %cst_22 = arith.constant dense<0.000000e+00> : vector<32x1024xf32>
    %53 = tpu.matmul %51, %52, %cst_22 {dimension_numbers = #tpu.dot_dimension_numbers<[1], [0], [0], [1], [0, 0, 1, 1], [], []>} : vector<32x128xbf16>, vector<128x1024xbf16>, vector<32x1024xf32> -> vector<32x1024xf32>
    %cst_23 = arith.constant dense<0.000000e+00> : vector<1024xf32>
    %54 = vector.multi_reduction <add>, %53, %cst_23 [0] : vector<32x1024xf32> to vector<1024xf32>
    %55 = vector.shape_cast %54 : vector<1024xf32> to vector<1x1024xf32>
    %56 = arith.mulf %53, %53 : vector<32x1024xf32>
    %cst_24 = arith.constant dense<0.000000e+00> : vector<1024xf32>
    %57 = vector.multi_reduction <add>, %56, %cst_24 [0] : vector<32x1024xf32> to vector<1024xf32>
    %58 = vector.shape_cast %57 : vector<1024xf32> to vector<1x1024xf32>
    %cst_25 = arith.constant 3.125000e-02 : f32
    %59 = vector.broadcast %cst_25 : f32 to vector<1x1024xf32>
    %60 = arith.mulf %55, %59 : vector<1x1024xf32>
    %cst_26 = arith.constant 3.125000e-02 : f32
    %61 = vector.broadcast %cst_26 : f32 to vector<1x1024xf32>
    %62 = arith.mulf %58, %61 : vector<1x1024xf32>
    %63 = arith.mulf %60, %60 : vector<1x1024xf32>
    %64 = arith.subf %62, %63 : vector<1x1024xf32>
    %cst_27 = arith.constant 0.000000e+00 : f32
    %65 = vector.broadcast %cst_27 : f32 to vector<1x1024xf32>
    %66 = arith.maximumf %64, %65 : vector<1x1024xf32>
    %67 = vector.broadcast %60 : vector<1x1024xf32> to vector<32x1024xf32>
    %68 = arith.subf %53, %67 : vector<32x1024xf32>
    %cst_28 = arith.constant 9.99999974E-6 : f32
    %69 = vector.broadcast %cst_28 : f32 to vector<1x1024xf32>
    %70 = arith.addf %66, %69 : vector<1x1024xf32>
    %71 = math.rsqrt %70 : vector<1x1024xf32>
    %72 = vector.broadcast %71 : vector<1x1024xf32> to vector<32x1024xf32>
    %73 = arith.mulf %68, %72 : vector<32x1024xf32>
    %cst_29 = arith.constant 0.000000e+00 : f32
    %74 = vector.broadcast %cst_29 : f32 to vector<32x1024xf32>
    %75 = arith.maximumf %73, %74 : vector<32x1024xf32>
    %76 = vector.shape_cast %75 : vector<32x1024xf32> to vector<2x16x1024xf32>
    %cst_30 = arith.constant dense<0xFF800000> : vector<2x1024xf32>
    %77 = vector.multi_reduction <maximumf>, %76, %cst_30 [1] : vector<2x16x1024xf32> to vector<2x1024xf32>
    %78 = arith.truncf %77 : vector<2x1024xf32> to vector<2x1024xbf16>
    %c0_31 = arith.constant 0 : index
    %c0_32 = arith.constant 0 : index
    %79 = vector.load %arg4[%c0_31, %c0_32] : memref<1024x512xbf16, #tpu.memory_space<vmem>>, vector<1024x512xbf16>
    %cst_33 = arith.constant dense<0.000000e+00> : vector<2x512xf32>
    %80 = tpu.matmul %78, %79, %cst_33 {dimension_numbers = #tpu.dot_dimension_numbers<[1], [0], [0], [1], [0, 0, 1, 1], [], []>} : vector<2x1024xbf16>, vector<1024x512xbf16>, vector<2x512xf32> -> vector<2x512xf32>
    %cst_34 = arith.constant dense<0.000000e+00> : vector<512xf32>
    %81 = vector.multi_reduction <add>, %80, %cst_34 [0] : vector<2x512xf32> to vector<512xf32>
    %82 = vector.shape_cast %81 : vector<512xf32> to vector<1x512xf32>
    %83 = arith.mulf %80, %80 : vector<2x512xf32>
    %cst_35 = arith.constant dense<0.000000e+00> : vector<512xf32>
    %84 = vector.multi_reduction <add>, %83, %cst_35 [0] : vector<2x512xf32> to vector<512xf32>
    %85 = vector.shape_cast %84 : vector<512xf32> to vector<1x512xf32>
    %cst_36 = arith.constant 5.000000e-01 : f32
    %86 = vector.broadcast %cst_36 : f32 to vector<1x512xf32>
    %87 = arith.mulf %82, %86 : vector<1x512xf32>
    %cst_37 = arith.constant 5.000000e-01 : f32
    %88 = vector.broadcast %cst_37 : f32 to vector<1x512xf32>
    %89 = arith.mulf %85, %88 : vector<1x512xf32>
    %90 = arith.mulf %87, %87 : vector<1x512xf32>
    %91 = arith.subf %89, %90 : vector<1x512xf32>
    %cst_38 = arith.constant 0.000000e+00 : f32
    %92 = vector.broadcast %cst_38 : f32 to vector<1x512xf32>
    %93 = arith.maximumf %91, %92 : vector<1x512xf32>
    %94 = vector.broadcast %87 : vector<1x512xf32> to vector<2x512xf32>
    %95 = arith.subf %80, %94 : vector<2x512xf32>
    %cst_39 = arith.constant 9.99999974E-6 : f32
    %96 = vector.broadcast %cst_39 : f32 to vector<1x512xf32>
    %97 = arith.addf %93, %96 : vector<1x512xf32>
    %98 = math.rsqrt %97 : vector<1x512xf32>
    %99 = vector.broadcast %98 : vector<1x512xf32> to vector<2x512xf32>
    %100 = arith.mulf %95, %99 : vector<2x512xf32>
    %cst_40 = arith.constant 0.000000e+00 : f32
    %101 = vector.broadcast %cst_40 : f32 to vector<2x512xf32>
    %102 = arith.maximumf %100, %101 : vector<2x512xf32>
    %103 = arith.truncf %102 : vector<2x512xf32> to vector<2x512xbf16>
    %c0_41 = arith.constant 0 : index
    %c0_42 = arith.constant 0 : index
    %104 = vector.load %arg5[%c0_41, %c0_42] : memref<512x256xbf16, #tpu.memory_space<vmem>>, vector<512x256xbf16>
    %cst_43 = arith.constant dense<0.000000e+00> : vector<2x256xf32>
    %105 = tpu.matmul %103, %104, %cst_43 {dimension_numbers = #tpu.dot_dimension_numbers<[1], [0], [0], [1], [0, 0, 1, 1], [], []>} : vector<2x512xbf16>, vector<512x256xbf16>, vector<2x256xf32> -> vector<2x256xf32>
    %cst_44 = arith.constant dense<0.000000e+00> : vector<256xf32>
    %106 = vector.multi_reduction <add>, %105, %cst_44 [0] : vector<2x256xf32> to vector<256xf32>
    %107 = vector.shape_cast %106 : vector<256xf32> to vector<1x256xf32>
    %108 = arith.mulf %105, %105 : vector<2x256xf32>
    %cst_45 = arith.constant dense<0.000000e+00> : vector<256xf32>
    %109 = vector.multi_reduction <add>, %108, %cst_45 [0] : vector<2x256xf32> to vector<256xf32>
    %110 = vector.shape_cast %109 : vector<256xf32> to vector<1x256xf32>
    %cst_46 = arith.constant 5.000000e-01 : f32
    %111 = vector.broadcast %cst_46 : f32 to vector<1x256xf32>
    %112 = arith.mulf %107, %111 : vector<1x256xf32>
    %cst_47 = arith.constant 5.000000e-01 : f32
    %113 = vector.broadcast %cst_47 : f32 to vector<1x256xf32>
    %114 = arith.mulf %110, %113 : vector<1x256xf32>
    %115 = arith.mulf %112, %112 : vector<1x256xf32>
    %116 = arith.subf %114, %115 : vector<1x256xf32>
    %cst_48 = arith.constant 0.000000e+00 : f32
    %117 = vector.broadcast %cst_48 : f32 to vector<1x256xf32>
    %118 = arith.maximumf %116, %117 : vector<1x256xf32>
    %119 = vector.broadcast %112 : vector<1x256xf32> to vector<2x256xf32>
    %120 = arith.subf %105, %119 : vector<2x256xf32>
    %cst_49 = arith.constant 9.99999974E-6 : f32
    %121 = vector.broadcast %cst_49 : f32 to vector<1x256xf32>
    %122 = arith.addf %118, %121 : vector<1x256xf32>
    %123 = math.rsqrt %122 : vector<1x256xf32>
    %124 = vector.broadcast %123 : vector<1x256xf32> to vector<2x256xf32>
    %125 = arith.mulf %120, %124 : vector<2x256xf32>
    %cst_50 = arith.constant 0.000000e+00 : f32
    %126 = vector.broadcast %cst_50 : f32 to vector<2x256xf32>
    %127 = arith.maximumf %125, %126 : vector<2x256xf32>
    %128 = arith.truncf %127 : vector<2x256xf32> to vector<2x256xbf16>
    %c0_51 = arith.constant 0 : index
    %c0_52 = arith.constant 0 : index
    %129 = vector.load %arg6[%c0_51, %c0_52] : memref<256x256xbf16, #tpu.memory_space<vmem>>, vector<256x256xbf16>
    %cst_53 = arith.constant dense<0.000000e+00> : vector<2x256xf32>
    %130 = tpu.matmul %128, %129, %cst_53 {dimension_numbers = #tpu.dot_dimension_numbers<[1], [0], [0], [1], [0, 0, 1, 1], [], []>} : vector<2x256xbf16>, vector<256x256xbf16>, vector<2x256xf32> -> vector<2x256xf32>
    %c0_54 = arith.constant 0 : index
    %c0_55 = arith.constant 0 : index
    %131 = vector.load %arg7[%c0_54, %c0_55] : memref<1x256xf32, #tpu.memory_space<vmem>>, vector<1x256xf32>
    %132 = vector.broadcast %131 : vector<1x256xf32> to vector<2x256xf32>
    %133 = arith.addf %130, %132 : vector<2x256xf32>
    %134 = tpu.iota {dimensions = array<i32: 1>} : vector<1x256xi32>
    %c17_i32 = arith.constant 17 : i32
    %c0_i32 = arith.constant 0 : i32
    %135 = arith.cmpi eq, %c17_i32, %c0_i32 : i32
    %c1_i32 = arith.constant 1 : i32
    %136 = arith.select %135, %c1_i32, %c17_i32 : i32
    %137 = vector.broadcast %136 : i32 to vector<1x256xi32>
    %138 = arith.remsi %134, %137 : vector<1x256xi32>
    %c0_i32_56 = arith.constant 0 : i32
    %139 = vector.broadcast %c0_i32_56 : i32 to vector<1x256xi32>
    %140 = arith.cmpi ne, %138, %139 : vector<1x256xi32>
    %c0_i32_57 = arith.constant 0 : i32
    %141 = vector.broadcast %c0_i32_57 : i32 to vector<1x256xi32>
    %142 = arith.cmpi slt, %138, %141 : vector<1x256xi32>
    %c0_i32_58 = arith.constant 0 : i32
    %143 = arith.cmpi slt, %136, %c0_i32_58 : i32
    %144 = vector.broadcast %143 : i1 to vector<1x256xi1>
    %145 = vector.broadcast %144 : vector<1x256xi1> to vector<1x256xi1>
    %146 = arith.xori %142, %145 : vector<1x256xi1>
    %147 = arith.andi %146, %140 : vector<1x256xi1>
    %148 = vector.broadcast %136 : i32 to vector<1x256xi32>
    %149 = arith.addi %138, %148 : vector<1x256xi32>
    %150 = arith.select %147, %149, %138 : vector<1x256xi1>, vector<1x256xi32>
    %c0_i32_59 = arith.constant 0 : i32
    %151 = vector.broadcast %c0_i32_59 : i32 to vector<1x256xi32>
    %152 = arith.cmpi eq, %150, %151 : vector<1x256xi32>
    %cst_60 = arith.constant 1.000000e+00 : f32
    %cst_61 = arith.constant 0.000000e+00 : f32
    %153 = vector.broadcast %cst_60 : f32 to vector<1x256xf32>
    %154 = vector.broadcast %cst_61 : f32 to vector<1x256xf32>
    %155 = arith.select %152, %153, %154 : vector<1x256xi1>, vector<1x256xf32>
    %156 = vector.broadcast %155 : vector<1x256xf32> to vector<2x256xf32>
    %157 = arith.addf %133, %156 : vector<2x256xf32>
    %c0_62 = arith.constant 0 : index
    %c0_63 = arith.constant 0 : index
    %158 = vector.load %arg8[%c0_62, %c0_63] : memref<2x256xf32, #tpu.memory_space<vmem>>, vector<2x256xf32>
    tpu.vector_store %arg8[%c0_62, %c0_63], %157 {strides = array<i32>} : memref<2x256xf32, #tpu.memory_space<vmem>>, vector<2x256xf32>,
    return
  }
}

</mosaic_0001>

<bundles_post_ra>
// kernel: tpu_custom_call.1
= control target key start
LH: loop header
LB: loop body
LE: loop exit
PB: predicated region body
PF: predicated region fallthrough
CT: control target
= control target key end

     0   :  { %13 = vsyncpa [#allocation3], 0  ;;  %s6091_s0 = inlined_call_operand.vmem [shape: f32[32,16], index: 0, kind: input, shape index: {}]   ;;  %s6092_s1 = inlined_call_operand.vmem [shape: bf16[16,64], index: 1, kind: input, shape index: {}]   ;;  %s6093_s2 = inlined_call_operand.vmem [shape: bf16[64,128], index: 2, kind: input, shape index: {}]   ;;  %s6094_s3 = inlined_call_operand.hbm [shape: bf16[128,1024], index: 3, kind: input, shape index: {}]   ;;  %s6095_s4 = inlined_call_operand.hbm [shape: bf16[1024,512], index: 4, kind: input, shape index: {}]   ;;  %s6096_s5 = inlined_call_operand.hbm [shape: bf16[512,256], index: 5, kind: input, shape index: {}]   ;;  %s6097_s6 = inlined_call_operand.hbm [shape: bf16[256,256], index: 6, kind: input, shape index: {}]   ;;  %s6098_s7 = inlined_call_operand.vmem [shape: f32[1,256], index: 7, kind: input, shape index: {}]   ;;  %s6099_s8 = inlined_call_operand.hbm [shape: f32[2,256], index: 8, kind: output, shape index: {}]  }
   0x1   :  { %14 = vsyncpa [#allocation6], 0 }
   0x2   :  { %15 = vsyncpa [#allocation9], 0 }
   0x3   :  { %16 = vsyncpa [#allocation4], 0  ;;  %s5430_s27 = smov [#allocation5]   ;;  %s5312_s9 = scalar_lea.hbm %s6095_s4, 32768 }
   0x4   :  { %s40_s28 = sshll.u32 %s5430_s27, 4  ;;  %p5313_p0 = scmp.ne.s32.totalorder %s6095_s4, %s5312_s9  ;;  %s41_s28 = int_to_ptr.vmem [resolvable:$true] %s40_s28 }
   0x5   :  { %p5316_p1 = scmp.lt.u32.totalorder %s5312_s9, %s6095_s4 }
   0x7   :  { %p5318_p2 = pnand %p5316_p1, %p5313_p0 }
   0x9   :  { %5321 = shalt.err (!%p5318_p2)
}
   0xa   :  { %s5322_s14 = scalar_lea.vmem %s41_s28, 32768  ;;  %p5327_p4 = scmp.lt.s32.totalorder %s41_s28, %s41_s28 }
   0xb   :  { %p5323_p3 = scmp.ne.s32.totalorder %s41_s28, %s5322_s14  ;;  %p5328_p5 = scmp.lt.s32.totalorder %s5322_s14, %s5322_s14 }
   0xd   :  { %p5329_p6 = por %p5328_p5, %p5327_p4 }
   0xf   :  { %p5330_p7 = pnand %p5329_p6, %p5323_p3 }
  0x11   :  { %5333 = shalt.err (!%p5330_p7)
}
  0x12   :  { %s5431_s15 = smov 256   ;;  %s5432_s16 = smov 16  }
  0x13   :  { %46 = dma.hbm_to_vmem [thread:$0]  %s6095_s4, 32768, %s41_s28, [#allocation6], %s5431_s15, %s5431_s15, %s5432_s16  }
  0x14   :  { %s5433_s19 = smov [#allocation2]   ;;  %s5334_s23 = scalar_lea.hbm %s6094_s3, 8192 }
  0x15   :  { %s28_s20 = sshll.u32 %s5433_s19, 4  ;;  %p5335_p8 = scmp.ne.s32.totalorder %s6094_s3, %s5334_s23  ;;  %s29_s20 = int_to_ptr.vmem [resolvable:$true] %s28_s20 }
  0x16   :  { %p5338_p9 = scmp.lt.u32.totalorder %s5334_s23, %s6094_s3 }
  0x18   :  { %p5340_p10 = pnand %p5338_p9, %p5335_p8 }
  0x1a   :  { %5343 = shalt.err (!%p5340_p10)
}
  0x1b   :  { %s5344_s29 = scalar_lea.vmem %s29_s20, 8192  ;;  %p5349_p12 = scmp.lt.s32.totalorder %s29_s20, %s29_s20 }
  0x1c   :  { %p5345_p11 = scmp.ne.s32.totalorder %s29_s20, %s5344_s29  ;;  %p5350_p13 = scmp.lt.s32.totalorder %s5344_s29, %s5344_s29 }
  0x1e   :  { %p5351_p0 = por %p5350_p13, %p5349_p12 }
  0x20   :  { %p5352_p1 = pnand %p5351_p0, %p5345_p11 }
  0x22   :  { %5355 = shalt.err (!%p5352_p1)
}
  0x23   :  { %s5434_s4 = smov 512   ;;  %s5435_s28 = smov 32  }
  0x24   :  { %34 = dma.hbm_to_vmem [thread:$0]  %s6094_s3, 8192, %s29_s20, [#allocation3], %s5434_s4, %s5434_s4, %s5435_s28  }
  0x25   :  { %s5436_s10 = smov [#allocation7]   ;;  %s5356_s14 = scalar_lea.hbm %s6096_s5, 8192 }
  0x26   :  { %s52_s11 = sshll.u32 %s5436_s10, 4  ;;  %p5357_p2 = scmp.ne.s32.totalorder %s6096_s5, %s5356_s14  ;;  %s53_s11 = int_to_ptr.vmem [resolvable:$true] %s52_s11 }
  0x27   :  { %p5360_p3 = scmp.lt.u32.totalorder %s5356_s14, %s6096_s5 }
  0x29   :  { %p5362_p4 = pnand %p5360_p3, %p5357_p2 }
  0x2b   :  { %5365 = shalt.err (!%p5362_p4)
}
  0x2c   :  { %s5366_s19 = scalar_lea.vmem %s53_s11, 8192  ;;  %p5371_p6 = scmp.lt.s32.totalorder %s53_s11, %s53_s11 }
  0x2d   :  { %p5367_p5 = scmp.ne.s32.totalorder %s53_s11, %s5366_s19  ;;  %p5372_p7 = scmp.lt.s32.totalorder %s5366_s19, %s5366_s19 }
  0x2f   :  { %p5373_p8 = por %p5372_p7, %p5371_p6 }
  0x31   :  { %p5374_p9 = pnand %p5373_p8, %p5367_p5 }
  0x33   :  { %5377 = shalt.err (!%p5374_p9)
}
  0x34   :  { %s5437_s3 = smov 128   ;;  %s5438_s20 = smov 8  }
  0x35   :  { %58 = dma.hbm_to_vmem [thread:$0]  %s6096_s5, 8192, %s53_s11, [#allocation6], %s5437_s3, %s5437_s3, %s5438_s20  }
  0x36   :  { %s5439_s23 = smov [#allocation8]   ;;  %s5378_s27 = scalar_lea.hbm %s6097_s6, 4096 }
  0x37   :  { %s64_s24 = sshll.u32 %s5439_s23, 4  ;;  %p5379_p10 = scmp.ne.s32.totalorder %s6097_s6, %s5378_s27  ;;  %s65_s24 = int_to_ptr.vmem [resolvable:$true] %s64_s24 }
  0x38   :  { %p5382_p11 = scmp.lt.u32.totalorder %s5378_s27, %s6097_s6 }
  0x3a   :  { %p5384_p12 = pnand %p5382_p11, %p5379_p10 }
  0x3c   :  { %5387 = shalt.err (!%p5384_p12)
}
  0x3d   :  { %s5388_s9 = scalar_lea.vmem %s65_s24, 4096  ;;  %p5393_p0 = scmp.lt.s32.totalorder %s65_s24, %s65_s24 }
  0x3e   :  { %p5389_p13 = scmp.ne.s32.totalorder %s65_s24, %s5388_s9  ;;  %p5394_p1 = scmp.lt.s32.totalorder %s5388_s9, %s5388_s9 }
  0x40   :  { %p5395_p2 = por %p5394_p1, %p5393_p0 }
  0x42   :  { %p5396_p3 = pnand %p5395_p2, %p5389_p13 }
  0x44   :  { %5399 = shalt.err (!%p5396_p3)
}
  0x45   :  { %70 = dma.hbm_to_vmem [thread:$0]  %s6097_s6, 4096, %s65_s24, [#allocation9], %s5437_s3, %s5437_s3, %s5438_s20  }
  0x46   :  { %5422 = dma.done.wait [#allocation3], 8192  }
  0x47   :  { %5423 = vsyncadd [#allocation3], 4294959104 }
  0x48   :  { %5424 = dma.done.wait [#allocation6], 40960  }
  0x49   :  { %5425 = vsyncadd [#allocation6], 4294926336 }
  0x4a   :  { %5426 = dma.done.wait [#allocation9], 4096  }
  0x4b   :  { %5427 = vsyncadd [#allocation9], 4294963200  ;;  %v4747_v0 = vld [vmem:[%s6092_s1] sm:$0xff]   ;;  %v87_v2 = vld [vmem:[%s6091_s0 + $0x8] sm:$0xff]  ;;  %vm100_vm0 = vcmask 130048   ;;  %vm156_vm1 = vcmask 523264  }
  0x4c   :  { %v86_v1 = vld [vmem:[%s6091_s0] sm:$0xff]  ;;  %v88_v3 = vld [vmem:[%s6091_s0 + $0x10] sm:$0xff]  ;;  %4684 = vmatprep.subr.bf16.mxu0 %v4747_v0  ;;  %v89_v5 = vld [vmem:[%s6091_s0 + $0x18] sm:$0xff]  ;;  %vm1678_vm2 = vcmask 1041409   ;;  %vm3311_vm3 = vcmask 1041408   ;;  %s5442_s26 = smov [#allocation10]  }
  0x4d   :  { %v90_v4 = vpack.c.bf16 %v87_v2, %v86_v1  ;;  %4685 = vmatpush3.bf16.msra.mxu0 %v4747_v0  ;;  %v91_v6 = vpack.c.bf16 %v89_v5, %v88_v3  ;;  %v4748_v7 = vld [vmem:[%s6093_s2] sm:$0xff]   ;;  %v4749_v8 = vld [vmem:[%s6093_s2 + $0x8] sm:$0xff]   ;;  %v4750_v9 = vld [vmem:[%s6093_s2 + $0x10] sm:$0xff]   ;;  %s4238_s27 = sshll.u32 %s5442_s26, 4  ;;  %s4239_s27 = int_to_ptr.vmem [resolvable:$true] %s4238_s27 }
  0x4e   :  { %4690 = vmatprep.subr.bf16.mxu1 %v4748_v7  ;;  %v4751_v10 = vld [vmem:[%s6093_s2 + $0x18] sm:$0xff]   ;;  %v338_v2 = vld [vmem:[#allocation2] sm:$0xff]  ;;  %v340_v5 = vld [vmem:[#allocation2 + $0x10] sm:$0xff]  ;;  %p5405_p5 = scmp.lt.s32.totalorder %s4239_s27, %s4239_s27 }
  0x4f   :  { %4686 = vmatprep.mubr.msk.bf16.mxu0 %vm100_vm0, %v90_v4  ;;  %4691 = vmatpush3.bf16.msra.mxu1 %v4748_v7  ;;  %v342_v3 = vld [vmem:[#allocation2 + $0x20] sm:$0xff] }
  0x50   :  { %4687 = vmatmul.mubr.msk.bf16.vlgmr.msra.gmra.mrb[0].mxu0 %vm100_vm0, %v91_v6  ;;  %4692 = vmatprep.subr.bf16.mxu1 %v4749_v8  ;;  %v4259_v4 = vcombine.high %v338_v2, %v342_v3  ;;  %v344_v6 = vld [vmem:[#allocation2 + $0x30] sm:$0xff]  ;;  %v4258_v7 = vcombine.low %v338_v2, %v342_v3  ;;  %v5573_v2 = vld [vmem:[#allocation2 + $0x8] sm:$0xff] }
  0x51   :  { %v5575_v3 = vld [vmem:[#allocation2 + $0x28] sm:$0xff] }
  0x53   :  { %4693 = vmatpush3.bf16.msra.mxu1 %v4749_v8  ;;  %v4263_v8 = vcombine.high %v340_v5, %v344_v6 }
  0x54   :  { %4694 = vmatprep.subr.bf16.mxu1 %v4750_v9 }
  0x55   :  { %828 = vmatprep.subr.bf16.mxu0 %v4263_v8 }
  0x57   :  { %4695 = vmatpush3.bf16.msra.mxu1 %v4750_v9  ;;  %v4262_v9 = vcombine.low %v340_v5, %v344_v6  ;;  %v4261_v5 = vcombine.high %v5573_v2, %v5575_v3  ;;  %v5440_v6 = vmov 0  }
  0x58   :  { %4696 = vmatprep.subr.bf16.mxu1 %v4751_v10  ;;  %860 = vmatprep.mubr.bf16.mxu0 %v5440_v6 }
  0x59   :  { %829 = vmatpush1.bf16.msra.mxu0 %v4262_v9 }
  0x5b   :  { %4697 = vmatpush3.bf16.msra.mxu1 %v4751_v10  ;;  %v346_v10 = vld [vmem:[#allocation2 + $0x40] sm:$0xff] }
  0x5c   :  { %722 = vmatprep.subr.bf16.mxu1 %v4259_v4  ;;  %v4260_v4 = vcombine.low %v5573_v2, %v5575_v3  ;;  %v375_v2 = vld [vmem:[#allocation2 + $0x128] sm:$0xff] }
 0x123   :  { %v4688_v11 = vpop.f32.mrb[0].mxu0 }
 0x124   :  { %v141_v12 = vpop.f32.mrb[1].mxu0  ;;  %v172_v16 = vmul.f32 %v4688_v11, %v4688_v11  ;;  %v160_v21 = vsel %vm156_vm1, %v4688_v11, 0.0 }
 0x125   :  { %v170_v13 = vmul.f32 %v141_v12, %v141_v12  ;;  %v4689_v14 = vpop.f32.mrb[2].mxu0  ;;  %v157_v17 = vsel %vm156_vm1, %v141_v12, 0.0 }
 0x126   :  { %v144_v15 = vpop.f32.mrb[3].mxu0  ;;  %v173_v23 = vmul.f32 %v4689_v14, %v4689_v14  ;;  %v177_v27 = vsel %vm156_vm1, %v172_v16, 0.0  ;;  %v162_v28 = vsel %vm156_vm1, %v4689_v14, 0.0 }
 0x127   :  { %v158_v18 = vsel %vm156_vm1, %v144_v15, 0.0  ;;  %v171_v19 = vmul.f32 %v144_v15, %v144_v15  ;;  %v174_v22 = vsel %vm156_vm1, %v170_v13, 0.0  ;;  %v348_v13 = vld [vmem:[#allocation2 + $0x50] sm:$0xff] }
 0x128   :  { %v159_v20 = vadd.f32 %v158_v18, %v157_v17  ;;  %v179_v31 = vsel %vm156_vm1, %v173_v23, 0.0  ;;  %v354_v18 = vld [vmem:[#allocation2 + $0x80] sm:$0xff] }
 0x129   :  { %v175_v24 = vsel %vm156_vm1, %v171_v19, 0.0  ;;  %v358_v19 = vld [vmem:[#allocation2 + $0xa0] sm:$0xff] }
 0x12a   :  { %v161_v25 = vadd.f32 %v160_v21, %v159_v20  ;;  %v176_v26 = vadd.f32 %v175_v24, %v174_v22  ;;  %v4275_v20 = vcombine.high %v354_v18, %v358_v19  ;;  %v356_v21 = vld [vmem:[#allocation2 + $0x90] sm:$0xff]  ;;  %v4274_v23 = vcombine.low %v354_v18, %v358_v19 }
 0x12b   :  { %v360_v22 = vld [vmem:[#allocation2 + $0xb0] sm:$0xff] }
 0x12c   :  { %v163_v29 = vadd.f32 %v162_v28, %v161_v25  ;;  %v178_v30 = vadd.f32 %v177_v27, %v176_v26  ;;  %v4279_v24 = vcombine.high %v356_v21, %v360_v22  ;;  %v4278_v25 = vcombine.low %v356_v21, %v360_v22  ;;  %v362_v26 = vld [vmem:[#allocation2 + $0xc0] sm:$0xff] }
 0x12d   :  { %v366_v27 = vld [vmem:[#allocation2 + $0xe0] sm:$0xff] }
 0x12e   :  { %v164_v32 = vrot.slane %v163_v29, 4  ;;  %v180_v33 = vadd.f32 %v179_v31, %v178_v30  ;;  %v4283_v28 = vcombine.high %v362_v26, %v366_v27  ;;  %v368_v30 = vld [vmem:[#allocation2 + $0xf0] sm:$0xff]  ;;  %v4282_v31 = vcombine.low %v362_v26, %v366_v27 }
 0x130   :  { %v165_v34 = vadd.f32 %v164_v32, %v163_v29  ;;  %v181_v35 = vrot.slane %v180_v33, 4  ;;  %v364_v29 = vld [vmem:[#allocation2 + $0xd0] sm:$0xff] }
 0x131   :  { %v4287_v32 = vcombine.high %v364_v29, %v368_v30 }
 0x132   :  { %v166_v36 = vrot.slane %v165_v34, 2  ;;  %v182_v37 = vadd.f32 %v181_v35, %v180_v33  ;;  %v4286_v33 = vcombine.low %v364_v29, %v368_v30  ;;  %v374_v35 = vld [vmem:[#allocation2 + $0x120] sm:$0xff] }
 0x134   :  { %v167_v38 = vadd.f32 %v166_v36, %v165_v34  ;;  %v183_v39 = vrot.slane %v182_v37, 2  ;;  %v370_v34 = vld [vmem:[#allocation2 + $0x100] sm:$0xff] }
 0x135   :  { %v4291_v36 = vcombine.high %v370_v34, %v374_v35 }
 0x136   :  { %v168_v40 = vrot.slane %v167_v38, 1  ;;  %v184_v41 = vadd.f32 %v183_v39, %v182_v37  ;;  %v372_v37 = vld [vmem:[#allocation2 + $0x110] sm:$0xff]  ;;  %v4290_v39 = vcombine.low %v370_v34, %v374_v35 }
 0x138   :  { %v169_v42 = vadd.f32 %v168_v40, %v167_v38  ;;  %v185_v43 = vrot.slane %v184_v41, 1  ;;  %v376_v38 = vld [vmem:[#allocation2 + $0x130] sm:$0xff] }
 0x139   :  { %v4295_v40 = vcombine.high %v372_v37, %v376_v38 }
 0x13a   :  { %v186_v44 = vadd.f32 %v185_v43, %v184_v41  ;;  %v187_v45 = vmul.f32 0.03125, %v169_v42  ;;  %v4294_v41 = vcombine.low %v372_v37, %v376_v38  ;;  %v378_v42 = vld [vmem:[#allocation2 + $0x140] sm:$0xff] }
 0x13b   :  { %v382_v43 = vld [vmem:[#allocation2 + $0x160] sm:$0xff] }
 0x13c   :  { %v188_v46 = vmul.f32 0.03125, %v186_v44  ;;  %v189_v47 = vmul.f32 %v187_v45, %v187_v45  ;;  %v193_v48 = vsub.f32 %v144_v15, %v187_v45  ;;  %v192_v49 = vsub.f32 %v141_v12, %v187_v45 }
 0x13d   :  { %v194_v50 = vsub.f32 %v4688_v11, %v187_v45  ;;  %v195_v51 = vsub.f32 %v4689_v14, %v187_v45  ;;  %v350_v11 = vld [vmem:[#allocation2 + $0x60] sm:$0xff]  ;;  %v352_v14 = vld [vmem:[#allocation2 + $0x70] sm:$0xff]  ;;  %v4299_v44 = vcombine.high %v378_v42, %v382_v43 }
 0x13e   :  { %v190_v52 = vsub.f32 %v188_v46, %v189_v47  ;;  %v4267_v12 = vcombine.high %v346_v10, %v350_v11  ;;  %v4266_v15 = vcombine.low %v346_v10, %v350_v11  ;;  %v4271_v16 = vcombine.high %v348_v13, %v352_v14  ;;  %v380_v45 = vld [vmem:[#allocation2 + $0x150] sm:$0xff] }
 0x13f   :  { %v4270_v17 = vcombine.low %v348_v13, %v352_v14  ;;  %v384_v46 = vld [vmem:[#allocation2 + $0x170] sm:$0xff]  ;;  %v4298_v47 = vcombine.low %v378_v42, %v382_v43 }
 0x140   :  { %v191_v53 = vmax.f32 %v190_v52, 0.0  ;;  %830 = vmatprep.subr.bf16.mxu0 %v4271_v16 }
 0x141   :  { %831 = vmatpush1.bf16.msra.mxu0 %v4270_v17 }
 0x142   :  { %v196_v54 = vadd.f32 1e-05, %v191_v53  ;;  %832 = vmatprep.subr.bf16.mxu0 %v4279_v24  ;;  %v388_v53 = vld [vmem:[#allocation2 + $0x190] sm:$0xff] }
 0x144   :  { %5280 = vrsqrt.f32 %v196_v54  ;;  %v392_v54 = vld [vmem:[#allocation2 + $0x1b0] sm:$0xff] }
 0x145   :  { %833 = vmatpush1.bf16.msra.mxu0 %v4278_v25 }
 0x146   :  { %834 = vmatprep.subr.bf16.mxu0 %v4287_v32 }
 0x149   :  { %835 = vmatpush1.bf16.msra.mxu0 %v4286_v33 }
 0x14a   :  { %836 = vmatprep.subr.bf16.mxu0 %v4295_v40 }
 0x14d   :  { %837 = vmatpush1.bf16.msra.mxu0 %v4294_v41 }
 0x14e   :  { %v5281_v55 = vpop.eup %5280 }
 0x14f   :  { %v198_v56 = vmul.f32 %v5281_v55, %v192_v49  ;;  %v199_v57 = vmul.f32 %v5281_v55, %v193_v48  ;;  %v200_v58 = vmul.f32 %v5281_v55, %v194_v50  ;;  %v201_v59 = vmul.f32 %v5281_v55, %v195_v51  ;;  %v386_v50 = vld [vmem:[#allocation2 + $0x180] sm:$0xff] }
 0x150   :  { %v4303_v48 = vcombine.high %v380_v45, %v384_v46  ;;  %v4302_v49 = vcombine.low %v380_v45, %v384_v46  ;;  %v390_v51 = vld [vmem:[#allocation2 + $0x1a0] sm:$0xff] }
 0x151   :  { %v202_v60 = vmax.f32 %v198_v56, 0.0  ;;  %v203_v61 = vmax.f32 %v199_v57, 0.0  ;;  %v204_v62 = vmax.f32 %v200_v58, 0.0  ;;  %v205_v63 = vmax.f32 %v201_v59, 0.0  ;;  %v394_v58 = vld [vmem:[#allocation2 + $0x1c0] sm:$0xff] }
 0x152   :  { %838 = vmatprep.subr.bf16.mxu0 %v4303_v48  ;;  %v4307_v52 = vcombine.high %v386_v50, %v390_v51  ;;  %v4306_v55 = vcombine.low %v386_v50, %v390_v51  ;;  %v4311_v56 = vcombine.high %v388_v53, %v392_v54  ;;  %v4310_v57 = vcombine.low %v388_v53, %v392_v54  ;;  %v398_v59 = vld [vmem:[#allocation2 + $0x1e0] sm:$0xff]  ;;  %v347_v48 = vld [vmem:[#allocation2 + $0x48] sm:$0xff] }
 0x153   :  { %v206_v0 = vpack.c.bf16 %v203_v61, %v202_v60  ;;  %v207_v1 = vpack.c.bf16 %v205_v63, %v204_v62  ;;  %839 = vmatpush1.bf16.msra.mxu0 %v4302_v49  ;;  %v4315_v60 = vcombine.high %v394_v58, %v398_v59  ;;  %v396_v61 = vld [vmem:[#allocation2 + $0x1d0] sm:$0xff]  ;;  %v4314_v63 = vcombine.low %v394_v58, %v398_v59  ;;  %v351_v49 = vld [vmem:[#allocation2 + $0x68] sm:$0xff] }
 0x154   :  { %840 = vmatprep.subr.bf16.mxu0 %v4311_v56  ;;  %v400_v62 = vld [vmem:[#allocation2 + $0x1f0] sm:$0xff]  ;;  %v359_v58 = vld [vmem:[#allocation2 + $0xa8] sm:$0xff]  ;;  %v4268_v59 = vcombine.low %v347_v48, %v351_v49 }
 0x155   :  { %4698 = vmatprep.mubr.msk.bf16.mxu1 %vm156_vm1, %v206_v0  ;;  %v4319_v0 = vcombine.high %v396_v61, %v400_v62 }
 0x156   :  { %4699 = vmatmul.mubr.msk.bf16.vlgmr.msra.gmra.mrb[0].mxu1 %vm156_vm1, %v207_v1  ;;  %v4318_v1 = vcombine.low %v396_v61, %v400_v62  ;;  %v363_v61 = vld [vmem:[#allocation2 + $0xc8] sm:$0xff] }
 0x157   :  { %723 = vmatpush1.bf16.msra.mxu1 %v4258_v7  ;;  %841 = vmatpush1.bf16.msra.mxu0 %v4310_v57  ;;  %v355_v57 = vld [vmem:[#allocation2 + $0x88] sm:$0xff] }
 0x158   :  { %724 = vmatprep.subr.bf16.mxu1 %v4267_v12  ;;  %842 = vmatprep.subr.bf16.mxu0 %v4319_v0  ;;  %v367_v62 = vld [vmem:[#allocation2 + $0xe8] sm:$0xff] }
 0x159   :  { %754 = vmatprep.mubr.bf16.mxu1 %v5440_v6  ;;  %v4285_v0 = vcombine.high %v363_v61, %v367_v62  ;;  %v4284_v3 = vcombine.low %v363_v61, %v367_v62  ;;  %v4764_v61 = vld [vmem:[#allocation5 + $0x40] ss:$16 sps:$4 sm:$0xff]   ;;  %v4772_v62 = vld [vmem:[#allocation5 + $0x64] ss:$16 sps:$4 sm:$0xff]  }
 0x15b   :  { %725 = vmatpush1.bf16.msra.mxu1 %v4266_v15  ;;  %843 = vmatpush1.bf16.msra.mxu0 %v4318_v1  ;;  %v371_v1 = vld [vmem:[#allocation2 + $0x108] sm:$0xff] }
 0x15c   :  { %726 = vmatprep.subr.bf16.mxu1 %v4275_v20 }
 0x15f   :  { %727 = vmatpush1.bf16.msra.mxu1 %v4274_v23 }
 0x160   :  { %728 = vmatprep.subr.bf16.mxu1 %v4283_v28 }
 0x163   :  { %729 = vmatpush1.bf16.msra.mxu1 %v4282_v31 }
 0x164   :  { %730 = vmatprep.subr.bf16.mxu1 %v4291_v36 }
 0x167   :  { %731 = vmatpush1.bf16.msra.mxu1 %v4290_v39 }
 0x168   :  { %732 = vmatprep.subr.bf16.mxu1 %v4299_v44 }
 0x16b   :  { %733 = vmatpush1.bf16.msra.mxu1 %v4298_v47 }
 0x16c   :  { %734 = vmatprep.subr.bf16.mxu1 %v4307_v52 }
 0x16f   :  { %735 = vmatpush1.bf16.msra.mxu1 %v4306_v55  ;;  %v4269_v55 = vcombine.high %v347_v48, %v351_v49 }
 0x170   :  { %736 = vmatprep.subr.bf16.mxu1 %v4315_v60  ;;  %v4277_v60 = vcombine.high %v355_v57, %v359_v58 }
 0x173   :  { %737 = vmatpush1.bf16.msra.mxu1 %v4314_v63  ;;  %v4276_v63 = vcombine.low %v355_v57, %v359_v58  ;;  %v4760_v57 = vld [vmem:[#allocation5 + $0x24] ss:$16 sps:$4 sm:$0xff]   ;;  %v4763_v58 = vld [vmem:[#allocation5 + $0x2c] ss:$16 sps:$4 sm:$0xff]  }
 0x174   :  { %775 = vmatprep.subr.bf16.mxu1 %v4261_v5  ;;  %v379_v5 = vld [vmem:[#allocation2 + $0x148] sm:$0xff] }
 0x229   :  { %v4700_v7 = vpop.f32.mrb[0].mxu1 }
 0x22a   :  { %v280_v8 = vpop.f32.mrb[1].mxu1  ;;  %v306_v14 = vmul.f32 %v4700_v7, %v4700_v7 }
 0x22b   :  { %v4701_v9 = vpop.f32.mrb[2].mxu1  ;;  %v304_v11 = vmul.f32 %v280_v8, %v280_v8 }
 0x22c   :  { %v283_v10 = vpop.f32.mrb[3].mxu1  ;;  %v307_v17 = vmul.f32 %v4701_v9, %v4701_v9 }
 0x22d   :  { %v295_v12 = vadd.f32 %v283_v10, %v280_v8  ;;  %v305_v13 = vmul.f32 %v283_v10, %v283_v10 }
 0x22f   :  { %v296_v15 = vadd.f32 %v4700_v7, %v295_v12  ;;  %v308_v16 = vadd.f32 %v305_v13, %v304_v11  ;;  %v391_v11 = vld [vmem:[#allocation2 + $0x1a8] sm:$0xff] }
 0x231   :  { %v297_v18 = vadd.f32 %v4701_v9, %v296_v15  ;;  %v309_v19 = vadd.f32 %v308_v16, %v306_v14  ;;  %v395_v14 = vld [vmem:[#allocation2 + $0x1c8] sm:$0xff] }
 0x232   :  { %v399_v15 = vld [vmem:[#allocation2 + $0x1e8] sm:$0xff] }
 0x233   :  { %v298_v20 = vrot.slane %v297_v18, 4  ;;  %v310_v21 = vadd.f32 %v309_v19, %v307_v17  ;;  %v4317_v17 = vcombine.high %v395_v14, %v399_v15  ;;  %v345_v19 = vld [vmem:[#allocation2 + $0x38] sm:$0xff] }
 0x235   :  { %v299_v22 = vadd.f32 %v298_v20, %v297_v18  ;;  %v311_v23 = vrot.slane %v310_v21, 4  ;;  %v341_v18 = vld [vmem:[#allocation2 + $0x18] sm:$0xff]  ;;  %v4316_v20 = vcombine.low %v395_v14, %v399_v15  ;;  %v4796_v15 = vld [vmem:[#allocation5 + $0xe4] ss:$16 sps:$4 sm:$0xff]  }
 0x236   :  { %v4791_v14 = vld [vmem:[#allocation5 + $0xc8] ss:$16 sps:$4 sm:$0xff]  }
 0x237   :  { %v300_v24 = vrot.slane %v299_v22, 2  ;;  %v312_v25 = vadd.f32 %v311_v23, %v310_v21  ;;  %v4265_v21 = vcombine.high %v341_v18, %v345_v19  ;;  %v353_v23 = vld [vmem:[#allocation2 + $0x78] sm:$0xff] }
 0x239   :  { %v301_v26 = vadd.f32 %v300_v24, %v299_v22  ;;  %v313_v27 = vrot.slane %v312_v25, 2  ;;  %v349_v22 = vld [vmem:[#allocation2 + $0x58] sm:$0xff]  ;;  %v4264_v24 = vcombine.low %v341_v18, %v345_v19  ;;  %v4802_v19 = vld [vmem:[#allocation5 + $0x104] ss:$16 sps:$4 sm:$0xff]  }
 0x23a   :  { %v4797_v18 = vld [vmem:[#allocation5 + $0xe8] ss:$16 sps:$4 sm:$0xff]  }
 0x23b   :  { %v302_v28 = vrot.slane %v301_v26, 1  ;;  %v314_v29 = vadd.f32 %v313_v27, %v312_v25  ;;  %v4273_v25 = vcombine.high %v349_v22, %v353_v23  ;;  %v361_v27 = vld [vmem:[#allocation2 + $0xb8] sm:$0xff] }
 0x23d   :  { %v303_v30 = vadd.f32 %v302_v28, %v301_v26  ;;  %v315_v31 = vrot.slane %v314_v29, 1  ;;  %v357_v26 = vld [vmem:[#allocation2 + $0x98] sm:$0xff]  ;;  %v4272_v28 = vcombine.low %v349_v22, %v353_v23  ;;  %v4808_v23 = vld [vmem:[#allocation5 + $0x124] ss:$16 sps:$4 sm:$0xff]  }
 0x23e   :  { %v4803_v22 = vld [vmem:[#allocation5 + $0x108] ss:$16 sps:$4 sm:$0xff]  }
 0x23f   :  { %v316_v32 = vadd.f32 %v315_v31, %v314_v29  ;;  %v317_v33 = vmul.f32 0.03125, %v303_v30  ;;  %v4281_v29 = vcombine.high %v357_v26, %v361_v27  ;;  %v365_v30 = vld [vmem:[#allocation2 + $0xd8] sm:$0xff] }
 0x240   :  { %v369_v31 = vld [vmem:[#allocation2 + $0xf8] sm:$0xff] }
 0x241   :  { %v318_v34 = vmul.f32 0.03125, %v316_v32  ;;  %v319_v35 = vmul.f32 %v317_v33, %v317_v33  ;;  %v323_v36 = vsub.f32 %v283_v10, %v317_v33  ;;  %v322_v37 = vsub.f32 %v280_v8, %v317_v33  ;;  %v387_v10 = vld [vmem:[#allocation2 + $0x188] sm:$0xff] }
 0x242   :  { %v324_v38 = vsub.f32 %v4700_v7, %v317_v33  ;;  %v325_v39 = vsub.f32 %v4701_v9, %v317_v33  ;;  %v383_v7 = vld [vmem:[#allocation2 + $0x168] sm:$0xff]  ;;  %v4292_v8 = vcombine.low %v371_v1, %v375_v2  ;;  %v4309_v13 = vcombine.high %v387_v10, %v391_v11 }
 0x243   :  { %v320_v40 = vsub.f32 %v318_v34, %v319_v35  ;;  %v4301_v9 = vcombine.high %v379_v5, %v383_v7  ;;  %v4300_v12 = vcombine.low %v379_v5, %v383_v7  ;;  %v4308_v16 = vcombine.low %v387_v10, %v391_v11  ;;  %v373_v34 = vld [vmem:[#allocation2 + $0x118] sm:$0xff]  ;;  %v4784_v7 = vld [vmem:[#allocation5 + $0xa4] ss:$16 sps:$4 sm:$0xff]  }
 0x244   :  { %v4280_v32 = vcombine.low %v357_v26, %v361_v27  ;;  %v4289_v33 = vcombine.high %v365_v30, %v369_v31  ;;  %v377_v35 = vld [vmem:[#allocation2 + $0x138] sm:$0xff]  ;;  %v4790_v11 = vld [vmem:[#allocation5 + $0xc4] ss:$16 sps:$4 sm:$0xff]  }
 0x245   :  { %v321_v41 = vmax.f32 %v320_v40, 0.0  ;;  %v4296_v40 = vcombine.low %v373_v34, %v377_v35  ;;  %v4779_v5 = vld [vmem:[#allocation5 + $0x88] ss:$16 sps:$4 sm:$0xff]   ;;  %v4814_v27 = vld [vmem:[#allocation5 + $0x144] ss:$16 sps:$4 sm:$0xff]  }
 0x246   :  { %v4785_v10 = vld [vmem:[#allocation5 + $0xa8] ss:$16 sps:$4 sm:$0xff]  }
 0x247   :  { %v326_v42 = vadd.f32 1e-05, %v321_v41  ;;  %v4809_v26 = vld [vmem:[#allocation5 + $0x128] ss:$16 sps:$4 sm:$0xff]  }
 0x249   :  { %5282 = vrsqrt.f32 %v326_v42  ;;  %v389_v42 = vld [vmem:[#allocation2 + $0x198] sm:$0xff] }
 0x253   :  { %v5283_v43 = vpop.eup %5282 }
 0x254   :  { %v329_v44 = vmul.f32 %v5283_v43, %v323_v36  ;;  %v328_v45 = vmul.f32 %v5283_v43, %v322_v37  ;;  %v330_v46 = vmul.f32 %v5283_v43, %v324_v38  ;;  %v331_v47 = vmul.f32 %v5283_v43, %v325_v39  ;;  %v381_v38 = vld [vmem:[#allocation2 + $0x158] sm:$0xff] }
 0x255   :  { %v4288_v36 = vcombine.low %v365_v30, %v369_v31  ;;  %v4297_v37 = vcombine.high %v373_v34, %v377_v35  ;;  %v385_v39 = vld [vmem:[#allocation2 + $0x178] sm:$0xff]  ;;  %v4820_v31 = vld [vmem:[#allocation5 + $0x164] ss:$16 sps:$4 sm:$0xff]  }
 0x256   :  { %v333_v50 = vmax.f32 %v329_v44, 0.0  ;;  %v332_v51 = vmax.f32 %v328_v45, 0.0  ;;  %v334_v52 = vmax.f32 %v330_v46, 0.0  ;;  %v335_v53 = vmax.f32 %v331_v47, 0.0  ;;  %v393_v43 = vld [vmem:[#allocation2 + $0x1b8] sm:$0xff] }
 0x257   :  { %v4305_v41 = vcombine.high %v381_v38, %v385_v39  ;;  %v4304_v44 = vcombine.low %v381_v38, %v385_v39  ;;  %v4313_v45 = vcombine.high %v389_v42, %v393_v43  ;;  %v397_v46 = vld [vmem:[#allocation2 + $0x1d8] sm:$0xff]  ;;  %v4312_v48 = vcombine.low %v389_v42, %v393_v43  ;;  %v4826_v35 = vld [vmem:[#allocation5 + $0x184] ss:$16 sps:$4 sm:$0xff]  }
 0x258   :  { %v5583_v54 = vpack.c.bf16 %v333_v50, %v332_v51  ;;  %v5585_v56 = vpack.c.bf16 %v335_v53, %v334_v52  ;;  %v401_v47 = vld [vmem:[#allocation2 + $0x1f8] sm:$0xff]  ;;  %v4754_v51 = vld [vmem:[#allocation5 + $0x4] ss:$16 sps:$4 sm:$0xff]   ;;  %v4752_v53 = vld [vmem:[#allocation5] ss:$16 sps:$4 sm:$0xff]  }
 0x259   :  { %v4321_v49 = vcombine.high %v397_v46, %v401_v47  ;;  %v4320_v50 = vcombine.low %v397_v46, %v401_v47  ;;  %v4757_v52 = vld [vmem:[#allocation5 + $0xc] ss:$16 sps:$4 sm:$0xff]   ;;  %2983 = vmatprep.subr.bf16.mxu0 %v4754_v51  ;;  %v4815_v30 = vld [vmem:[#allocation5 + $0x148] ss:$16 sps:$4 sm:$0xff]   ;;  %v4832_v39 = vld [vmem:[#allocation5 + $0x1a4] ss:$16 sps:$4 sm:$0xff]  }
 0x25a   :  { %755 = vmatmul.mubr.bf16.vlgmr.msra.gmra.mrb[4].mxu1 %v5583_v54  ;;  %861 = vmatmul.mubr.bf16.vlgmr.msra.gmra.mrb[4].mxu0 %v5583_v54  ;;  %v4821_v34 = vld [vmem:[#allocation5 + $0x168] ss:$16 sps:$4 sm:$0xff]   ;;  %v4838_v43 = vld [vmem:[#allocation5 + $0x1c4] ss:$16 sps:$4 sm:$0xff]  }
 0x25b   :  { %776 = vmatpush1.bf16.msra.mxu1 %v4260_v4  ;;  %764 = vmatprep.mubr.bf16.mxu1 %v5440_v6  ;;  %v4293_v4 = vcombine.high %v371_v1, %v375_v2  ;;  %v4773_v1 = vld [vmem:[#allocation5 + $0x68] ss:$16 sps:$4 sm:$0xff]   ;;  %v4778_v2 = vld [vmem:[#allocation5 + $0x84] ss:$16 sps:$4 sm:$0xff]  }
 0x25c   :  { %777 = vmatprep.subr.bf16.mxu1 %v4269_v55  ;;  %870 = vmatprep.mubr.bf16.mxu0 %v5440_v6  ;;  %v4755_v55 = vld [vmem:[#allocation5 + $0x8] ss:$16 sps:$4 sm:$0xff]   ;;  %v4844_v47 = vld [vmem:[#allocation5 + $0x1e4] ss:$16 sps:$4 sm:$0xff]  }
 0x25d   :  { %2984 = vmatpush1.bf16.msra.mxu0 %v4752_v53  ;;  %v4827_v38 = vld [vmem:[#allocation5 + $0x188] ss:$16 sps:$4 sm:$0xff]   ;;  %v4850_v51 = vld [vmem:[#allocation5 + $0x204] ss:$16 sps:$4 sm:$0xff]  }
 0x25e   :  { %2985 = vmatprep.subr.bf16.mxu0 %v4760_v57  ;;  %v4833_v42 = vld [vmem:[#allocation5 + $0x1a8] ss:$16 sps:$4 sm:$0xff]  }
 0x25f   :  { %778 = vmatpush1.bf16.msra.mxu1 %v4268_v59  ;;  %v4758_v59 = vld [vmem:[#allocation5 + $0x20] ss:$16 sps:$4 sm:$0xff]   ;;  %v4839_v46 = vld [vmem:[#allocation5 + $0x1c8] ss:$16 sps:$4 sm:$0xff]  }
 0x260   :  { %779 = vmatprep.subr.bf16.mxu1 %v4277_v60  ;;  %v4761_v60 = vld [vmem:[#allocation5 + $0x28] ss:$16 sps:$4 sm:$0xff]  }
 0x261   :  { %2986 = vmatpush1.bf16.msra.mxu0 %v4758_v59 }
 0x262   :  { %765 = vmatmul.mubr.bf16.gmra.mrb[8].mxu1 %v5585_v56  ;;  %871 = vmatmul.mubr.bf16.gmra.mrb[8].mxu0 %v5585_v56 }
 0x263   :  { %780 = vmatpush1.bf16.msra.mxu1 %v4276_v63  ;;  %807 = vmatprep.mubr.bf16.mxu1 %v5440_v6  ;;  %v4775_v63 = vld [vmem:[#allocation5 + $0x6c] ss:$16 sps:$4 sm:$0xff]  }
 0x264   :  { %781 = vmatprep.subr.bf16.mxu1 %v4285_v0  ;;  %v4770_v0 = vld [vmem:[#allocation5 + $0x60] ss:$16 sps:$4 sm:$0xff]  }
 0x267   :  { %782 = vmatpush1.bf16.msra.mxu1 %v4284_v3  ;;  %v4781_v3 = vld [vmem:[#allocation5 + $0x8c] ss:$16 sps:$4 sm:$0xff]  }
 0x268   :  { %783 = vmatprep.subr.bf16.mxu1 %v4293_v4  ;;  %v4776_v4 = vld [vmem:[#allocation5 + $0x80] ss:$16 sps:$4 sm:$0xff]  }
 0x26b   :  { %784 = vmatpush1.bf16.msra.mxu1 %v4292_v8  ;;  %v4787_v8 = vld [vmem:[#allocation5 + $0xac] ss:$16 sps:$4 sm:$0xff]  }
 0x26c   :  { %785 = vmatprep.subr.bf16.mxu1 %v4301_v9  ;;  %v4782_v9 = vld [vmem:[#allocation5 + $0xa0] ss:$16 sps:$4 sm:$0xff]  }
 0x26f   :  { %786 = vmatpush1.bf16.msra.mxu1 %v4300_v12  ;;  %v4793_v12 = vld [vmem:[#allocation5 + $0xcc] ss:$16 sps:$4 sm:$0xff]  }
 0x270   :  { %787 = vmatprep.subr.bf16.mxu1 %v4309_v13  ;;  %v4788_v13 = vld [vmem:[#allocation5 + $0xc0] ss:$16 sps:$4 sm:$0xff]  }
 0x273   :  { %788 = vmatpush1.bf16.msra.mxu1 %v4308_v16  ;;  %v4799_v16 = vld [vmem:[#allocation5 + $0xec] ss:$16 sps:$4 sm:$0xff]  }
 0x274   :  { %789 = vmatprep.subr.bf16.mxu1 %v4317_v17  ;;  %v4794_v17 = vld [vmem:[#allocation5 + $0xe0] ss:$16 sps:$4 sm:$0xff]  }
 0x277   :  { %790 = vmatpush1.bf16.msra.mxu1 %v4316_v20  ;;  %v4805_v20 = vld [vmem:[#allocation5 + $0x10c] ss:$16 sps:$4 sm:$0xff]  }
 0x278   :  { %881 = vmatprep.subr.bf16.mxu1 %v4265_v21  ;;  %v4800_v21 = vld [vmem:[#allocation5 + $0x100] ss:$16 sps:$4 sm:$0xff]  }
 0x27a   :  { %808 = vmatmul.mubr.bf16.vlgmr.msra.gmra.mrb[12].mxu1 %v5583_v54 }
 0x27b   :  { %882 = vmatpush1.bf16.msra.mxu1 %v4264_v24  ;;  %817 = vmatprep.mubr.bf16.mxu1 %v5440_v6  ;;  %v4811_v24 = vld [vmem:[#allocation5 + $0x12c] ss:$16 sps:$4 sm:$0xff]  }
 0x27c   :  { %883 = vmatprep.subr.bf16.mxu1 %v4273_v25  ;;  %v4806_v25 = vld [vmem:[#allocation5 + $0x120] ss:$16 sps:$4 sm:$0xff]  }
 0x27f   :  { %884 = vmatpush1.bf16.msra.mxu1 %v4272_v28  ;;  %v4817_v28 = vld [vmem:[#allocation5 + $0x14c] ss:$16 sps:$4 sm:$0xff]  }
 0x280   :  { %885 = vmatprep.subr.bf16.mxu1 %v4281_v29  ;;  %v4812_v29 = vld [vmem:[#allocation5 + $0x140] ss:$16 sps:$4 sm:$0xff]  }
 0x282   :  { %818 = vmatmul.mubr.bf16.gmra.mrb[16].mxu1 %v5585_v56 }
 0x283   :  { %886 = vmatpush1.bf16.msra.mxu1 %v4280_v32  ;;  %913 = vmatprep.mubr.bf16.mxu1 %v5440_v6  ;;  %v4823_v32 = vld [vmem:[#allocation5 + $0x16c] ss:$16 sps:$4 sm:$0xff]  }
 0x284   :  { %887 = vmatprep.subr.bf16.mxu1 %v4289_v33  ;;  %v4818_v33 = vld [vmem:[#allocation5 + $0x160] ss:$16 sps:$4 sm:$0xff]  }
 0x287   :  { %888 = vmatpush1.bf16.msra.mxu1 %v4288_v36  ;;  %v4829_v36 = vld [vmem:[#allocation5 + $0x18c] ss:$16 sps:$4 sm:$0xff]  }
 0x288   :  { %889 = vmatprep.subr.bf16.mxu1 %v4297_v37  ;;  %v4824_v37 = vld [vmem:[#allocation5 + $0x180] ss:$16 sps:$4 sm:$0xff]  }
 0x28b   :  { %890 = vmatpush1.bf16.msra.mxu1 %v4296_v40  ;;  %v4835_v40 = vld [vmem:[#allocation5 + $0x1ac] ss:$16 sps:$4 sm:$0xff]  }
 0x28c   :  { %891 = vmatprep.subr.bf16.mxu1 %v4305_v41  ;;  %v4830_v41 = vld [vmem:[#allocation5 + $0x1a0] ss:$16 sps:$4 sm:$0xff]  }
 0x28f   :  { %892 = vmatpush1.bf16.msra.mxu1 %v4304_v44  ;;  %v4841_v44 = vld [vmem:[#allocation5 + $0x1cc] ss:$16 sps:$4 sm:$0xff]  }
 0x290   :  { %893 = vmatprep.subr.bf16.mxu1 %v4313_v45  ;;  %v4836_v45 = vld [vmem:[#allocation5 + $0x1c0] ss:$16 sps:$4 sm:$0xff]  }
 0x293   :  { %894 = vmatpush1.bf16.msra.mxu1 %v4312_v48  ;;  %v4847_v48 = vld [vmem:[#allocation5 + $0x1ec] ss:$16 sps:$4 sm:$0xff]  }
 0x294   :  { %895 = vmatprep.subr.bf16.mxu1 %v4321_v49  ;;  %v4842_v49 = vld [vmem:[#allocation5 + $0x1e0] ss:$16 sps:$4 sm:$0xff]  }
 0x297   :  { %896 = vmatpush1.bf16.msra.mxu1 %v4320_v50  ;;  %v4845_v50 = vld [vmem:[#allocation5 + $0x1e8] ss:$16 sps:$4 sm:$0xff]  }
 0x298   :  { %3147 = vmatprep.subr.bf16.mxu1 %v4757_v52  ;;  %v4853_v52 = vld [vmem:[#allocation5 + $0x20c] ss:$16 sps:$4 sm:$0xff]  }
 0x29a   :  { %914 = vmatmul.mubr.bf16.vlgmr.msra.gmra.mrb[20].mxu1 %v5583_v54  ;;  %v4766_v54 = vld [vmem:[#allocation5 + $0x44] ss:$16 sps:$4 sm:$0xff]  }
 0x29b   :  { %923 = vmatprep.mubr.bf16.mxu1 %v5440_v6  ;;  %3148 = vmatpush1.bf16.msra.mxu1 %v4755_v55  ;;  %v4769_v6 = vld [vmem:[#allocation5 + $0x4c] ss:$16 sps:$4 sm:$0xff]  }
 0x29c   :  { %3149 = vmatprep.subr.bf16.mxu1 %v4763_v58  ;;  %2987 = vmatprep.subr.bf16.mxu0 %v4766_v54 }
 0x29d   :  { %2988 = vmatpush1.bf16.msra.mxu0 %v4764_v61 }
 0x29e   :  { %2989 = vmatprep.subr.bf16.mxu0 %v4772_v62 }
 0x29f   :  { %3150 = vmatpush1.bf16.msra.mxu1 %v4761_v60 }
 0x2a0   :  { %3151 = vmatprep.subr.bf16.mxu1 %v4769_v6 }
 0x2a1   :  { %2990 = vmatpush1.bf16.msra.mxu0 %v4770_v0 }
 0x2a2   :  { %924 = vmatmul.mubr.bf16.gmra.mrb[24].mxu1 %v5585_v56  ;;  %v4767_v56 = vld [vmem:[#allocation5 + $0x48] ss:$16 sps:$4 sm:$0xff]   ;;  %2991 = vmatprep.subr.bf16.mxu0 %v4778_v2 }
 0x2a3   :  { %3152 = vmatpush1.bf16.msra.mxu1 %v4767_v56 }
 0x2a4   :  { %3153 = vmatprep.subr.bf16.mxu1 %v4775_v63 }
 0x2a5   :  { %2992 = vmatpush1.bf16.msra.mxu0 %v4776_v4 }
 0x2a6   :  { %2993 = vmatprep.subr.bf16.mxu0 %v4784_v7 }
 0x2a7   :  { %3154 = vmatpush1.bf16.msra.mxu1 %v4773_v1 }
 0x2a8   :  { %3155 = vmatprep.subr.bf16.mxu1 %v4781_v3 }
 0x2a9   :  { %2994 = vmatpush1.bf16.msra.mxu0 %v4782_v9 }
 0x2aa   :  { %2995 = vmatprep.subr.bf16.mxu0 %v4790_v11 }
 0x2ab   :  { %3156 = vmatpush1.bf16.msra.mxu1 %v4779_v5 }
 0x2ac   :  { %3157 = vmatprep.subr.bf16.mxu1 %v4787_v8 }
 0x2ad   :  { %2996 = vmatpush1.bf16.msra.mxu0 %v4788_v13 }
 0x2ae   :  { %2997 = vmatprep.subr.bf16.mxu0 %v4796_v15 }
 0x2af   :  { %3158 = vmatpush1.bf16.msra.mxu1 %v4785_v10 }
 0x2b0   :  { %3159 = vmatprep.subr.bf16.mxu1 %v4793_v12 }
 0x2b1   :  { %2998 = vmatpush1.bf16.msra.mxu0 %v4794_v17 }
 0x2b2   :  { %2999 = vmatprep.subr.bf16.mxu0 %v4802_v19 }
 0x2b3   :  { %3160 = vmatpush1.bf16.msra.mxu1 %v4791_v14 }
 0x2b4   :  { %3161 = vmatprep.subr.bf16.mxu1 %v4799_v16 }
 0x2b5   :  { %3000 = vmatpush1.bf16.msra.mxu0 %v4800_v21 }
 0x2b6   :  { %3001 = vmatprep.subr.bf16.mxu0 %v4808_v23 }
 0x2b7   :  { %3162 = vmatpush1.bf16.msra.mxu1 %v4797_v18 }
 0x2b8   :  { %3163 = vmatprep.subr.bf16.mxu1 %v4805_v20 }
 0x2b9   :  { %3002 = vmatpush1.bf16.msra.mxu0 %v4806_v25 }
 0x2ba   :  { %3003 = vmatprep.subr.bf16.mxu0 %v4814_v27 }
 0x2bb   :  { %3164 = vmatpush1.bf16.msra.mxu1 %v4803_v22 }
 0x2bc   :  { %3165 = vmatprep.subr.bf16.mxu1 %v4811_v24 }
 0x2bd   :  { %3004 = vmatpush1.bf16.msra.mxu0 %v4812_v29 }
 0x2be   :  { %3005 = vmatprep.subr.bf16.mxu0 %v4820_v31 }
 0x2bf   :  { %3166 = vmatpush1.bf16.msra.mxu1 %v4809_v26 }
 0x2c0   :  { %3167 = vmatprep.subr.bf16.mxu1 %v4817_v28 }
 0x2c1   :  { %3006 = vmatpush1.bf16.msra.mxu0 %v4818_v33 }
 0x2c2   :  { %3007 = vmatprep.subr.bf16.mxu0 %v4826_v35 }
 0x2c3   :  { %3168 = vmatpush1.bf16.msra.mxu1 %v4815_v30 }
 0x2c4   :  { %3169 = vmatprep.subr.bf16.mxu1 %v4823_v32 }
 0x2c5   :  { %3008 = vmatpush1.bf16.msra.mxu0 %v4824_v37 }
 0x2c6   :  { %3009 = vmatprep.subr.bf16.mxu0 %v4832_v39 }
 0x2c7   :  { %3170 = vmatpush1.bf16.msra.mxu1 %v4821_v34 }
 0x2c8   :  { %3171 = vmatprep.subr.bf16.mxu1 %v4829_v36 }
 0x2c9   :  { %3010 = vmatpush1.bf16.msra.mxu0 %v4830_v41 }
 0x2ca   :  { %3011 = vmatprep.subr.bf16.mxu0 %v4838_v43 }
 0x2cb   :  { %3172 = vmatpush1.bf16.msra.mxu1 %v4827_v38 }
 0x2cc   :  { %3173 = vmatprep.subr.bf16.mxu1 %v4835_v40 }
 0x2cd   :  { %3012 = vmatpush1.bf16.msra.mxu0 %v4836_v45 }
 0x2ce   :  { %3013 = vmatprep.subr.bf16.mxu0 %v4844_v47 }
 0x2cf   :  { %3174 = vmatpush1.bf16.msra.mxu1 %v4833_v42 }
 0x2d0   :  { %3175 = vmatprep.subr.bf16.mxu1 %v4841_v44 }
 0x2d1   :  { %3014 = vmatpush1.bf16.msra.mxu0 %v4842_v49 }
 0x2d2   :  { %3024 = vmatprep.subr.bf16.mxu0 %v4850_v51 }
 0x2d3   :  { %3176 = vmatpush1.bf16.msra.mxu1 %v4839_v46 }
 0x2d4   :  { %3177 = vmatprep.subr.bf16.mxu1 %v4847_v48 }
 0x2d7   :  { %3178 = vmatpush1.bf16.msra.mxu1 %v4845_v50 }
 0x2d8   :  { %3188 = vmatprep.subr.bf16.mxu1 %v4853_v52 }
 0x32d   :  { %v5601_v53 = vpop.f32.mrb[4].mxu1  ;;  %v5603_v55 = vpop.f32.mrb[4].mxu0 }
 0x32e   :  { %v5605_v57 = vpop.f32.mrb[5].mxu1  ;;  %v5607_v58 = vpop.f32.mrb[5].mxu0  ;;  %v1006_v59 = vmul.f32 %v5601_v53, %v5601_v53  ;;  %v1010_v60 = vmul.f32 %v5603_v55, %v5603_v55 }
 0x32f   :  { %v1007_v54 = vmul.f32 %v5605_v57, %v5605_v57  ;;  %v1011_v6 = vmul.f32 %v5607_v58, %v5607_v58  ;;  %v5617_v61 = vpop.f32.mrb[6].mxu1  ;;  %v5619_v56 = vpop.f32.mrb[6].mxu0 }
 0x330   :  { %v934_v62 = vadd.f32 %v5617_v61, %v5601_v53  ;;  %v1014_v63 = vmul.f32 %v5617_v61, %v5617_v61  ;;  %v970_v0 = vadd.f32 %v5619_v56, %v5603_v55  ;;  %v1018_v1 = vmul.f32 %v5619_v56, %v5619_v56  ;;  %v5629_v2 = vpop.f32.mrb[7].mxu1  ;;  %v5631_v3 = vpop.f32.mrb[7].mxu0 }
 0x331   :  { %v943_v4 = vadd.f32 %v5629_v2, %v5605_v57  ;;  %v1015_v5 = vmul.f32 %v5629_v2, %v5629_v2  ;;  %v979_v7 = vadd.f32 %v5631_v3, %v5607_v58  ;;  %v1019_v8 = vmul.f32 %v5631_v3, %v5631_v3 }
 0x332   :  { %v1038_v9 = vadd.f32 %v1014_v63, %v1006_v59  ;;  %v1074_v10 = vadd.f32 %v1018_v1, %v1010_v60 }
 0x333   :  { %v1047_v11 = vadd.f32 %v1015_v5, %v1007_v54  ;;  %v1083_v12 = vadd.f32 %v1019_v8, %v1011_v6 }
 0x335   :  { %v5641_v13 = vpop.f32.mrb[8].mxu1  ;;  %v5643_v14 = vpop.f32.mrb[8].mxu0 }
 0x336   :  { %v935_v15 = vadd.f32 %v934_v62, %v5641_v13  ;;  %v1022_v16 = vmul.f32 %v5641_v13, %v5641_v13  ;;  %v971_v17 = vadd.f32 %v970_v0, %v5643_v14  ;;  %v1026_v18 = vmul.f32 %v5643_v14, %v5643_v14  ;;  %v5651_v19 = vpop.f32.mrb[9].mxu1  ;;  %v5653_v20 = vpop.f32.mrb[9].mxu0 }
 0x337   :  { %v944_v21 = vadd.f32 %v943_v4, %v5651_v19  ;;  %v1023_v22 = vmul.f32 %v5651_v19, %v5651_v19  ;;  %v980_v23 = vadd.f32 %v979_v7, %v5653_v20  ;;  %v1027_v24 = vmul.f32 %v5653_v20, %v5653_v20  ;;  %v5661_v25 = vpop.f32.mrb[10].mxu1  ;;  %v5663_v26 = vpop.f32.mrb[10].mxu0 }
 0x338   :  { %v1039_v27 = vadd.f32 %v1038_v9, %v1022_v16  ;;  %v1075_v28 = vadd.f32 %v1074_v10, %v1026_v18  ;;  %v936_v29 = vadd.f32 %v935_v15, %v5661_v25  ;;  %v1030_v30 = vmul.f32 %v5661_v25, %v5661_v25  ;;  %v5668_v31 = vpop.f32.mrb[11].mxu1  ;;  %v5670_v32 = vpop.f32.mrb[11].mxu0 }
 0x339   :  { %v1048_v33 = vadd.f32 %v1047_v11, %v1023_v22  ;;  %v1084_v34 = vadd.f32 %v1083_v12, %v1027_v24  ;;  %v972_v35 = vadd.f32 %v971_v17, %v5663_v26  ;;  %v1034_v36 = vmul.f32 %v5663_v26, %v5663_v26 }
 0x33a   :  { %v937_v37 = vrot.slane %v936_v29, 4  ;;  %v1040_v38 = vadd.f32 %v1039_v27, %v1030_v30  ;;  %v945_v39 = vadd.f32 %v944_v21, %v5668_v31  ;;  %v1031_v40 = vmul.f32 %v5668_v31, %v5668_v31 }
 0x33b   :  { %v973_v41 = vrot.slane %v972_v35, 4  ;;  %v1076_v42 = vadd.f32 %v1075_v28, %v1034_v36  ;;  %v981_v43 = vadd.f32 %v980_v23, %v5670_v32  ;;  %v1035_v44 = vmul.f32 %v5670_v32, %v5670_v32 }
 0x33c   :  { %v938_v45 = vadd.f32 %v937_v37, %v936_v29  ;;  %v1041_v46 = vrot.slane %v1040_v38, 4  ;;  %v946_v47 = vrot.slane %v945_v39, 4  ;;  %v1049_v48 = vadd.f32 %v1048_v33, %v1031_v40 }
 0x33d   :  { %v974_v49 = vadd.f32 %v973_v41, %v972_v35  ;;  %v1077_v50 = vrot.slane %v1076_v42, 4  ;;  %v982_v51 = vrot.slane %v981_v43, 4  ;;  %v1085_v52 = vadd.f32 %v1084_v34, %v1035_v44 }
 0x33e   :  { %v939_v59 = vrot.slane %v938_v45, 2  ;;  %v1042_v60 = vadd.f32 %v1041_v46, %v1040_v38  ;;  %v947_v54 = vadd.f32 %v946_v47, %v945_v39  ;;  %v1050_v6 = vrot.slane %v1049_v48, 4 }
 0x33f   :  { %v975_v62 = vrot.slane %v974_v49, 2  ;;  %v1078_v63 = vadd.f32 %v1077_v50, %v1076_v42  ;;  %v983_v0 = vadd.f32 %v982_v51, %v981_v43  ;;  %v1086_v1 = vrot.slane %v1085_v52, 4 }
 0x340   :  { %v940_v4 = vadd.f32 %v939_v59, %v938_v45  ;;  %v1043_v5 = vrot.slane %v1042_v60, 2  ;;  %v948_v7 = vrot.slane %v947_v54, 2  ;;  %v1051_v8 = vadd.f32 %v1050_v6, %v1049_v48 }
 0x341   :  { %v976_v9 = vadd.f32 %v975_v62, %v974_v49  ;;  %v1079_v10 = vrot.slane %v1078_v63, 2  ;;  %v984_v11 = vrot.slane %v983_v0, 2  ;;  %v1087_v12 = vadd.f32 %v1086_v1, %v1085_v52 }
 0x342   :  { %v941_v15 = vrot.slane %v940_v4, 1  ;;  %v1044_v16 = vadd.f32 %v1043_v5, %v1042_v60  ;;  %v949_v17 = vadd.f32 %v948_v7, %v947_v54  ;;  %v1052_v18 = vrot.slane %v1051_v8, 2 }
 0x343   :  { %v977_v21 = vrot.slane %v976_v9, 1  ;;  %v1080_v22 = vadd.f32 %v1079_v10, %v1078_v63  ;;  %v985_v23 = vadd.f32 %v984_v11, %v983_v0  ;;  %v1088_v24 = vrot.slane %v1087_v12, 2 }
 0x344   :  { %v942_v27 = vadd.f32 %v941_v15, %v940_v4  ;;  %v1045_v28 = vrot.slane %v1044_v16, 1  ;;  %v950_v29 = vrot.slane %v949_v17, 1  ;;  %v1053_v30 = vadd.f32 %v1052_v18, %v1051_v8 }
 0x345   :  { %v978_v33 = vadd.f32 %v977_v21, %v976_v9  ;;  %v1081_v34 = vrot.slane %v1080_v22, 1  ;;  %v986_v35 = vrot.slane %v985_v23, 1  ;;  %v1089_v36 = vadd.f32 %v1088_v24, %v1087_v12 }
 0x346   :  { %v1046_v37 = vadd.f32 %v1045_v28, %v1044_v16  ;;  %v5681_v38 = vmul.f32 0.03125, %v942_v27  ;;  %v951_v39 = vadd.f32 %v950_v29, %v949_v17  ;;  %v1054_v40 = vrot.slane %v1053_v30, 1 }
 0x347   :  { %v1082_v41 = vadd.f32 %v1081_v34, %v1080_v22  ;;  %v5683_v42 = vmul.f32 0.03125, %v978_v33  ;;  %v987_v43 = vadd.f32 %v986_v35, %v985_v23  ;;  %v1090_v44 = vrot.slane %v1089_v36, 1 }
 0x348   :  { %v1118_v45 = vmul.f32 0.03125, %v1046_v37  ;;  %v1126_v46 = vmul.f32 %v5681_v38, %v5681_v38  ;;  %v1150_v47 = vsub.f32 %v5601_v53, %v5681_v38  ;;  %v1158_v48 = vsub.f32 %v5617_v61, %v5681_v38 }
 0x349   :  { %v1166_v49 = vsub.f32 %v5641_v13, %v5681_v38  ;;  %v1174_v50 = vsub.f32 %v5661_v25, %v5681_v38  ;;  %v1122_v51 = vmul.f32 0.03125, %v1082_v41  ;;  %v1130_v52 = vmul.f32 %v5683_v42, %v5683_v42 }
 0x34a   :  { %v1134_v59 = vsub.f32 %v1118_v45, %v1126_v46  ;;  %v1170_v6 = vsub.f32 %v5643_v14, %v5683_v42  ;;  %v1178_v63 = vsub.f32 %v5663_v26, %v5683_v42  ;;  %v1055_v0 = vadd.f32 %v1054_v40, %v1053_v30 }
 0x34b   :  { %v1138_v62 = vsub.f32 %v1122_v51, %v1130_v52  ;;  %v5705_v1 = vmul.f32 0.03125, %v951_v39  ;;  %v1091_v5 = vadd.f32 %v1090_v44, %v1089_v36  ;;  %v5707_v7 = vmul.f32 0.03125, %v987_v43 }
 0x34c   :  { %v1142_v4 = vmax.f32 %v1134_v59, 0.0  ;;  %v1119_v9 = vmul.f32 0.03125, %v1055_v0 }
 0x34d   :  { %v1146_v8 = vmax.f32 %v1138_v62, 0.0  ;;  %v1127_v10 = vmul.f32 %v5705_v1, %v5705_v1  ;;  %v1167_v11 = vsub.f32 %v5651_v19, %v5705_v1  ;;  %v5713_v12 = vpop.f32.mrb[12].mxu1  ;;  %v1175_v16 = vsub.f32 %v5668_v31, %v5705_v1 }
 0x34e   :  { %v1182_v15 = vadd.f32 1e-05, %v1142_v4  ;;  %v1123_v17 = vmul.f32 0.03125, %v1091_v5  ;;  %v1131_v18 = vmul.f32 %v5707_v7, %v5707_v7  ;;  %v5719_v21 = vpop.f32.mrb[13].mxu1  ;;  %v1171_v24 = vsub.f32 %v5653_v20, %v5707_v7 }
 0x34f   :  { %v1186_v22 = vadd.f32 1e-05, %v1146_v8  ;;  %v1135_v23 = vsub.f32 %v1119_v9, %v1127_v10  ;;  %v1179_v27 = vsub.f32 %v5670_v32, %v5707_v7  ;;  %v5725_v28 = vpop.f32.mrb[14].mxu1  ;;  %v1008_v30 = vmul.f32 %v5713_v12, %v5713_v12 }
 0x350   :  { %5284 = vrsqrt.f32 %v1182_v15  ;;  %v1139_v29 = vsub.f32 %v1123_v17, %v1131_v18  ;;  %v1009_v33 = vmul.f32 %v5719_v21, %v5719_v21  ;;  %v5731_v34 = vpop.f32.mrb[15].mxu1  ;;  %v952_v36 = vadd.f32 %v5725_v28, %v5713_v12 }
 0x351   :  { %5286 = vrsqrt.f32 %v1186_v22  ;;  %v1143_v35 = vmax.f32 %v1135_v23, 0.0  ;;  %v1016_v37 = vmul.f32 %v5725_v28, %v5725_v28  ;;  %v961_v40 = vadd.f32 %v5731_v34, %v5719_v21 }
 0x352   :  { %v1147_v39 = vmax.f32 %v1139_v29, 0.0  ;;  %v1017_v41 = vmul.f32 %v5731_v34, %v5731_v34  ;;  %v1151_v43 = vsub.f32 %v5605_v57, %v5705_v1  ;;  %v1159_v46 = vsub.f32 %v5629_v2, %v5705_v1 }
 0x353   :  { %v1183_v44 = vadd.f32 1e-05, %v1143_v35  ;;  %v1056_v45 = vadd.f32 %v1016_v37, %v1008_v30  ;;  %v1155_v51 = vsub.f32 %v5607_v58, %v5707_v7  ;;  %v1163_v62 = vsub.f32 %v5631_v3, %v5707_v7 }
 0x354   :  { %v1187_v52 = vadd.f32 1e-05, %v1147_v39  ;;  %v1065_v59 = vadd.f32 %v1017_v41, %v1009_v33 }
 0x355   :  { %5288 = vrsqrt.f32 %v1183_v44  ;;  %v5749_v0 = vpop.f32.mrb[16].mxu1 }
 0x356   :  { %5290 = vrsqrt.f32 %v1187_v52  ;;  %v953_v4 = vadd.f32 %v952_v36, %v5749_v0  ;;  %v1024_v5 = vmul.f32 %v5749_v0, %v5749_v0  ;;  %v5754_v8 = vpop.f32.mrb[17].mxu1 }
 0x357   :  { %v962_v9 = vadd.f32 %v961_v40, %v5754_v8  ;;  %v1025_v10 = vmul.f32 %v5754_v8, %v5754_v8  ;;  %v5759_v15 = vpop.f32.mrb[18].mxu1 }
 0x358   :  { %v1057_v17 = vadd.f32 %v1056_v45, %v1024_v5  ;;  %v954_v18 = vadd.f32 %v953_v4, %v5759_v15  ;;  %v1032_v22 = vmul.f32 %v5759_v15, %v5759_v15  ;;  %v5764_v23 = vpop.f32.mrb[19].mxu1 }
 0x359   :  { %v1066_v29 = vadd.f32 %v1065_v59, %v1025_v10  ;;  %v963_v30 = vadd.f32 %v962_v9, %v5764_v23  ;;  %v1033_v37 = vmul.f32 %v5764_v23, %v5764_v23 }
 0x35a   :  { %v5285_v33 = vpop.eup %5284  ;;  %v955_v35 = vrot.slane %v954_v18, 4  ;;  %v1058_v36 = vadd.f32 %v1057_v17, %v1032_v22 }
 0x35b   :  { %v5769_v39 = vpop.eup %5286  ;;  %v1198_v40 = vmul.f32 %v5285_v33, %v1150_v47  ;;  %v1206_v41 = vmul.f32 %v5285_v33, %v1158_v48  ;;  %v1214_v44 = vmul.f32 %v5285_v33, %v1166_v49  ;;  %v1222_v45 = vmul.f32 %v5285_v33, %v1174_v50 }
 0x35c   :  { %v1218_v52 = vmul.f32 %v5769_v39, %v1170_v6  ;;  %v1226_v53 = vmul.f32 %v5769_v39, %v1178_v63  ;;  %v956_v61 = vadd.f32 %v955_v35, %v954_v18  ;;  %v1059_v47 = vrot.slane %v1058_v36, 4 }
 0x35d   :  { %v1230_v48 = vmax.f32 %v1198_v40, 0.0  ;;  %v1238_v59 = vmax.f32 %v1206_v41, 0.0  ;;  %v1246_v13 = vmax.f32 %v1214_v44, 0.0  ;;  %v1254_v49 = vmax.f32 %v1222_v45, 0.0 }
 0x35e   :  { %v1250_v4 = vmax.f32 %v1218_v52, 0.0  ;;  %v1258_v5 = vmax.f32 %v1226_v53, 0.0  ;;  %v957_v25 = vrot.slane %v956_v61, 2  ;;  %v1060_v38 = vadd.f32 %v1059_v47, %v1058_v36 }
 0x35f   :  { %v5289_v50 = vpop.eup %5288  ;;  %v1318_v9 = vmax.f32 %v1246_v13, %v1254_v49  ;;  %v964_v14 = vrot.slane %v963_v30, 4  ;;  %v1067_v10 = vadd.f32 %v1066_v29, %v1033_v37  ;;  %v5791_v6 = vmax.f32 %v1230_v48, %v1238_v59 }
 0x360   :  { %v5793_v17 = vpop.eup %5290  ;;  %v1346_v26 = vmax.f32 %v1250_v4, %v1258_v5  ;;  %v1215_v63 = vmul.f32 %v5289_v50, %v1167_v11  ;;  %v1223_v18 = vmul.f32 %v5289_v50, %v1175_v16  ;;  %v958_v22 = vadd.f32 %v957_v25, %v956_v61 }
 0x361   :  { %v1319_v33 = vrot.slane %v1318_v9, 4  ;;  %v1219_v29 = vmul.f32 %v5793_v17, %v1171_v24  ;;  %v1227_v35 = vmul.f32 %v5793_v17, %v1179_v27  ;;  %v1061_v36 = vrot.slane %v1060_v38, 2 }
 0x362   :  { %v1347_v37 = vrot.slane %v1346_v26, 4  ;;  %v1247_v19 = vmax.f32 %v1215_v63, 0.0  ;;  %v1255_v11 = vmax.f32 %v1223_v18, 0.0  ;;  %v959_v40 = vrot.slane %v958_v22, 1 }
 0x363   :  { %v1320_v41 = vmax.f32 %v1318_v9, %v1319_v33  ;;  %v1251_v31 = vmax.f32 %v1219_v29, 0.0  ;;  %v1259_v16 = vmax.f32 %v1227_v35, 0.0  ;;  %v1062_v44 = vadd.f32 %v1061_v36, %v1060_v38 }
 0x364   :  { %v1325_v45 = vmax.f32 %v1247_v19, %v1255_v11  ;;  %v960_v52 = vadd.f32 %v959_v40, %v958_v22  ;;  %v965_v53 = vadd.f32 %v964_v14, %v963_v30  ;;  %v1068_v47 = vrot.slane %v1067_v10, 4 }
 0x365   :  { %v1321_v20 = vrot.slane %v1320_v41, 2  ;;  %v1353_v61 = vmax.f32 %v1251_v31, %v1259_v16  ;;  %v1063_v24 = vrot.slane %v1062_v44, 1  ;;  %v5809_v48 = vmax.f32 %v1346_v26, %v1347_v37 }
 0x366   :  { %v1326_v32 = vrot.slane %v1325_v45, 4  ;;  %v5811_v27 = vmul.f32 0.03125, %v960_v52  ;;  %v966_v4 = vrot.slane %v965_v53, 2  ;;  %v1069_v38 = vadd.f32 %v1068_v47, %v1067_v10 }
 0x367   :  { %v1322_v59 = vmax.f32 %v1320_v41, %v1321_v20  ;;  %v1354_v13 = vrot.slane %v1353_v61, 4  ;;  %v1064_v49 = vadd.f32 %v1063_v24, %v1062_v44  ;;  %v1199_v11 = vmul.f32 %v5289_v50, %v1151_v43 }
 0x368   :  { %v1327_v5 = vmax.f32 %v1325_v45, %v1326_v32  ;;  %v1128_v25 = vmul.f32 %v5811_v27, %v5811_v27  ;;  %v1152_v30 = vsub.f32 %v5713_v12, %v5811_v27  ;;  %v1160_v63 = vsub.f32 %v5725_v28, %v5811_v27 }
 0x369   :  { %v1323_v9 = vrot.slane %v1322_v59, 1  ;;  %v5817_v14 = vmax.f32 %v1353_v61, %v1354_v13  ;;  %v1120_v26 = vmul.f32 0.03125, %v1064_v49  ;;  %v1168_v33 = vsub.f32 %v5749_v0, %v5811_v27 }
 0x36a   :  { %v1328_v22 = vrot.slane %v1327_v5, 2  ;;  %v1176_v29 = vsub.f32 %v5759_v15, %v5811_v27  ;;  %v967_v37 = vadd.f32 %v966_v4, %v965_v53  ;;  %v1070_v19 = vrot.slane %v1069_v38, 2 }
 0x36b   :  { %v1324_v35 = vmax.f32 %v1322_v59, %v1323_v9  ;;  %v1136_v10 = vsub.f32 %v1120_v26, %v1128_v25  ;;  %v1207_v40 = vmul.f32 %v5289_v50, %v1159_v46  ;;  %v1263_v52 = vrot.slane %v5791_v6, 4 }
 0x36c   :  { %v1329_v41 = vmax.f32 %v1327_v5, %v1328_v22  ;;  %v968_v44 = vrot.slane %v967_v37, 1  ;;  %v1071_v20 = vadd.f32 %v1070_v19, %v1069_v38  ;;  %v1231_v57 = vmax.f32 %v1199_v11, 0.0 }
 0x36d   :  { %v1382_v31 = vpack.c.bf16 %v1324_v35, %v1324_v35  ;;  %v1144_v16 = vmax.f32 %v1136_v10, 0.0  ;;  %v5833_v45 = vpop.f32.mrb[20].mxu1  ;;  %v1239_v43 = vmax.f32 %v1207_v40, 0.0 }
 0x36e   :  { %v1012_v53 = vmul.f32 %v5833_v45, %v5833_v45  ;;  %v5838_v61 = vpop.f32.mrb[21].mxu1  ;;  %v969_v1 = vadd.f32 %v968_v44, %v967_v37  ;;  %v1072_v47 = vrot.slane %v1071_v20, 1  ;;  %v1330_v22 = vrot.slane %v1329_v41, 1 }
 0x36f   :  { %v5840_v24 = vunpack.c.l.b16 %v1382_v31  ;;  %v1184_v2 = vadd.f32 1e-05, %v1144_v16  ;;  %v1013_v46 = vmul.f32 %v5838_v61, %v5838_v61  ;;  %v5844_v50 = vpop.f32.mrb[22].mxu1  ;;  %v1269_v49 = vmax.f32 %v1231_v57, %v1239_v43 }
 0x370   :  { %v988_v32 = vadd.f32 %v5844_v50, %v5833_v45  ;;  %v1020_v59 = vmul.f32 %v5844_v50, %v5844_v50  ;;  %v5850_v13 = vpop.f32.mrb[23].mxu1  ;;  %v5852_v4 = vmul.f32 0.03125, %v969_v1  ;;  %v1073_v38 = vadd.f32 %v1072_v47, %v1071_v20 }
 0x371   :  { %5292 = vrsqrt.f32 %v1184_v2  ;;  %v997_v5 = vadd.f32 %v5850_v13, %v5838_v61  ;;  %v1021_v25 = vmul.f32 %v5850_v13, %v5850_v13  ;;  %v1270_v26 = vrot.slane %v1269_v49, 4 }
 0x372   :  { %v1092_v9 = vadd.f32 %v1020_v59, %v1012_v53  ;;  %v1129_v35 = vmul.f32 %v5852_v4, %v5852_v4  ;;  %v1169_v10 = vsub.f32 %v5754_v8, %v5852_v4  ;;  %v1177_v37 = vsub.f32 %v5764_v23, %v5852_v4 }
 0x373   :  { %v1101_v19 = vadd.f32 %v1021_v25, %v1013_v46  ;;  %v1121_v11 = vmul.f32 0.03125, %v1073_v38  ;;  %v1271_v40 = vmax.f32 %v1269_v49, %v1270_v26  ;;  %v1331_v31 = vmax.f32 %v1329_v41, %v1330_v22 }
 0x374   :  { %v1264_v16 = vmax.f32 %v5791_v6, %v1263_v52  ;;  %v1153_v20 = vsub.f32 %v5719_v21, %v5852_v4  ;;  %v1161_v53 = vsub.f32 %v5731_v34, %v5852_v4  ;;  %v5875_v57 = vmul.f32 %v5793_v17, %v1155_v51 }
 0x375   :  { %v5865_v44 = vpop.f32.mrb[24].mxu1  ;;  %v5881_v41 = vmul.f32 %v5793_v17, %v1163_v62  ;;  %v1137_v6 = vsub.f32 %v1121_v11, %v1129_v35  ;;  %v1272_v1 = vrot.slane %v1271_v40, 2  ;;  %v1383_v46 = vpack.c.bf16 %v1331_v31, %v1331_v31 }
 0x376   :  { %v989_v52 = vadd.f32 %v988_v32, %v5865_v44  ;;  %v1028_v43 = vmul.f32 %v5865_v44, %v5865_v44  ;;  %v5886_v2 = vpop.f32.mrb[25].mxu1  ;;  %v1265_v7 = vrot.slane %v1264_v16, 2  ;;  %v6100_v4 = vrot.slane %v5809_v48, 2 }
 0x377   :  { %v998_v58 = vadd.f32 %v997_v5, %v5886_v2  ;;  %v1029_v51 = vmul.f32 %v5886_v2, %v5886_v2  ;;  %v5891_v3 = vpop.f32.mrb[26].mxu1  ;;  %v1145_v62 = vmax.f32 %v1137_v6, 0.0  ;;  %v1273_v47 = vmax.f32 %v1271_v40, %v1272_v1 }
 0x378   :  { %v1093_v17 = vadd.f32 %v1092_v9, %v1028_v43  ;;  %v990_v32 = vadd.f32 %v989_v52, %v5891_v3  ;;  %v5894_v59 = vpop.f32.mrb[27].mxu1  ;;  %v1671_v25 = vunpack.c.l.b16 %v1383_v46  ;;  %v1036_v5 = vmul.f32 %v5891_v3, %v5891_v3 }
 0x379   :  { %v1102_v49 = vadd.f32 %v1101_v19, %v1029_v51  ;;  %v1266_v38 = vmax.f32 %v1264_v16, %v1265_v7  ;;  %v1185_v26 = vadd.f32 1e-05, %v1145_v62  ;;  %v1274_v22 = vrot.slane %v1273_v47, 1 }
 0x37a   :  { %v991_v35 = vrot.slane %v990_v32, 4  ;;  %v999_v11 = vadd.f32 %v998_v58, %v5894_v59  ;;  %v1094_v54 = vadd.f32 %v1093_v17, %v1036_v5  ;;  %v1037_v9 = vmul.f32 %v5894_v59, %v5894_v59 }
 0x37b   :  { %v5293_v31 = vpop.eup %5292  ;;  %v1267_v6 = vrot.slane %v1266_v38, 1  ;;  %5294 = vrsqrt.f32 %v1185_v26  ;;  %v1275_v52 = vmax.f32 %v1273_v47, %v1274_v22 }
 0x37c   :  { %v1216_v19 = vmul.f32 %v5293_v31, %v1168_v33  ;;  %v1224_v16 = vmul.f32 %v5293_v31, %v1176_v29  ;;  %v992_v43 = vadd.f32 %v991_v35, %v990_v32  ;;  %v1095_v1 = vrot.slane %v1094_v54, 4 }
 0x37d   :  { %v1268_v58 = vmax.f32 %v1266_v38, %v1267_v6  ;;  %v1000_v51 = vrot.slane %v999_v11, 4  ;;  %v1375_v62 = vpack.c.bf16 %v1275_v52, %v1275_v52  ;;  %v1103_v17 = vadd.f32 %v1102_v49, %v1037_v9  ;;  %v4851_v6 = vld [vmem:[#allocation5 + $0x208] ss:$16 sps:$4 sm:$0xff]  }
 0x37e   :  { %v1248_v46 = vmax.f32 %v1216_v19, 0.0  ;;  %v1256_v7 = vmax.f32 %v1224_v16, 0.0  ;;  %v993_v5 = vrot.slane %v992_v43, 2  ;;  %v1096_v60 = vadd.f32 %v1095_v1, %v1094_v54 }
 0x37f   :  { %v1374_v36 = vpack.c.bf16 %v1268_v58, %v1268_v58  ;;  %v1001_v40 = vadd.f32 %v1000_v51, %v999_v11  ;;  %v1663_v33 = vunpack.c.l.b16 %v1375_v62  ;;  %v1104_v18 = vrot.slane %v1103_v17, 4  ;;  %v4848_v11 = vld [vmem:[#allocation5 + $0x200] ss:$16 sps:$4 sm:$0xff]  }
 0x380   :  { %v1332_v0 = vmax.f32 %v1248_v46, %v1256_v7  ;;  %v5911_v15 = vmul.f32 %v5293_v31, %v1152_v30  ;;  %v994_v29 = vadd.f32 %v993_v5, %v992_v43  ;;  %v1097_v47 = vrot.slane %v1096_v60, 2  ;;  %v4856_v43 = vld [vmem:[#allocation5 + $0x224] ss:$16 sps:$4 sm:$0xff]   ;;  %v4854_v62 = vld [vmem:[#allocation5 + $0x220] ss:$16 sps:$4 sm:$0xff]  }
 0x381   :  { %v1662_v32 = vunpack.c.l.b16 %v1374_v36  ;;  %v1002_v38 = vrot.slane %v1001_v40, 2  ;;  %v1680_v22 = vsel %vm1678_vm2, %v1671_v25, %v1663_v33  ;;  %v1105_v49 = vadd.f32 %v1104_v18, %v1103_v17  ;;  %v4859_v25 = vld [vmem:[#allocation5 + $0x22c] ss:$16 sps:$4 sm:$0xff]   ;;  %v4857_v33 = vld [vmem:[#allocation5 + $0x228] ss:$16 sps:$4 sm:$0xff]  }
 0x382   :  { %v1333_v26 = vrot.slane %v1332_v0, 4  ;;  %v5917_v54 = vmul.f32 %v5293_v31, %v1160_v63  ;;  %v1688_v35 = vpack.c.b16 %v1680_v22, %v1680_v22  ;;  %v995_v9 = vrot.slane %v994_v29, 1 }
 0x383   :  { %v1098_v12 = vadd.f32 %v1097_v47, %v1096_v60  ;;  %v1679_v30 = vsel %vm1678_vm2, %v5840_v24, %v1662_v32  ;;  %v1003_v16 = vadd.f32 %v1002_v38, %v1001_v40  ;;  %v1106_v52 = vrot.slane %v1105_v49, 2 }
 0x384   :  { %v1334_v19 = vmax.f32 %v1332_v0, %v1333_v26  ;;  %v1687_v36 = vpack.c.b16 %v1679_v30, %v1679_v30  ;;  %3015 = vmatprep.mubr.bf16.mxu0 %v1688_v35  ;;  %3179 = vmatprep.mubr.bf16.mxu1 %v1688_v35  ;;  %v996_v18 = vadd.f32 %v995_v9, %v994_v29  ;;  %v1232_v27 = vmax.f32 %v5911_v15, 0.0  ;;  %v4865_v29 = vld [vmem:[#allocation5 + $0x24c] ss:$16 sps:$4 sm:$0xff]  }
 0x385   :  { %v1099_v28 = vrot.slane %v1098_v12, 1  ;;  %v1240_v63 = vmax.f32 %v5917_v54, 0.0  ;;  %v5295_v31 = vpop.eup %5294  ;;  %v1004_v60 = vrot.slane %v1003_v16, 1  ;;  %v1107_v24 = vadd.f32 %v1106_v52, %v1105_v49  ;;  %v4860_v54 = vld [vmem:[#allocation5 + $0x240] ss:$16 sps:$4 sm:$0xff]  }
 0x386   :  { %v1335_v1 = vrot.slane %v1334_v19, 2  ;;  %3016 = vmatmul.mubr.bf16.vlgmr.msra.gmra.mrb[12].mxu0 %v1687_v36  ;;  %3180 = vmatmul.mubr.bf16.vlgmr.msra.gmra.mrb[28].mxu1 %v1687_v36  ;;  %v1243_v58 = vmax.f32 %v5881_v41, 0.0  ;;  %v1217_v40 = vmul.f32 %v5295_v31, %v1169_v10  ;;  %v1225_v51 = vmul.f32 %v5295_v31, %v1177_v37  ;;  %v4862_v41 = vld [vmem:[#allocation5 + $0x244] ss:$16 sps:$4 sm:$0xff]   ;;  %v4871_v52 = vld [vmem:[#allocation5 + $0x26c] ss:$16 sps:$4 sm:$0xff]  }
 0x387   :  { %v1100_v46 = vadd.f32 %v1099_v28, %v1098_v12  ;;  %v5930_v7 = vmul.f32 0.03125, %v996_v18  ;;  %3025 = vmatpush1.bf16.msra.mxu0 %v4848_v11  ;;  %3189 = vmatpush1.bf16.msra.mxu1 %v4851_v6  ;;  %v1005_v5 = vadd.f32 %v1004_v60, %v1003_v16  ;;  %v1108_v0 = vrot.slane %v1107_v24, 1  ;;  %v4863_v11 = vld [vmem:[#allocation5 + $0x248] ss:$16 sps:$4 sm:$0xff]   ;;  %v4868_v6 = vld [vmem:[#allocation5 + $0x264] ss:$16 sps:$4 sm:$0xff]  }
 0x388   :  { %v1336_v17 = vmax.f32 %v1334_v19, %v1335_v1  ;;  %3026 = vmatprep.subr.bf16.mxu0 %v4856_v43  ;;  %3190 = vmatprep.subr.bf16.mxu1 %v4859_v25  ;;  %v1201_v8 = vmul.f32 %v5295_v31, %v1153_v20  ;;  %v1249_v10 = vmax.f32 %v1217_v40, 0.0  ;;  %v1257_v23 = vmax.f32 %v1225_v51, 0.0  ;;  %v4874_v40 = vld [vmem:[#allocation5 + $0x284] ss:$16 sps:$4 sm:$0xff]  }
 0x389   :  { %v1124_v37 = vmul.f32 0.03125, %v1100_v46  ;;  %v1132_v15 = vmul.f32 %v5930_v7, %v5930_v7  ;;  %v1156_v32 = vsub.f32 %v5833_v45, %v5930_v7  ;;  %v1164_v38 = vsub.f32 %v5844_v50, %v5930_v7 }
 0x38a   :  { %v1337_v47 = vrot.slane %v1336_v17, 1  ;;  %v1172_v26 = vsub.f32 %v5865_v44, %v5930_v7  ;;  %v1339_v22 = vmax.f32 %v1249_v10, %v1257_v23  ;;  %v1180_v20 = vsub.f32 %v5891_v3, %v5930_v7 }
 0x38b   :  { %v1140_v21 = vsub.f32 %v1124_v37, %v1132_v15  ;;  %v1109_v49 = vadd.f32 %v1108_v0, %v1107_v24  ;;  %3027 = vmatpush1.bf16.msra.mxu0 %v4854_v62  ;;  %v5945_v35 = vmul.f32 0.03125, %v1005_v5  ;;  %3191 = vmatpush1.bf16.msra.mxu1 %v4857_v33  ;;  %v1209_v9 = vmul.f32 %v5295_v31, %v1161_v53  ;;  %v4866_v31 = vld [vmem:[#allocation5 + $0x260] ss:$16 sps:$4 sm:$0xff]   ;;  %v4869_v24 = vld [vmem:[#allocation5 + $0x268] ss:$16 sps:$4 sm:$0xff]  }
 0x38c   :  { %3028 = vmatprep.subr.bf16.mxu0 %v4862_v41  ;;  %v1233_v12 = vmax.f32 %v1201_v8, 0.0  ;;  %v1276_v30 = vmax.f32 %v1232_v27, %v1240_v63  ;;  %v1340_v19 = vrot.slane %v1339_v22, 4  ;;  %3192 = vmatprep.subr.bf16.mxu1 %v4865_v29  ;;  %v5950_v43 = vmax.f32 %v1336_v17, %v1337_v47  ;;  %v4877_v5 = vld [vmem:[#allocation5 + $0x28c] ss:$16 sps:$4 sm:$0xff]   ;;  %v4872_v37 = vld [vmem:[#allocation5 + $0x280] ss:$16 sps:$4 sm:$0xff]  }
 0x38d   :  { %v1148_v36 = vmax.f32 %v1140_v21, 0.0  ;;  %v1125_v16 = vmul.f32 0.03125, %v1109_v49  ;;  %v1133_v25 = vmul.f32 %v5945_v35, %v5945_v35  ;;  %v1173_v18 = vsub.f32 %v5886_v2, %v5945_v35  ;;  %v4875_v15 = vld [vmem:[#allocation5 + $0x288] ss:$16 sps:$4 sm:$0xff]  }
 0x38e   :  { %v1181_v28 = vsub.f32 %v5894_v59, %v5945_v35  ;;  %v1241_v34 = vmax.f32 %v1209_v9, 0.0  ;;  %v5961_v53 = vmax.f32 %v5809_v48, %v6100_v4  ;;  %v1341_v27 = vmax.f32 %v1339_v22, %v1340_v19  ;;  %v4883_v9 = vld [vmem:[#allocation5 + $0x2ac] ss:$16 sps:$4 sm:$0xff]   ;;  %v4886_v4 = vld [vmem:[#allocation5 + $0x2c4] ss:$16 sps:$4 sm:$0xff]  }
 0x38f   :  { %v1188_v63 = vadd.f32 1e-05, %v1148_v36  ;;  %3029 = vmatpush1.bf16.msra.mxu0 %v4860_v54  ;;  %v1277_v1 = vrot.slane %v1276_v30, 4  ;;  %v1141_v60 = vsub.f32 %v1125_v16, %v1133_v25  ;;  %3193 = vmatpush1.bf16.msra.mxu1 %v4863_v11  ;;  %v6101_v46 = vmax.f32 %v5875_v57, 0.0  ;;  %v4880_v54 = vld [vmem:[#allocation5 + $0x2a4] ss:$16 sps:$4 sm:$0xff]  }
 0x390   :  { %3030 = vmatprep.subr.bf16.mxu0 %v4868_v6  ;;  %v1283_v51 = vmax.f32 %v1233_v12, %v1241_v34  ;;  %v1342_v17 = vrot.slane %v1341_v27, 2  ;;  %3194 = vmatprep.subr.bf16.mxu1 %v4871_v52  ;;  %v1384_v0 = vpack.c.bf16 %v5950_v43, %v5950_v43  ;;  %v6102_v10 = vrot.slane %v5817_v14, 2  ;;  %v4881_v34 = vld [vmem:[#allocation5 + $0x2a8] ss:$16 sps:$4 sm:$0xff]  }
 0x391   :  { %v1297_v62 = vmax.f32 %v6101_v46, %v1243_v58  ;;  %5296 = vrsqrt.f32 %v1188_v63  ;;  %v1278_v48 = vmax.f32 %v1276_v30, %v1277_v1  ;;  %v1149_v33 = vmax.f32 %v1141_v60, 0.0  ;;  %v4889_v1 = vld [vmem:[#allocation5 + $0x2cc] ss:$16 sps:$4 sm:$0xff]   ;;  %v4899_v59 = vld [vmem:[#allocation5 + $0x308] ss:$16 sps:$4 sm:$0xff]  }
 0x392   :  { %v1284_v41 = vrot.slane %v1283_v51, 4  ;;  %v1357_v23 = vmax.f32 %v5817_v14, %v6102_v10  ;;  %v1343_v57 = vmax.f32 %v1341_v27, %v1342_v17  ;;  %v6103_v29 = vsub.f32 %v5603_v55, %v5683_v42 }
 0x393   :  { %v1298_v8 = vrot.slane %v1297_v62, 4  ;;  %3031 = vmatpush1.bf16.msra.mxu0 %v4866_v31  ;;  %v1279_v58 = vrot.slane %v1278_v48, 2  ;;  %v6104_v22 = vsub.f32 %v5619_v56, %v5683_v42  ;;  %v1189_v49 = vadd.f32 1e-05, %v1149_v33  ;;  %3195 = vmatpush1.bf16.msra.mxu1 %v4869_v24  ;;  %v4878_v42 = vld [vmem:[#allocation5 + $0x2a0] ss:$16 sps:$4 sm:$0xff]  }
 0x394   :  { %v1202_v47 = vmul.f32 %v5769_v39, %v6103_v29  ;;  %3032 = vmatprep.subr.bf16.mxu0 %v4874_v40  ;;  %v1285_v14 = vmax.f32 %v1283_v51, %v1284_v41  ;;  %v1358_v6 = vrot.slane %v1357_v23, 1  ;;  %3196 = vmatprep.subr.bf16.mxu1 %v4877_v5  ;;  %v1344_v12 = vrot.slane %v1343_v57, 1 }
 0x395   :  { %v1210_v21 = vmul.f32 %v5769_v39, %v6104_v22  ;;  %v1299_v11 = vmax.f32 %v1297_v62, %v1298_v8  ;;  %v1280_v30 = vmax.f32 %v1278_v48, %v1279_v58  ;;  %5298 = vrsqrt.f32 %v1189_v49  ;;  %v4884_v48 = vld [vmem:[#allocation5 + $0x2c0] ss:$16 sps:$4 sm:$0xff]   ;;  %v4895_v58 = vld [vmem:[#allocation5 + $0x2ec] ss:$16 sps:$4 sm:$0xff]  }
 0x396   :  { %v1234_v19 = vmax.f32 %v1202_v47, 0.0  ;;  %v1286_v36 = vrot.slane %v1285_v14, 2  ;;  %v1359_v52 = vmax.f32 %v1357_v23, %v1358_v6  ;;  %v1351_v56 = vrot.slane %v5961_v53, 1 }
 0x397   :  { %v1242_v55 = vmax.f32 %v1210_v21, 0.0  ;;  %v1300_v16 = vrot.slane %v1299_v11, 2  ;;  %3033 = vmatpush1.bf16.msra.mxu0 %v4872_v37  ;;  %v1345_v39 = vmax.f32 %v1343_v57, %v1344_v12  ;;  %v1281_v43 = vrot.slane %v1280_v30, 1  ;;  %3197 = vmatpush1.bf16.msra.mxu1 %v4875_v15  ;;  %v4892_v37 = vld [vmem:[#allocation5 + $0x2e4] ss:$16 sps:$4 sm:$0xff]  }
 0x398   :  { %3034 = vmatprep.subr.bf16.mxu0 %v4880_v54  ;;  %v1287_v27 = vmax.f32 %v1285_v14, %v1286_v36  ;;  %v1387_v31 = vpack.c.bf16 %v1359_v52, %v1359_v52  ;;  %3198 = vmatprep.subr.bf16.mxu1 %v4883_v9  ;;  %v1672_v46 = vunpack.c.l.b16 %v1384_v0  ;;  %v1157_v17 = vsub.f32 %v5838_v61, %v5945_v35  ;;  %v4887_v61 = vld [vmem:[#allocation5 + $0x2c8] ss:$16 sps:$4 sm:$0xff]   ;;  %v4901_v36 = vld [vmem:[#allocation5 + $0x30c] ss:$16 sps:$4 sm:$0xff]  }
 0x399   :  { %v1290_v25 = vmax.f32 %v1234_v19, %v1242_v55  ;;  %v1301_v63 = vmax.f32 %v1299_v11, %v1300_v16  ;;  %v1385_v60 = vpack.c.bf16 %v1345_v39, %v1345_v39  ;;  %v1282_v24 = vmax.f32 %v1280_v30, %v1281_v43  ;;  %v4893_v9 = vld [vmem:[#allocation5 + $0x2e8] ss:$16 sps:$4 sm:$0xff]   ;;  %v4898_v30 = vld [vmem:[#allocation5 + $0x304] ss:$16 sps:$4 sm:$0xff]   ;;  %v4896_v43 = vld [vmem:[#allocation5 + $0x300] ss:$16 sps:$4 sm:$0xff]  }
 0x39a   :  { %v1288_v51 = vrot.slane %v1287_v27, 1  ;;  %v1675_v41 = vunpack.c.l.b16 %v1387_v31  ;;  %v5982_v10 = vmax.f32 %v5961_v53, %v1351_v56  ;;  %v1165_v22 = vsub.f32 %v5850_v13, %v5945_v35  ;;  %v4904_v35 = vld [vmem:[#allocation5 + $0x324] ss:$16 sps:$4 sm:$0xff]  }
 0x39b   :  { %v1291_v40 = vrot.slane %v1290_v25, 4  ;;  %v1302_v62 = vrot.slane %v1301_v63, 1  ;;  %v5297_v5 = vpop.eup %5296  ;;  %3035 = vmatpush1.bf16.msra.mxu0 %v4878_v42  ;;  %v1376_v33 = vpack.c.bf16 %v1282_v24, %v1282_v24  ;;  %3199 = vmatpush1.bf16.msra.mxu1 %v4881_v34  ;;  %v1673_v57 = vunpack.c.l.b16 %v1385_v60 }
 0x39c   :  { %v1220_v23 = vmul.f32 %v5297_v5, %v1172_v26  ;;  %v1228_v0 = vmul.f32 %v5297_v5, %v1180_v20  ;;  %3036 = vmatprep.subr.bf16.mxu0 %v4886_v4  ;;  %v1289_v15 = vmax.f32 %v1287_v27, %v1288_v51  ;;  %3200 = vmatprep.subr.bf16.mxu1 %v4889_v1  ;;  %v4890_v20 = vld [vmem:[#allocation5 + $0x2e0] ss:$16 sps:$4 sm:$0xff]   ;;  %v4907_v4 = vld [vmem:[#allocation5 + $0x32c] ss:$16 sps:$4 sm:$0xff]  }
 0x39d   :  { %v1292_v8 = vmax.f32 %v1290_v25, %v1291_v40  ;;  %v1664_v29 = vunpack.c.l.b16 %v1376_v33  ;;  %v1303_v47 = vmax.f32 %v1301_v63, %v1302_v62  ;;  %v1204_v3 = vmul.f32 %v5297_v5, %v1156_v32  ;;  %v4902_v51 = vld [vmem:[#allocation5 + $0x320] ss:$16 sps:$4 sm:$0xff]  }
 0x39e   :  { %v1252_v44 = vmax.f32 %v1220_v23, 0.0  ;;  %v1260_v26 = vmax.f32 %v1228_v0, 0.0  ;;  %v1377_v21 = vpack.c.bf16 %v1289_v15, %v1289_v15  ;;  %v1212_v11 = vmul.f32 %v5297_v5, %v1164_v38  ;;  %v4910_v5 = vld [vmem:[#allocation5 + $0x344] ss:$16 sps:$4 sm:$0xff]   ;;  %v4908_v15 = vld [vmem:[#allocation5 + $0x340] ss:$16 sps:$4 sm:$0xff]  }
 0x39f   :  { %v1293_v53 = vrot.slane %v1292_v8, 2  ;;  %3037 = vmatpush1.bf16.msra.mxu0 %v4884_v48  ;;  %v5996_v49 = vsel %vm1678_vm2, %v1672_v46, %v1664_v29  ;;  %v1379_v54 = vpack.c.bf16 %v1303_v47, %v1303_v47  ;;  %v5299_v6 = vpop.eup %5298  ;;  %3201 = vmatpush1.bf16.msra.mxu1 %v4887_v61  ;;  %v1386_v45 = vpack.c.bf16 %v5982_v10, %v5982_v10  ;;  %v4916_v29 = vld [vmem:[#allocation5 + $0x364] ss:$16 sps:$4 sm:$0xff]  }
 0x3a0   :  { %v1360_v13 = vmax.f32 %v1252_v44, %v1260_v26  ;;  %3038 = vmatprep.subr.bf16.mxu0 %v4892_v37  ;;  %v1665_v12 = vunpack.c.l.b16 %v1377_v21  ;;  %v1221_v32 = vmul.f32 %v5299_v6, %v1173_v18  ;;  %v1229_v19 = vmul.f32 %v5299_v6, %v1181_v28  ;;  %3202 = vmatprep.subr.bf16.mxu1 %v4895_v58  ;;  %v4911_v58 = vld [vmem:[#allocation5 + $0x348] ss:$16 sps:$4 sm:$0xff]  }
 0x3a1   :  { %v1294_v14 = vmax.f32 %v1292_v8, %v1293_v53  ;;  %v1667_v50 = vunpack.c.l.b16 %v1379_v54  ;;  %v1205_v16 = vmul.f32 %v5299_v6, %v1157_v17  ;;  %v1213_v52 = vmul.f32 %v5299_v6, %v1165_v22  ;;  %v4905_v17 = vld [vmem:[#allocation5 + $0x328] ss:$16 sps:$4 sm:$0xff]   ;;  %v4913_v8 = vld [vmem:[#allocation5 + $0x34c] ss:$16 sps:$4 sm:$0xff]  }
 0x3a2   :  { %v1361_v38 = vrot.slane %v1360_v13, 4  ;;  %v1682_v55 = vsel %vm1678_vm2, %v1673_v57, %v1665_v12  ;;  %v1253_v56 = vmax.f32 %v1221_v32, 0.0  ;;  %v1261_v42 = vmax.f32 %v1229_v19, 0.0  ;;  %v4919_v53 = vld [vmem:[#allocation5 + $0x36c] ss:$16 sps:$4 sm:$0xff]  }
 0x3a3   :  { %v1295_v7 = vrot.slane %v1294_v14, 1  ;;  %3039 = vmatpush1.bf16.msra.mxu0 %v4890_v20  ;;  %v1690_v39 = vpack.c.b16 %v1682_v55, %v1682_v55  ;;  %v6011_v2 = vsel %vm1678_vm2, %v1675_v41, %v1667_v50  ;;  %3203 = vmatpush1.bf16.msra.mxu1 %v4893_v9  ;;  %v1237_v25 = vmax.f32 %v1205_v16, 0.0  ;;  %v4920_v32 = vld [vmem:[#allocation5 + $0x380] ss:$16 sps:$4 sm:$0xff]  }
 0x3a4   :  { %v1362_v18 = vmax.f32 %v1360_v13, %v1361_v38  ;;  %3040 = vmatprep.subr.bf16.mxu0 %v4898_v30  ;;  %v1367_v34 = vmax.f32 %v1253_v56, %v1261_v42  ;;  %v1245_v27 = vmax.f32 %v1213_v52, 0.0  ;;  %v1236_v63 = vmax.f32 %v1204_v3, 0.0  ;;  %3204 = vmatprep.subr.bf16.mxu1 %v4901_v36  ;;  %v4914_v3 = vld [vmem:[#allocation5 + $0x360] ss:$16 sps:$4 sm:$0xff]   ;;  %v4925_v13 = vld [vmem:[#allocation5 + $0x38c] ss:$16 sps:$4 sm:$0xff]  }
 0x3a5   :  { %v1296_v28 = vmax.f32 %v1294_v14, %v1295_v7  ;;  %3056 = vmatprep.mubr.bf16.mxu0 %v1690_v39  ;;  %3220 = vmatprep.mubr.bf16.mxu1 %v1690_v39  ;;  %v1674_v60 = vunpack.c.l.b16 %v1386_v45  ;;  %v1244_v24 = vmax.f32 %v1212_v11, 0.0  ;;  %v4917_v14 = vld [vmem:[#allocation5 + $0x368] ss:$16 sps:$4 sm:$0xff]   ;;  %v4922_v11 = vld [vmem:[#allocation5 + $0x384] ss:$16 sps:$4 sm:$0xff]  }
 0x3a6   :  { %v1363_v31 = vrot.slane %v1362_v18, 2  ;;  %v1368_v40 = vrot.slane %v1367_v34, 4  ;;  %v1311_v46 = vmax.f32 %v1237_v25, %v1245_v27  ;;  %v4923_v7 = vld [vmem:[#allocation5 + $0x388] ss:$16 sps:$4 sm:$0xff]   ;;  %v4928_v38 = vld [vmem:[#allocation5 + $0x3a4] ss:$16 sps:$4 sm:$0xff]  }
 0x3a7   :  { %v1378_v1 = vpack.c.bf16 %v1296_v28, %v1296_v28  ;;  %3041 = vmatpush1.bf16.msra.mxu0 %v4896_v43  ;;  %3205 = vmatpush1.bf16.msra.mxu1 %v4899_v59  ;;  %v1304_v33 = vmax.f32 %v1236_v63, %v1244_v24  ;;  %v4931_v36 = vld [vmem:[#allocation5 + $0x3ac] ss:$16 sps:$4 sm:$0xff]   ;;  %v4926_v39 = vld [vmem:[#allocation5 + $0x3a0] ss:$16 sps:$4 sm:$0xff]   ;;  %v4934_v59 = vld [vmem:[#allocation5 + $0x3c4] ss:$16 sps:$4 sm:$0xff]  }
 0x3a8   :  { %v1364_v62 = vmax.f32 %v1362_v18, %v1363_v31  ;;  %3042 = vmatprep.subr.bf16.mxu0 %v4904_v35  ;;  %v1369_v41 = vmax.f32 %v1367_v34, %v1368_v40  ;;  %3206 = vmatprep.subr.bf16.mxu1 %v4907_v4  ;;  %v1312_v10 = vrot.slane %v1311_v46, 4  ;;  %v4929_v18 = vld [vmem:[#allocation5 + $0x3a8] ss:$16 sps:$4 sm:$0xff]   ;;  %v4937_v28 = vld [vmem:[#allocation5 + $0x3cc] ss:$16 sps:$4 sm:$0xff]  }
 0x3a9   :  { %v1666_v48 = vunpack.c.l.b16 %v1378_v1  ;;  %v1305_v61 = vrot.slane %v1304_v33, 4  ;;  %v4932_v4 = vld [vmem:[#allocation5 + $0x3c0] ss:$16 sps:$4 sm:$0xff]   ;;  %v4935_v27 = vld [vmem:[#allocation5 + $0x3c8] ss:$16 sps:$4 sm:$0xff]  }
 0x3aa   :  { %v1365_v23 = vrot.slane %v1364_v62, 1  ;;  %v1370_v37 = vrot.slane %v1369_v41, 2  ;;  %v1313_v57 = vmax.f32 %v1311_v46, %v1312_v10  ;;  %v4940_v63 = vld [vmem:[#allocation5 + $0x3e4] ss:$16 sps:$4 sm:$0xff]   ;;  %v4943_v31 = vld [vmem:[#allocation5 + $0x3ec] ss:$16 sps:$4 sm:$0xff]   ;;  %v1689_v46 = vpack.c.b16 %v5996_v49, %v5996_v49 }
 0x3ab   :  { %v6014_v0 = vsel %vm1678_vm2, %v1674_v60, %v1666_v48  ;;  %3043 = vmatpush1.bf16.msra.mxu0 %v4902_v51  ;;  %3207 = vmatpush1.bf16.msra.mxu1 %v4905_v17  ;;  %v1306_v47 = vmax.f32 %v1304_v33, %v1305_v61  ;;  %v4938_v1 = vld [vmem:[#allocation5 + $0x3e0] ss:$16 sps:$4 sm:$0xff]   ;;  %v4941_v60 = vld [vmem:[#allocation5 + $0x3e8] ss:$16 sps:$4 sm:$0xff]   ;;  %v4946_v24 = vld [vmem:[#allocation5 + $0x404] ss:$16 sps:$4 sm:$0xff]  }
 0x3ac   :  { %3044 = vmatprep.subr.bf16.mxu0 %v4910_v5  ;;  %3208 = vmatprep.subr.bf16.mxu1 %v4913_v8  ;;  %v1314_v22 = vrot.slane %v1313_v57, 2  ;;  %v1371_v44 = vmax.f32 %v1369_v41, %v1370_v37  ;;  %v1366_v21 = vmax.f32 %v1364_v62, %v1365_v23  ;;  %v4949_v40 = vld [vmem:[#allocation5 + $0x40c] ss:$16 sps:$4 sm:$0xff]   ;;  %v4944_v51 = vld [vmem:[#allocation5 + $0x400] ss:$16 sps:$4 sm:$0xff]   ;;  %v1692_v5 = vpack.c.b16 %v6011_v2, %v6011_v2 }
 0x3ad   :  { %v1307_v26 = vrot.slane %v1306_v47, 2  ;;  %v4947_v62 = vld [vmem:[#allocation5 + $0x408] ss:$16 sps:$4 sm:$0xff]   ;;  %v4952_v17 = vld [vmem:[#allocation5 + $0x424] ss:$16 sps:$4 sm:$0xff]  }
 0x3ae   :  { %v1315_v20 = vmax.f32 %v1313_v57, %v1314_v22  ;;  %v1372_v54 = vrot.slane %v1371_v44, 1  ;;  %v1388_v45 = vpack.c.bf16 %v1366_v21, %v1366_v21  ;;  %v4955_v48 = vld [vmem:[#allocation5 + $0x42c] ss:$16 sps:$4 sm:$0xff]   ;;  %v4950_v33 = vld [vmem:[#allocation5 + $0x420] ss:$16 sps:$4 sm:$0xff]  }
 0x3af   :  { %3045 = vmatpush1.bf16.msra.mxu0 %v4908_v15  ;;  %3209 = vmatpush1.bf16.msra.mxu1 %v4911_v58  ;;  %v1308_v6 = vmax.f32 %v1306_v47, %v1307_v26  ;;  %v4953_v41 = vld [vmem:[#allocation5 + $0x428] ss:$16 sps:$4 sm:$0xff]   ;;  %v4958_v8 = vld [vmem:[#allocation5 + $0x444] ss:$16 sps:$4 sm:$0xff]   ;;  %v4961_v10 = vld [vmem:[#allocation5 + $0x44c] ss:$16 sps:$4 sm:$0xff]  }
 0x3b0   :  { %3046 = vmatprep.subr.bf16.mxu0 %v4916_v29  ;;  %3210 = vmatprep.subr.bf16.mxu1 %v4919_v53  ;;  %v1316_v9 = vrot.slane %v1315_v20, 1  ;;  %v1373_v12 = vmax.f32 %v1371_v44, %v1372_v54  ;;  %v1676_v42 = vunpack.c.l.b16 %v1388_v45  ;;  %v4956_v49 = vld [vmem:[#allocation5 + $0x440] ss:$16 sps:$4 sm:$0xff]   ;;  %v4959_v23 = vld [vmem:[#allocation5 + $0x448] ss:$16 sps:$4 sm:$0xff]  }
 0x3b1   :  { %v1309_v30 = vrot.slane %v1308_v6, 1  ;;  %v4964_v61 = vld [vmem:[#allocation5 + $0x464] ss:$16 sps:$4 sm:$0xff]   ;;  %v4967_v2 = vld [vmem:[#allocation5 + $0x46c] ss:$16 sps:$4 sm:$0xff]  }
 0x3b2   :  { %v1317_v19 = vmax.f32 %v1315_v20, %v1316_v9  ;;  %v1389_v50 = vpack.c.bf16 %v1373_v12, %v1373_v12  ;;  %v4962_v37 = vld [vmem:[#allocation5 + $0x460] ss:$16 sps:$4 sm:$0xff]   ;;  %v4965_v15 = vld [vmem:[#allocation5 + $0x468] ss:$16 sps:$4 sm:$0xff]   ;;  %v4970_v57 = vld [vmem:[#allocation5 + $0x484] ss:$16 sps:$4 sm:$0xff]  }
 0x3b3   :  { %3047 = vmatpush1.bf16.msra.mxu0 %v4914_v3  ;;  %3211 = vmatpush1.bf16.msra.mxu1 %v4917_v14  ;;  %v1310_v55 = vmax.f32 %v1308_v6, %v1309_v30  ;;  %v4973_v58 = vld [vmem:[#allocation5 + $0x48c] ss:$16 sps:$4 sm:$0xff]   ;;  %v4968_v29 = vld [vmem:[#allocation5 + $0x480] ss:$16 sps:$4 sm:$0xff]   ;;  %v4971_v47 = vld [vmem:[#allocation5 + $0x488] ss:$16 sps:$4 sm:$0xff]  }
 0x3b4   :  { %3048 = vmatprep.subr.bf16.mxu0 %v4922_v11  ;;  %3212 = vmatprep.subr.bf16.mxu1 %v4925_v13  ;;  %v1381_v16 = vpack.c.bf16 %v1317_v19, %v1317_v19  ;;  %v1677_v52 = vunpack.c.l.b16 %v1389_v50  ;;  %v4976_v53 = vld [vmem:[#allocation5 + $0x4a4] ss:$16 sps:$4 sm:$0xff]   ;;  %v4979_v22 = vld [vmem:[#allocation5 + $0x4ac] ss:$16 sps:$4 sm:$0xff]   ;;  %v4974_v44 = vld [vmem:[#allocation5 + $0x4a0] ss:$16 sps:$4 sm:$0xff]  }
 0x3b5   :  { %v1380_v56 = vpack.c.bf16 %v1310_v55, %v1310_v55  ;;  %v4977_v26 = vld [vmem:[#allocation5 + $0x4a8] ss:$16 sps:$4 sm:$0xff]   ;;  %v4982_v21 = vld [vmem:[#allocation5 + $0x4c4] ss:$16 sps:$4 sm:$0xff]   ;;  %v4985_v3 = vld [vmem:[#allocation5 + $0x4cc] ss:$16 sps:$4 sm:$0xff]  }
 0x3b6   :  { %v1669_v43 = vunpack.c.l.b16 %v1381_v16  ;;  %v4980_v20 = vld [vmem:[#allocation5 + $0x4c0] ss:$16 sps:$4 sm:$0xff]   ;;  %v4983_v54 = vld [vmem:[#allocation5 + $0x4c8] ss:$16 sps:$4 sm:$0xff]   ;;  %v4988_v14 = vld [vmem:[#allocation5 + $0x4e4] ss:$16 sps:$4 sm:$0xff]  }
 0x3b7   :  { %3049 = vmatpush1.bf16.msra.mxu0 %v4920_v32  ;;  %3213 = vmatpush1.bf16.msra.mxu1 %v4923_v7  ;;  %v1668_v35 = vunpack.c.l.b16 %v1380_v56  ;;  %v4991_v11 = vld [vmem:[#allocation5 + $0x4ec] ss:$16 sps:$4 sm:$0xff]   ;;  %v4986_v6 = vld [vmem:[#allocation5 + $0x4e0] ss:$16 sps:$4 sm:$0xff]   ;;  %v4989_v13 = vld [vmem:[#allocation5 + $0x4e8] ss:$16 sps:$4 sm:$0xff]  }
 0x3b8   :  { %3050 = vmatprep.subr.bf16.mxu0 %v4928_v38  ;;  %3214 = vmatprep.subr.bf16.mxu1 %v4931_v36  ;;  %v6017_v25 = vsel %vm1678_vm2, %v1677_v52, %v1669_v43  ;;  %v4994_v9 = vld [vmem:[#allocation5 + $0x504] ss:$16 sps:$4 sm:$0xff]   ;;  %v4997_v12 = vld [vmem:[#allocation5 + $0x50c] ss:$16 sps:$4 sm:$0xff]   ;;  %v4992_v30 = vld [vmem:[#allocation5 + $0x500] ss:$16 sps:$4 sm:$0xff]  }
 0x3b9   :  { %v6020_v34 = vsel %vm1678_vm2, %v1676_v42, %v1668_v35  ;;  %v4995_v45 = vld [vmem:[#allocation5 + $0x508] ss:$16 sps:$4 sm:$0xff]   ;;  %v5000_v32 = vld [vmem:[#allocation5 + $0x524] ss:$16 sps:$4 sm:$0xff]   ;;  %v5003_v19 = vld [vmem:[#allocation5 + $0x52c] ss:$16 sps:$4 sm:$0xff]  }
 0x3ba   :  { %v4998_v50 = vld [vmem:[#allocation5 + $0x520] ss:$16 sps:$4 sm:$0xff]   ;;  %v5001_v7 = vld [vmem:[#allocation5 + $0x528] ss:$16 sps:$4 sm:$0xff]   ;;  %v5006_v38 = vld [vmem:[#allocation5 + $0x544] ss:$16 sps:$4 sm:$0xff]  }
 0x3bb   :  { %3051 = vmatpush1.bf16.msra.mxu0 %v4926_v39  ;;  %3215 = vmatpush1.bf16.msra.mxu1 %v4929_v18  ;;  %v5009_v55 = vld [vmem:[#allocation5 + $0x54c] ss:$16 sps:$4 sm:$0xff]   ;;  %v5004_v36 = vld [vmem:[#allocation5 + $0x540] ss:$16 sps:$4 sm:$0xff]   ;;  %v5007_v16 = vld [vmem:[#allocation5 + $0x548] ss:$16 sps:$4 sm:$0xff]  }
 0x3bc   :  { %3052 = vmatprep.subr.bf16.mxu0 %v4934_v59  ;;  %3216 = vmatprep.subr.bf16.mxu1 %v4937_v28  ;;  %v5012_v52 = vld [vmem:[#allocation5 + $0x564] ss:$16 sps:$4 sm:$0xff]   ;;  %v5015_v56 = vld [vmem:[#allocation5 + $0x56c] ss:$16 sps:$4 sm:$0xff]   ;;  %v5010_v42 = vld [vmem:[#allocation5 + $0x560] ss:$16 sps:$4 sm:$0xff]  }
 0x3bd   :  { %v5013_v39 = vld [vmem:[#allocation5 + $0x568] ss:$16 sps:$4 sm:$0xff]   ;;  %v5018_v43 = vld [vmem:[#allocation5 + $0x584] ss:$16 sps:$4 sm:$0xff]   ;;  %v5021_v18 = vld [vmem:[#allocation5 + $0x58c] ss:$16 sps:$4 sm:$0xff]  }
 0x3be   :  { %v5016_v59 = vld [vmem:[#allocation5 + $0x580] ss:$16 sps:$4 sm:$0xff]   ;;  %v5019_v35 = vld [vmem:[#allocation5 + $0x588] ss:$16 sps:$4 sm:$0xff]   ;;  %v5024_v28 = vld [vmem:[#allocation5 + $0x5a4] ss:$16 sps:$4 sm:$0xff]  }
 0x3bf   :  { %3053 = vmatpush1.bf16.msra.mxu0 %v4932_v4  ;;  %3217 = vmatpush1.bf16.msra.mxu1 %v4935_v27  ;;  %v5027_v4 = vld [vmem:[#allocation5 + $0x5ac] ss:$16 sps:$4 sm:$0xff]   ;;  %v5022_v27 = vld [vmem:[#allocation5 + $0x5a0] ss:$16 sps:$4 sm:$0xff]  }
 0x3c0   :  { %3054 = vmatprep.subr.bf16.mxu0 %v4940_v63  ;;  %3218 = vmatprep.subr.bf16.mxu1 %v4943_v31  ;;  %v5025_v63 = vld [vmem:[#allocation5 + $0x5a8] ss:$16 sps:$4 sm:$0xff]   ;;  %v5030_v31 = vld [vmem:[#allocation5 + $0x5c4] ss:$16 sps:$4 sm:$0xff]  }
 0x3c3   :  { %3055 = vmatpush1.bf16.msra.mxu0 %v4938_v1  ;;  %3219 = vmatpush1.bf16.msra.mxu1 %v4941_v60  ;;  %v5033_v1 = vld [vmem:[#allocation5 + $0x5cc] ss:$16 sps:$4 sm:$0xff]   ;;  %v5028_v60 = vld [vmem:[#allocation5 + $0x5c0] ss:$16 sps:$4 sm:$0xff]  }
 0x3c4   :  { %3065 = vmatprep.subr.bf16.mxu0 %v4946_v24  ;;  %3229 = vmatprep.subr.bf16.mxu1 %v4949_v40  ;;  %v5031_v24 = vld [vmem:[#allocation5 + $0x5c8] ss:$16 sps:$4 sm:$0xff]   ;;  %v5036_v40 = vld [vmem:[#allocation5 + $0x5e4] ss:$16 sps:$4 sm:$0xff]  }
 0x3c6   :  { %3057 = vmatmul.mubr.bf16.vlgmr.msra.gmra.mrb[12].mxu0 %v1689_v46  ;;  %3221 = vmatmul.mubr.bf16.vlgmr.msra.gmra.mrb[28].mxu1 %v1689_v46  ;;  %v5034_v46 = vld [vmem:[#allocation5 + $0x5e0] ss:$16 sps:$4 sm:$0xff]  }
 0x3c7   :  { %3066 = vmatpush1.bf16.msra.mxu0 %v4944_v51  ;;  %3097 = vmatprep.mubr.bf16.mxu0 %v1692_v5  ;;  %v5039_v51 = vld [vmem:[#allocation5 + $0x5ec] ss:$16 sps:$4 sm:$0xff]  }
 0x3c8   :  { %3230 = vmatpush1.bf16.msra.mxu1 %v4947_v62  ;;  %3261 = vmatprep.mubr.bf16.mxu1 %v1692_v5  ;;  %v5037_v62 = vld [vmem:[#allocation5 + $0x5e8] ss:$16 sps:$4 sm:$0xff]   ;;  %v5045_v5 = vld [vmem:[#allocation5 + $0x60c] ss:$16 sps:$4 sm:$0xff]  }
 0x3c9   :  { %3067 = vmatprep.subr.bf16.mxu0 %v4952_v17  ;;  %3231 = vmatprep.subr.bf16.mxu1 %v4955_v48  ;;  %v5042_v17 = vld [vmem:[#allocation5 + $0x604] ss:$16 sps:$4 sm:$0xff]   ;;  %v5040_v48 = vld [vmem:[#allocation5 + $0x600] ss:$16 sps:$4 sm:$0xff]  }
 0x3cb   :  { %3068 = vmatpush1.bf16.msra.mxu0 %v4950_v33  ;;  %v1691_v33 = vpack.c.b16 %v6014_v0, %v6014_v0  ;;  %v5052_v0 = vld [vmem:[#allocation5 + $0x640] ss:$16 sps:$4 sm:$0xff]  }
 0x3cc   :  { %3232 = vmatpush1.bf16.msra.mxu1 %v4953_v41  ;;  %3069 = vmatprep.subr.bf16.mxu0 %v4958_v8  ;;  %v5043_v41 = vld [vmem:[#allocation5 + $0x608] ss:$16 sps:$4 sm:$0xff]   ;;  %v5048_v8 = vld [vmem:[#allocation5 + $0x624] ss:$16 sps:$4 sm:$0xff]  }
 0x3cd   :  { %3233 = vmatprep.subr.bf16.mxu1 %v4961_v10  ;;  %v1694_v10 = vpack.c.b16 %v6017_v25, %v6017_v25  ;;  %v5063_v25 = vld [vmem:[#allocation5 + $0x66c] ss:$16 sps:$4 sm:$0xff]  }
 0x3cf   :  { %3070 = vmatpush1.bf16.msra.mxu0 %v4956_v49  ;;  %v5051_v49 = vld [vmem:[#allocation5 + $0x62c] ss:$16 sps:$4 sm:$0xff]  }
 0x3d0   :  { %3234 = vmatpush1.bf16.msra.mxu1 %v4959_v23  ;;  %3071 = vmatprep.subr.bf16.mxu0 %v4964_v61  ;;  %v5046_v23 = vld [vmem:[#allocation5 + $0x620] ss:$16 sps:$4 sm:$0xff]   ;;  %v5049_v61 = vld [vmem:[#allocation5 + $0x628] ss:$16 sps:$4 sm:$0xff]  }
 0x3d1   :  { %3235 = vmatprep.subr.bf16.mxu1 %v4967_v2  ;;  %v5054_v2 = vld [vmem:[#allocation5 + $0x644] ss:$16 sps:$4 sm:$0xff]  }
 0x3d3   :  { %3072 = vmatpush1.bf16.msra.mxu0 %v4962_v37  ;;  %v5057_v37 = vld [vmem:[#allocation5 + $0x64c] ss:$16 sps:$4 sm:$0xff]  }
 0x3d4   :  { %3236 = vmatpush1.bf16.msra.mxu1 %v4965_v15  ;;  %3073 = vmatprep.subr.bf16.mxu0 %v4970_v57  ;;  %v5055_v15 = vld [vmem:[#allocation5 + $0x648] ss:$16 sps:$4 sm:$0xff]   ;;  %v5060_v57 = vld [vmem:[#allocation5 + $0x664] ss:$16 sps:$4 sm:$0xff]  }
 0x3d5   :  { %3237 = vmatprep.subr.bf16.mxu1 %v4973_v58  ;;  %v5058_v58 = vld [vmem:[#allocation5 + $0x660] ss:$16 sps:$4 sm:$0xff]  }
 0x3d7   :  { %3074 = vmatpush1.bf16.msra.mxu0 %v4968_v29  ;;  %v5061_v29 = vld [vmem:[#allocation5 + $0x668] ss:$16 sps:$4 sm:$0xff]  }
 0x3d8   :  { %3238 = vmatpush1.bf16.msra.mxu1 %v4971_v47  ;;  %3075 = vmatprep.subr.bf16.mxu0 %v4976_v53  ;;  %v5066_v47 = vld [vmem:[#allocation5 + $0x684] ss:$16 sps:$4 sm:$0xff]   ;;  %v5069_v53 = vld [vmem:[#allocation5 + $0x68c] ss:$16 sps:$4 sm:$0xff]  }
 0x3d9   :  { %3239 = vmatprep.subr.bf16.mxu1 %v4979_v22  ;;  %v5064_v22 = vld [vmem:[#allocation5 + $0x680] ss:$16 sps:$4 sm:$0xff]  }
 0x3db   :  { %3076 = vmatpush1.bf16.msra.mxu0 %v4974_v44  ;;  %v5067_v44 = vld [vmem:[#allocation5 + $0x688] ss:$16 sps:$4 sm:$0xff]  }
 0x3dc   :  { %3240 = vmatpush1.bf16.msra.mxu1 %v4977_v26  ;;  %3077 = vmatprep.subr.bf16.mxu0 %v4982_v21  ;;  %v5072_v26 = vld [vmem:[#allocation5 + $0x6a4] ss:$16 sps:$4 sm:$0xff]   ;;  %v5075_v21 = vld [vmem:[#allocation5 + $0x6ac] ss:$16 sps:$4 sm:$0xff]  }
 0x3dd   :  { %3241 = vmatprep.subr.bf16.mxu1 %v4985_v3  ;;  %v5070_v3 = vld [vmem:[#allocation5 + $0x6a0] ss:$16 sps:$4 sm:$0xff]  }
 0x3df   :  { %3078 = vmatpush1.bf16.msra.mxu0 %v4980_v20  ;;  %v5073_v20 = vld [vmem:[#allocation5 + $0x6a8] ss:$16 sps:$4 sm:$0xff]  }
 0x3e0   :  { %3242 = vmatpush1.bf16.msra.mxu1 %v4983_v54  ;;  %3079 = vmatprep.subr.bf16.mxu0 %v4988_v14  ;;  %v5078_v54 = vld [vmem:[#allocation5 + $0x6c4] ss:$16 sps:$4 sm:$0xff]   ;;  %v5081_v14 = vld [vmem:[#allocation5 + $0x6cc] ss:$16 sps:$4 sm:$0xff]  }
 0x3e1   :  { %3243 = vmatprep.subr.bf16.mxu1 %v4991_v11  ;;  %v5076_v11 = vld [vmem:[#allocation5 + $0x6c0] ss:$16 sps:$4 sm:$0xff]  }
 0x3e3   :  { %3080 = vmatpush1.bf16.msra.mxu0 %v4986_v6  ;;  %v5079_v6 = vld [vmem:[#allocation5 + $0x6c8] ss:$16 sps:$4 sm:$0xff]  }
 0x3e4   :  { %3244 = vmatpush1.bf16.msra.mxu1 %v4989_v13  ;;  %3081 = vmatprep.subr.bf16.mxu0 %v4994_v9  ;;  %v5084_v13 = vld [vmem:[#allocation5 + $0x6e4] ss:$16 sps:$4 sm:$0xff]   ;;  %v5087_v9 = vld [vmem:[#allocation5 + $0x6ec] ss:$16 sps:$4 sm:$0xff]  }
 0x3e5   :  { %3245 = vmatprep.subr.bf16.mxu1 %v4997_v12  ;;  %v5082_v12 = vld [vmem:[#allocation5 + $0x6e0] ss:$16 sps:$4 sm:$0xff]  }
 0x3e7   :  { %3082 = vmatpush1.bf16.msra.mxu0 %v4992_v30  ;;  %v5085_v30 = vld [vmem:[#allocation5 + $0x6e8] ss:$16 sps:$4 sm:$0xff]  }
 0x3e8   :  { %3246 = vmatpush1.bf16.msra.mxu1 %v4995_v45  ;;  %3083 = vmatprep.subr.bf16.mxu0 %v5000_v32  ;;  %v5090_v45 = vld [vmem:[#allocation5 + $0x704] ss:$16 sps:$4 sm:$0xff]   ;;  %v5093_v32 = vld [vmem:[#allocation5 + $0x70c] ss:$16 sps:$4 sm:$0xff]  }
 0x3e9   :  { %3247 = vmatprep.subr.bf16.mxu1 %v5003_v19  ;;  %v5088_v19 = vld [vmem:[#allocation5 + $0x700] ss:$16 sps:$4 sm:$0xff]  }
 0x3eb   :  { %3084 = vmatpush1.bf16.msra.mxu0 %v4998_v50  ;;  %v5091_v50 = vld [vmem:[#allocation5 + $0x708] ss:$16 sps:$4 sm:$0xff]  }
 0x3ec   :  { %3248 = vmatpush1.bf16.msra.mxu1 %v5001_v7  ;;  %3085 = vmatprep.subr.bf16.mxu0 %v5006_v38  ;;  %v5096_v7 = vld [vmem:[#allocation5 + $0x724] ss:$16 sps:$4 sm:$0xff]   ;;  %v5099_v38 = vld [vmem:[#allocation5 + $0x72c] ss:$16 sps:$4 sm:$0xff]  }
 0x3ed   :  { %3249 = vmatprep.subr.bf16.mxu1 %v5009_v55  ;;  %v5094_v55 = vld [vmem:[#allocation5 + $0x720] ss:$16 sps:$4 sm:$0xff]  }
 0x3ef   :  { %3086 = vmatpush1.bf16.msra.mxu0 %v5004_v36  ;;  %v5097_v36 = vld [vmem:[#allocation5 + $0x728] ss:$16 sps:$4 sm:$0xff]  }
 0x3f0   :  { %3250 = vmatpush1.bf16.msra.mxu1 %v5007_v16  ;;  %3087 = vmatprep.subr.bf16.mxu0 %v5012_v52  ;;  %v5102_v16 = vld [vmem:[#allocation5 + $0x744] ss:$16 sps:$4 sm:$0xff]   ;;  %v5105_v52 = vld [vmem:[#allocation5 + $0x74c] ss:$16 sps:$4 sm:$0xff]  }
 0x3f1   :  { %3251 = vmatprep.subr.bf16.mxu1 %v5015_v56  ;;  %v5100_v56 = vld [vmem:[#allocation5 + $0x740] ss:$16 sps:$4 sm:$0xff]  }
 0x3f3   :  { %3088 = vmatpush1.bf16.msra.mxu0 %v5010_v42  ;;  %v5103_v42 = vld [vmem:[#allocation5 + $0x748] ss:$16 sps:$4 sm:$0xff]  }
 0x3f4   :  { %3252 = vmatpush1.bf16.msra.mxu1 %v5013_v39  ;;  %3089 = vmatprep.subr.bf16.mxu0 %v5018_v43  ;;  %v5108_v39 = vld [vmem:[#allocation5 + $0x764] ss:$16 sps:$4 sm:$0xff]   ;;  %v5111_v43 = vld [vmem:[#allocation5 + $0x76c] ss:$16 sps:$4 sm:$0xff]  }
 0x3f5   :  { %3253 = vmatprep.subr.bf16.mxu1 %v5021_v18  ;;  %v5106_v18 = vld [vmem:[#allocation5 + $0x760] ss:$16 sps:$4 sm:$0xff]  }
 0x3f7   :  { %3090 = vmatpush1.bf16.msra.mxu0 %v5016_v59  ;;  %v5109_v59 = vld [vmem:[#allocation5 + $0x768] ss:$16 sps:$4 sm:$0xff]  }
 0x3f8   :  { %3254 = vmatpush1.bf16.msra.mxu1 %v5019_v35  ;;  %3091 = vmatprep.subr.bf16.mxu0 %v5024_v28  ;;  %v5114_v35 = vld [vmem:[#allocation5 + $0x784] ss:$16 sps:$4 sm:$0xff]   ;;  %v5117_v28 = vld [vmem:[#allocation5 + $0x78c] ss:$16 sps:$4 sm:$0xff]  }
 0x3f9   :  { %3255 = vmatprep.subr.bf16.mxu1 %v5027_v4  ;;  %v5112_v4 = vld [vmem:[#allocation5 + $0x780] ss:$16 sps:$4 sm:$0xff]  }
 0x3fb   :  { %3092 = vmatpush1.bf16.msra.mxu0 %v5022_v27  ;;  %v5115_v27 = vld [vmem:[#allocation5 + $0x788] ss:$16 sps:$4 sm:$0xff]  }
 0x3fc   :  { %3256 = vmatpush1.bf16.msra.mxu1 %v5025_v63  ;;  %3093 = vmatprep.subr.bf16.mxu0 %v5030_v31  ;;  %v5120_v63 = vld [vmem:[#allocation5 + $0x7a4] ss:$16 sps:$4 sm:$0xff]   ;;  %v5123_v31 = vld [vmem:[#allocation5 + $0x7ac] ss:$16 sps:$4 sm:$0xff]  }
 0x3fd   :  { %3257 = vmatprep.subr.bf16.mxu1 %v5033_v1  ;;  %v5118_v1 = vld [vmem:[#allocation5 + $0x7a0] ss:$16 sps:$4 sm:$0xff]  }
 0x3ff   :  { %3094 = vmatpush1.bf16.msra.mxu0 %v5028_v60  ;;  %v5121_v60 = vld [vmem:[#allocation5 + $0x7a8] ss:$16 sps:$4 sm:$0xff]  }
 0x400   :  { %3258 = vmatpush1.bf16.msra.mxu1 %v5031_v24  ;;  %3095 = vmatprep.subr.bf16.mxu0 %v5036_v40  ;;  %v5126_v24 = vld [vmem:[#allocation5 + $0x7c4] ss:$16 sps:$4 sm:$0xff]   ;;  %v5129_v40 = vld [vmem:[#allocation5 + $0x7cc] ss:$16 sps:$4 sm:$0xff]  }
 0x401   :  { %3259 = vmatprep.subr.bf16.mxu1 %v5039_v51  ;;  %v5124_v51 = vld [vmem:[#allocation5 + $0x7c0] ss:$16 sps:$4 sm:$0xff]  }
 0x403   :  { %3096 = vmatpush1.bf16.msra.mxu0 %v5034_v46  ;;  %v5127_v46 = vld [vmem:[#allocation5 + $0x7c8] ss:$16 sps:$4 sm:$0xff]  }
 0x404   :  { %3260 = vmatpush1.bf16.msra.mxu1 %v5037_v62  ;;  %3106 = vmatprep.subr.bf16.mxu0 %v5042_v17  ;;  %v5132_v62 = vld [vmem:[#allocation5 + $0x7e4] ss:$16 sps:$4 sm:$0xff]   ;;  %v5135_v17 = vld [vmem:[#allocation5 + $0x7ec] ss:$16 sps:$4 sm:$0xff]  }
 0x405   :  { %3270 = vmatprep.subr.bf16.mxu1 %v5045_v5  ;;  %v5130_v5 = vld [vmem:[#allocation5 + $0x7e0] ss:$16 sps:$4 sm:$0xff]  }
 0x406   :  { %3098 = vmatmul.mubr.bf16.vlgmr.msra.gmra.mrb[12].mxu0 %v1691_v33 }
 0x407   :  { %3262 = vmatmul.mubr.bf16.vlgmr.msra.gmra.mrb[28].mxu1 %v1691_v33  ;;  %3107 = vmatpush1.bf16.msra.mxu0 %v5040_v48  ;;  %v5133_v48 = vld [vmem:[#allocation5 + $0x7e8] ss:$16 sps:$4 sm:$0xff]   ;;  %v5138_v33 = vld [vmem:[#allocation7 + $0x4] ss:$8 sps:$4 sm:$0xff]  }
 0x408   :  { %3138 = vmatprep.mubr.bf16.mxu0 %v1694_v10  ;;  %3271 = vmatpush1.bf16.msra.mxu1 %v5043_v41  ;;  %v5136_v41 = vld [vmem:[#allocation7] ss:$8 sps:$4 sm:$0xff]  }
 0x409   :  { %3302 = vmatprep.mubr.bf16.mxu1 %v1694_v10  ;;  %3108 = vmatprep.subr.bf16.mxu0 %v5048_v8  ;;  %v1693_v8 = vpack.c.b16 %v6020_v34, %v6020_v34  ;;  %v5141_v10 = vld [vmem:[#allocation7 + $0x14] ss:$8 sps:$4 sm:$0xff]  }
 0x40a   :  { %3272 = vmatprep.subr.bf16.mxu1 %v5051_v49  ;;  %v5139_v49 = vld [vmem:[#allocation7 + $0x10] ss:$8 sps:$4 sm:$0xff]   ;;  %v5153_v34 = vld [vmem:[#allocation7 + $0x54] ss:$8 sps:$4 sm:$0xff]  }
 0x40b   :  { %3109 = vmatpush1.bf16.msra.mxu0 %v5046_v23  ;;  %v5144_v23 = vld [vmem:[#allocation7 + $0x24] ss:$8 sps:$4 sm:$0xff]  }
 0x40c   :  { %3273 = vmatpush1.bf16.msra.mxu1 %v5049_v61  ;;  %3110 = vmatprep.subr.bf16.mxu0 %v5054_v2  ;;  %v5142_v61 = vld [vmem:[#allocation7 + $0x20] ss:$8 sps:$4 sm:$0xff]   ;;  %v5147_v2 = vld [vmem:[#allocation7 + $0x34] ss:$8 sps:$4 sm:$0xff]  }
 0x40d   :  { %3274 = vmatprep.subr.bf16.mxu1 %v5057_v37  ;;  %v5145_v37 = vld [vmem:[#allocation7 + $0x30] ss:$8 sps:$4 sm:$0xff]  }
 0x40f   :  { %3111 = vmatpush1.bf16.msra.mxu0 %v5052_v0  ;;  %v5150_v0 = vld [vmem:[#allocation7 + $0x44] ss:$8 sps:$4 sm:$0xff]  }
 0x410   :  { %3275 = vmatpush1.bf16.msra.mxu1 %v5055_v15  ;;  %3112 = vmatprep.subr.bf16.mxu0 %v5060_v57  ;;  %v5148_v15 = vld [vmem:[#allocation7 + $0x40] ss:$8 sps:$4 sm:$0xff]   ;;  %v5151_v57 = vld [vmem:[#allocation7 + $0x50] ss:$8 sps:$4 sm:$0xff]  }
 0x411   :  { %3276 = vmatprep.subr.bf16.mxu1 %v5063_v25  ;;  %v5154_v25 = vld [vmem:[#allocation7 + $0x60] ss:$8 sps:$4 sm:$0xff]  }
 0x413   :  { %3113 = vmatpush1.bf16.msra.mxu0 %v5058_v58  ;;  %v5156_v58 = vld [vmem:[#allocation7 + $0x64] ss:$8 sps:$4 sm:$0xff]  }
 0x414   :  { %3277 = vmatpush1.bf16.msra.mxu1 %v5061_v29  ;;  %3114 = vmatprep.subr.bf16.mxu0 %v5066_v47  ;;  %v5159_v29 = vld [vmem:[#allocation7 + $0x74] ss:$8 sps:$4 sm:$0xff]   ;;  %v5157_v47 = vld [vmem:[#allocation7 + $0x70] ss:$8 sps:$4 sm:$0xff]  }
 0x415   :  { %3278 = vmatprep.subr.bf16.mxu1 %v5069_v53  ;;  %v5162_v53 = vld [vmem:[#allocation7 + $0x84] ss:$8 sps:$4 sm:$0xff]  }
 0x417   :  { %3115 = vmatpush1.bf16.msra.mxu0 %v5064_v22  ;;  %v5160_v22 = vld [vmem:[#allocation7 + $0x80] ss:$8 sps:$4 sm:$0xff]  }
 0x418   :  { %3279 = vmatpush1.bf16.msra.mxu1 %v5067_v44  ;;  %3116 = vmatprep.subr.bf16.mxu0 %v5072_v26  ;;  %v5165_v44 = vld [vmem:[#allocation7 + $0x94] ss:$8 sps:$4 sm:$0xff]   ;;  %v5163_v26 = vld [vmem:[#allocation7 + $0x90] ss:$8 sps:$4 sm:$0xff]  }
 0x419   :  { %3280 = vmatprep.subr.bf16.mxu1 %v5075_v21  ;;  %v5168_v21 = vld [vmem:[#allocation7 + $0xa4] ss:$8 sps:$4 sm:$0xff]  }
 0x41b   :  { %3117 = vmatpush1.bf16.msra.mxu0 %v5070_v3  ;;  %v5166_v3 = vld [vmem:[#allocation7 + $0xa0] ss:$8 sps:$4 sm:$0xff]  }
 0x41c   :  { %3281 = vmatpush1.bf16.msra.mxu1 %v5073_v20  ;;  %3118 = vmatprep.subr.bf16.mxu0 %v5078_v54  ;;  %v5171_v20 = vld [vmem:[#allocation7 + $0xb4] ss:$8 sps:$4 sm:$0xff]   ;;  %v5169_v54 = vld [vmem:[#allocation7 + $0xb0] ss:$8 sps:$4 sm:$0xff]  }
 0x41d   :  { %3282 = vmatprep.subr.bf16.mxu1 %v5081_v14  ;;  %v5174_v14 = vld [vmem:[#allocation7 + $0xc4] ss:$8 sps:$4 sm:$0xff]  }
 0x41f   :  { %3119 = vmatpush1.bf16.msra.mxu0 %v5076_v11  ;;  %v5172_v11 = vld [vmem:[#allocation7 + $0xc0] ss:$8 sps:$4 sm:$0xff]  }
 0x420   :  { %3283 = vmatpush1.bf16.msra.mxu1 %v5079_v6  ;;  %3120 = vmatprep.subr.bf16.mxu0 %v5084_v13  ;;  %v5177_v6 = vld [vmem:[#allocation7 + $0xd4] ss:$8 sps:$4 sm:$0xff]   ;;  %v5175_v13 = vld [vmem:[#allocation7 + $0xd0] ss:$8 sps:$4 sm:$0xff]  }
 0x421   :  { %3284 = vmatprep.subr.bf16.mxu1 %v5087_v9  ;;  %v5180_v9 = vld [vmem:[#allocation7 + $0xe4] ss:$8 sps:$4 sm:$0xff]  }
 0x423   :  { %3121 = vmatpush1.bf16.msra.mxu0 %v5082_v12  ;;  %v5178_v12 = vld [vmem:[#allocation7 + $0xe0] ss:$8 sps:$4 sm:$0xff]  }
 0x424   :  { %3285 = vmatpush1.bf16.msra.mxu1 %v5085_v30  ;;  %3122 = vmatprep.subr.bf16.mxu0 %v5090_v45  ;;  %v5183_v30 = vld [vmem:[#allocation7 + $0xf4] ss:$8 sps:$4 sm:$0xff]   ;;  %v5181_v45 = vld [vmem:[#allocation7 + $0xf0] ss:$8 sps:$4 sm:$0xff]  }
 0x425   :  { %3286 = vmatprep.subr.bf16.mxu1 %v5093_v32  ;;  %v5186_v32 = vld [vmem:[#allocation7 + $0x104] ss:$8 sps:$4 sm:$0xff]  }
 0x427   :  { %3123 = vmatpush1.bf16.msra.mxu0 %v5088_v19  ;;  %v5232_v19 = vld [vmem:[#allocation8] ss:$8 sps:$4 sm:$0xff]  }
 0x428   :  { %3287 = vmatpush1.bf16.msra.mxu1 %v5091_v50  ;;  %3124 = vmatprep.subr.bf16.mxu0 %v5096_v7  ;;  %v5234_v50 = vld [vmem:[#allocation8 + $0x4] ss:$8 sps:$4 sm:$0xff]   ;;  %v5237_v7 = vld [vmem:[#allocation8 + $0x14] ss:$8 sps:$4 sm:$0xff]  }
 0x429   :  { %3288 = vmatprep.subr.bf16.mxu1 %v5099_v38  ;;  %v5235_v38 = vld [vmem:[#allocation8 + $0x10] ss:$8 sps:$4 sm:$0xff]  }
 0x42b   :  { %3125 = vmatpush1.bf16.msra.mxu0 %v5094_v55  ;;  %v5240_v55 = vld [vmem:[#allocation8 + $0x24] ss:$8 sps:$4 sm:$0xff]  }
 0x42c   :  { %3289 = vmatpush1.bf16.msra.mxu1 %v5097_v36  ;;  %3126 = vmatprep.subr.bf16.mxu0 %v5102_v16  ;;  %v5238_v36 = vld [vmem:[#allocation8 + $0x20] ss:$8 sps:$4 sm:$0xff]   ;;  %v5243_v16 = vld [vmem:[#allocation8 + $0x34] ss:$8 sps:$4 sm:$0xff]  }
 0x42d   :  { %3290 = vmatprep.subr.bf16.mxu1 %v5105_v52  ;;  %v5241_v52 = vld [vmem:[#allocation8 + $0x30] ss:$8 sps:$4 sm:$0xff]  }
 0x42f   :  { %3127 = vmatpush1.bf16.msra.mxu0 %v5100_v56  ;;  %v5246_v56 = vld [vmem:[#allocation8 + $0x44] ss:$8 sps:$4 sm:$0xff]  }
 0x430   :  { %3291 = vmatpush1.bf16.msra.mxu1 %v5103_v42  ;;  %3128 = vmatprep.subr.bf16.mxu0 %v5108_v39  ;;  %v5244_v42 = vld [vmem:[#allocation8 + $0x40] ss:$8 sps:$4 sm:$0xff]   ;;  %v5249_v39 = vld [vmem:[#allocation8 + $0x54] ss:$8 sps:$4 sm:$0xff]  }
 0x431   :  { %3292 = vmatprep.subr.bf16.mxu1 %v5111_v43  ;;  %v5247_v43 = vld [vmem:[#allocation8 + $0x50] ss:$8 sps:$4 sm:$0xff]  }
 0x433   :  { %3129 = vmatpush1.bf16.msra.mxu0 %v5106_v18 }
 0x434   :  { %3293 = vmatpush1.bf16.msra.mxu1 %v5109_v59  ;;  %3130 = vmatprep.subr.bf16.mxu0 %v5114_v35 }
 0x435   :  { %3294 = vmatprep.subr.bf16.mxu1 %v5117_v28 }
 0x437   :  { %3131 = vmatpush1.bf16.msra.mxu0 %v5112_v4 }
 0x438   :  { %3295 = vmatpush1.bf16.msra.mxu1 %v5115_v27  ;;  %3132 = vmatprep.subr.bf16.mxu0 %v5120_v63 }
 0x439   :  { %3296 = vmatprep.subr.bf16.mxu1 %v5123_v31 }
 0x43b   :  { %3133 = vmatpush1.bf16.msra.mxu0 %v5118_v1 }
 0x43c   :  { %3297 = vmatpush1.bf16.msra.mxu1 %v5121_v60  ;;  %3134 = vmatprep.subr.bf16.mxu0 %v5126_v24 }
 0x43d   :  { %3298 = vmatprep.subr.bf16.mxu1 %v5129_v40 }
 0x43f   :  { %3135 = vmatpush1.bf16.msra.mxu0 %v5124_v51 }
 0x440   :  { %3299 = vmatpush1.bf16.msra.mxu1 %v5127_v46  ;;  %3136 = vmatprep.subr.bf16.mxu0 %v5132_v62 }
 0x441   :  { %3300 = vmatprep.subr.bf16.mxu1 %v5135_v17 }
 0x443   :  { %3137 = vmatpush1.bf16.msra.mxu0 %v5130_v5 }
 0x444   :  { %3301 = vmatpush1.bf16.msra.mxu1 %v5133_v48  ;;  %3800 = vmatprep.subr.bf16.mxu0 %v5138_v33 }
 0x445   :  { %4138 = vmatprep.subr.bf16.mxu1 %v5234_v50 }
 0x446   :  { %3139 = vmatmul.mubr.bf16.vlgmr.msra.gmra.mrb[12].mxu0 %v1693_v8 }
 0x447   :  { %3303 = vmatmul.mubr.bf16.vlgmr.msra.gmra.mrb[28].mxu1 %v1693_v8  ;;  %3801 = vmatpush1.bf16.msra.mxu0 %v5136_v41 }
 0x448   :  { %3802 = vmatprep.subr.bf16.mxu0 %v5141_v10  ;;  %4139 = vmatpush1.bf16.msra.mxu1 %v5232_v19 }
 0x449   :  { %4140 = vmatprep.subr.bf16.mxu1 %v5237_v7 }
 0x44b   :  { %3803 = vmatpush1.bf16.msra.mxu0 %v5139_v49 }
 0x44c   :  { %3804 = vmatprep.subr.bf16.mxu0 %v5144_v23  ;;  %4141 = vmatpush1.bf16.msra.mxu1 %v5235_v38 }
 0x44d   :  { %4142 = vmatprep.subr.bf16.mxu1 %v5240_v55 }
 0x44f   :  { %3805 = vmatpush1.bf16.msra.mxu0 %v5142_v61 }
 0x450   :  { %3806 = vmatprep.subr.bf16.mxu0 %v5147_v2  ;;  %4143 = vmatpush1.bf16.msra.mxu1 %v5238_v36 }
 0x451   :  { %4144 = vmatprep.subr.bf16.mxu1 %v5243_v16 }
 0x453   :  { %3807 = vmatpush1.bf16.msra.mxu0 %v5145_v37 }
 0x454   :  { %3808 = vmatprep.subr.bf16.mxu0 %v5150_v0  ;;  %4145 = vmatpush1.bf16.msra.mxu1 %v5241_v52 }
 0x455   :  { %4146 = vmatprep.subr.bf16.mxu1 %v5246_v56 }
 0x457   :  { %3809 = vmatpush1.bf16.msra.mxu0 %v5148_v15 }
 0x458   :  { %3810 = vmatprep.subr.bf16.mxu0 %v5153_v34  ;;  %4147 = vmatpush1.bf16.msra.mxu1 %v5244_v42 }
 0x459   :  { %4148 = vmatprep.subr.bf16.mxu1 %v5249_v39 }
 0x45b   :  { %3811 = vmatpush1.bf16.msra.mxu0 %v5151_v57 }
 0x45c   :  { %3812 = vmatprep.subr.bf16.mxu0 %v5156_v58  ;;  %4149 = vmatpush1.bf16.msra.mxu1 %v5247_v43 }
 0x45f   :  { %3813 = vmatpush1.bf16.msra.mxu0 %v5154_v25 }
 0x460   :  { %3814 = vmatprep.subr.bf16.mxu0 %v5159_v29 }
 0x463   :  { %3815 = vmatpush1.bf16.msra.mxu0 %v5157_v47 }
 0x464   :  { %3816 = vmatprep.subr.bf16.mxu0 %v5162_v53 }
 0x467   :  { %3817 = vmatpush1.bf16.msra.mxu0 %v5160_v22 }
 0x468   :  { %3818 = vmatprep.subr.bf16.mxu0 %v5165_v44 }
 0x46b   :  { %3819 = vmatpush1.bf16.msra.mxu0 %v5163_v26 }
 0x46c   :  { %3820 = vmatprep.subr.bf16.mxu0 %v5168_v21 }
 0x46f   :  { %3821 = vmatpush1.bf16.msra.mxu0 %v5166_v3 }
 0x470   :  { %3822 = vmatprep.subr.bf16.mxu0 %v5171_v20 }
 0x473   :  { %3823 = vmatpush1.bf16.msra.mxu0 %v5169_v54 }
 0x474   :  { %3824 = vmatprep.subr.bf16.mxu0 %v5174_v14 }
 0x477   :  { %3825 = vmatpush1.bf16.msra.mxu0 %v5172_v11 }
 0x478   :  { %3826 = vmatprep.subr.bf16.mxu0 %v5177_v6 }
 0x47b   :  { %3827 = vmatpush1.bf16.msra.mxu0 %v5175_v13 }
 0x47c   :  { %3828 = vmatprep.subr.bf16.mxu0 %v5180_v9 }
 0x47f   :  { %3829 = vmatpush1.bf16.msra.mxu0 %v5178_v12 }
 0x480   :  { %3830 = vmatprep.subr.bf16.mxu0 %v5183_v30 }
 0x483   :  { %3831 = vmatpush1.bf16.msra.mxu0 %v5181_v45 }
 0x484   :  { %3841 = vmatprep.subr.bf16.mxu0 %v5186_v32 }
 0x519   :  { %v6032_v18 = vpop.f32.mrb[12].mxu0 }
 0x51a   :  { %v3312_v59 = vsel %vm3311_vm3, %v6032_v18, 0.0  ;;  %v3340_v35 = vmul.f32 %v6032_v18, %v6032_v18  ;;  %v6038_v28 = vpop.f32.mrb[28].mxu1  ;;  %v6040_v4 = vpop.f32.mrb[13].mxu0 }
 0x51b   :  { %v3313_v27 = vrot.slane %v3312_v59, 4  ;;  %v3319_v63 = vsel %vm3311_vm3, %v6040_v4, 0.0  ;;  %v6044_v31 = vpop.f32.mrb[29].mxu1  ;;  %v3144_v1 = vpop.f32.mrb[14].mxu0  ;;  %v3341_v40 = vmul.f32 %v6040_v4, %v6040_v4 }
 0x51c   :  { %v3344_v60 = vsel %vm3311_vm3, %v3340_v35, 0.0  ;;  %v3320_v24 = vrot.slane %v3319_v63, 4  ;;  %v3308_v51 = vpop.f32.mrb[30].mxu1  ;;  %v3145_v46 = vpop.f32.mrb[15].mxu0  ;;  %v3333_v5 = vsel %vm3311_vm3, %v6044_v31, 0.0  ;;  %v3343_v2 = vmul.f32 %v6044_v31, %v6044_v31 }
 0x51d   :  { %v3314_v62 = vadd.f32 %v3313_v27, %v3312_v59  ;;  %v3345_v17 = vrot.slane %v3344_v60, 4  ;;  %v3309_v48 = vpop.f32.mrb[31].mxu1  ;;  %v3351_v41 = vsel %vm3311_vm3, %v3341_v40, 0.0  ;;  %v3334_v23 = vrot.slane %v3333_v5, 4 }
 0x51e   :  { %v3321_v33 = vadd.f32 %v3320_v24, %v3319_v63  ;;  %v3352_v49 = vrot.slane %v3351_v41, 4  ;;  %v3365_v25 = vsel %vm3311_vm3, %v3343_v2, 0.0 }
 0x51f   :  { %v3315_v8 = vrot.slane %v3314_v62, 2  ;;  %v3346_v10 = vadd.f32 %v3345_v17, %v3344_v60  ;;  %v3335_v34 = vadd.f32 %v3334_v23, %v3333_v5  ;;  %v3366_v44 = vrot.slane %v3365_v25, 4  ;;  %v5184_v23 = vld [vmem:[#allocation7 + $0x100] ss:$8 sps:$4 sm:$0xff]  }
 0x520   :  { %v3322_v61 = vrot.slane %v3321_v33, 2  ;;  %v3353_v15 = vadd.f32 %v3352_v49, %v3351_v41  ;;  %v3342_v41 = vmul.f32 %v6038_v28, %v6038_v28 }
 0x521   :  { %v3316_v37 = vadd.f32 %v3315_v8, %v3314_v62  ;;  %v3347_v0 = vrot.slane %v3346_v10, 2  ;;  %v3336_v53 = vrot.slane %v3335_v34, 2  ;;  %v3367_v14 = vadd.f32 %v3366_v44, %v3365_v25 }
 0x522   :  { %v3323_v57 = vadd.f32 %v3322_v61, %v3321_v33  ;;  %v3354_v47 = vrot.slane %v3353_v15, 2  ;;  %v3326_v33 = vsel %vm3311_vm3, %v6038_v28, 0.0 }
 0x523   :  { %v3317_v58 = vrot.slane %v3316_v37, 1  ;;  %v3348_v29 = vadd.f32 %v3347_v0, %v3346_v10  ;;  %v3337_v20 = vadd.f32 %v3336_v53, %v3335_v34  ;;  %v3368_v30 = vrot.slane %v3367_v14, 2 }
 0x524   :  { %v3324_v22 = vrot.slane %v3323_v57, 1  ;;  %v3355_v3 = vadd.f32 %v3354_v47, %v3353_v15  ;;  %v3327_v10 = vrot.slane %v3326_v33, 4 }
 0x525   :  { %v3318_v26 = vadd.f32 %v3317_v58, %v3316_v37  ;;  %v3349_v21 = vrot.slane %v3348_v29, 1  ;;  %v3338_v9 = vrot.slane %v3337_v20, 1  ;;  %v3369_v36 = vadd.f32 %v3368_v30, %v3367_v14  ;;  %v5189_v37 = vld [vmem:[#allocation7 + $0x114] ss:$8 sps:$4 sm:$0xff]   ;;  %v5192_v58 = vld [vmem:[#allocation7 + $0x124] ss:$8 sps:$4 sm:$0xff]  }
 0x526   :  { %v3325_v54 = vadd.f32 %v3324_v22, %v3323_v57  ;;  %v3356_v13 = vrot.slane %v3355_v3, 1  ;;  %v3328_v15 = vadd.f32 %v3327_v10, %v3326_v33  ;;  %v5187_v57 = vld [vmem:[#allocation7 + $0x110] ss:$8 sps:$4 sm:$0xff]   ;;  %v5190_v22 = vld [vmem:[#allocation7 + $0x120] ss:$8 sps:$4 sm:$0xff]  }
 0x527   :  { %v3350_v11 = vadd.f32 %v3349_v21, %v3348_v29  ;;  %v3372_v6 = vmul.f32 0.5, %v3318_v26  ;;  %v3339_v55 = vadd.f32 %v3338_v9, %v3337_v20  ;;  %v3370_v42 = vrot.slane %v3369_v36, 1  ;;  %v5193_v21 = vld [vmem:[#allocation7 + $0x130] ss:$8 sps:$4 sm:$0xff]   ;;  %v5196_v14 = vld [vmem:[#allocation7 + $0x140] ss:$8 sps:$4 sm:$0xff]  }
 0x528   :  { %v3373_v12 = vmul.f32 0.5, %v3325_v54  ;;  %v3357_v19 = vadd.f32 %v3356_v13, %v3355_v3  ;;  %v3329_v47 = vrot.slane %v3328_v15, 2  ;;  %v5198_v3 = vld [vmem:[#allocation7 + $0x144] ss:$8 sps:$4 sm:$0xff]   ;;  %v5199_v9 = vld [vmem:[#allocation7 + $0x150] ss:$8 sps:$4 sm:$0xff]  }
 0x529   :  { %v3376_v45 = vmul.f32 0.5, %v3350_v11  ;;  %v3380_v32 = vmul.f32 %v3372_v6, %v3372_v6  ;;  %v3375_v56 = vmul.f32 0.5, %v3339_v55  ;;  %v3371_v59 = vadd.f32 %v3370_v42, %v3369_v36  ;;  %v5201_v11 = vld [vmem:[#allocation7 + $0x154] ss:$8 sps:$4 sm:$0xff]   ;;  %v5210_v55 = vld [vmem:[#allocation7 + $0x184] ss:$8 sps:$4 sm:$0xff]  }
 0x52a   :  { %v3381_v50 = vmul.f32 %v3373_v12, %v3373_v12  ;;  %v3377_v38 = vmul.f32 0.5, %v3357_v19  ;;  %v3392_v40 = vsub.f32 %v6032_v18, %v3372_v6  ;;  %v3393_v62 = vsub.f32 %v6040_v4, %v3373_v12  ;;  %v5204_v12 = vld [vmem:[#allocation7 + $0x164] ss:$8 sps:$4 sm:$0xff]   ;;  %v5207_v19 = vld [vmem:[#allocation7 + $0x174] ss:$8 sps:$4 sm:$0xff]  }
 0x52b   :  { %v3384_v7 = vsub.f32 %v3376_v45, %v3380_v32  ;;  %v3383_v35 = vmul.f32 %v3375_v56, %v3375_v56  ;;  %v3379_v63 = vmul.f32 0.5, %v3371_v59  ;;  %v3358_v18 = vsel %vm3311_vm3, %v3342_v41, 0.0  ;;  %v5202_v32 = vld [vmem:[#allocation7 + $0x160] ss:$8 sps:$4 sm:$0xff]   ;;  %v5211_v42 = vld [vmem:[#allocation7 + $0x190] ss:$8 sps:$4 sm:$0xff]  }
 0x52c   :  { %v3385_v52 = vsub.f32 %v3377_v38, %v3381_v50  ;;  %v3395_v2 = vsub.f32 %v6044_v31, %v3375_v56  ;;  %v3359_v34 = vrot.slane %v3358_v18, 4  ;;  %v5195_v31 = vld [vmem:[#allocation7 + $0x134] ss:$8 sps:$4 sm:$0xff]   ;;  %v3330_v44 = vadd.f32 %v3329_v47, %v3328_v15  ;;  %v5205_v38 = vld [vmem:[#allocation7 + $0x170] ss:$8 sps:$4 sm:$0xff]  }
 0x52d   :  { %v3388_v16 = vmax.f32 %v3384_v7, 0.0  ;;  %v3387_v1 = vsub.f32 %v3379_v63, %v3383_v35  ;;  %v5214_v59 = vld [vmem:[#allocation7 + $0x1a0] ss:$8 sps:$4 sm:$0xff]   ;;  %v5219_v35 = vld [vmem:[#allocation7 + $0x1b4] ss:$8 sps:$4 sm:$0xff]  }
 0x52e   :  { %v3389_v43 = vmax.f32 %v3385_v52, 0.0  ;;  %v3360_v53 = vadd.f32 %v3359_v34, %v3358_v18  ;;  %v3331_v20 = vrot.slane %v3330_v44, 1  ;;  %v5213_v52 = vld [vmem:[#allocation7 + $0x194] ss:$8 sps:$4 sm:$0xff]   ;;  %v5222_v63 = vld [vmem:[#allocation7 + $0x1c4] ss:$8 sps:$4 sm:$0xff]  }
 0x52f   :  { %v3396_v39 = vadd.f32 1e-05, %v3388_v16  ;;  %v3391_v60 = vmax.f32 %v3387_v1, 0.0  ;;  %v5208_v16 = vld [vmem:[#allocation7 + $0x180] ss:$8 sps:$4 sm:$0xff]  }
 0x530   :  { %v3397_v27 = vadd.f32 1e-05, %v3389_v43  ;;  %v3361_v26 = vrot.slane %v3360_v53, 2  ;;  %v3332_v6 = vadd.f32 %v3331_v20, %v3330_v44  ;;  %v5220_v1 = vld [vmem:[#allocation7 + $0x1c0] ss:$8 sps:$4 sm:$0xff]  }
 0x531   :  { %5300 = vrsqrt.f32 %v3396_v39  ;;  %v3399_v24 = vadd.f32 1e-05, %v3391_v60  ;;  %v5216_v39 = vld [vmem:[#allocation7 + $0x1a4] ss:$8 sps:$4 sm:$0xff]   ;;  %v5225_v60 = vld [vmem:[#allocation7 + $0x1d4] ss:$8 sps:$4 sm:$0xff]  }
 0x532   :  { %5302 = vrsqrt.f32 %v3397_v27  ;;  %v3362_v54 = vadd.f32 %v3361_v26, %v3360_v53  ;;  %v3374_v45 = vmul.f32 0.5, %v3332_v6  ;;  %v5217_v27 = vld [vmem:[#allocation7 + $0x1b0] ss:$8 sps:$4 sm:$0xff]   ;;  %v5252_v10 = vld [vmem:[#allocation8 + $0x64] ss:$8 sps:$4 sm:$0xff]  }
 0x533   :  { %5304 = vrsqrt.f32 %v3399_v24  ;;  %v5223_v24 = vld [vmem:[#allocation7 + $0x1d0] ss:$8 sps:$4 sm:$0xff]   ;;  %4150 = vmatprep.subr.bf16.mxu1 %v5252_v10  ;;  %v5261_v18 = vld [vmem:[#allocation8 + $0x94] ss:$8 sps:$4 sm:$0xff]   ;;  %v5270_v34 = vld [vmem:[#allocation8 + $0xc4] ss:$8 sps:$4 sm:$0xff]  }
 0x534   :  { %v3363_v13 = vrot.slane %v3362_v54, 1  ;;  %v3382_v7 = vmul.f32 %v3374_v45, %v3374_v45  ;;  %v5265_v15 = vld [vmem:[#allocation8 + $0xb0] ss:$8 sps:$4 sm:$0xff]   ;;  %v5274_v47 = vld [vmem:[#allocation8 + $0xe0] ss:$8 sps:$4 sm:$0xff]  }
 0x535   :  { %v5279_v53 = vld [vmem:[#allocation8 + $0xf4] ss:$8 sps:$4 sm:$0xff]  }
 0x536   :  { %v3364_v30 = vadd.f32 %v3363_v13, %v3362_v54 }
 0x538   :  { %v3378_v50 = vmul.f32 0.5, %v3364_v30 }
 0x53a   :  { %v3386_v36 = vsub.f32 %v3378_v50, %v3382_v7 }
 0x53b   :  { %v5301_v51 = vpop.eup %5300 }
 0x53c   :  { %v3404_v46 = vmul.f32 %v5301_v51, %v3392_v40  ;;  %v5303_v17 = vpop.eup %5302  ;;  %v3390_v56 = vmax.f32 %v3386_v36, 0.0  ;;  %v5228_v40 = vld [vmem:[#allocation7 + $0x1e4] ss:$8 sps:$4 sm:$0xff]  }
 0x53d   :  { %v3405_v5 = vmul.f32 %v5303_v17, %v3393_v62  ;;  %v5305_v4 = vpop.eup %5304  ;;  %v5226_v62 = vld [vmem:[#allocation7 + $0x1e0] ss:$8 sps:$4 sm:$0xff]  }
 0x53e   :  { %v3408_v48 = vmax.f32 %v3404_v46, 0.0  ;;  %v3407_v0 = vmul.f32 %v5305_v4, %v3395_v2  ;;  %v3398_v43 = vadd.f32 1e-05, %v3390_v56  ;;  %v3394_v46 = vsub.f32 %v6038_v28, %v3374_v45  ;;  %v5258_v28 = vld [vmem:[#allocation8 + $0x84] ss:$8 sps:$4 sm:$0xff]  }
 0x53f   :  { %v3409_v8 = vmax.f32 %v3405_v5, 0.0  ;;  %v5231_v5 = vld [vmem:[#allocation7 + $0x1f4] ss:$8 sps:$4 sm:$0xff]   ;;  %v5259_v2 = vld [vmem:[#allocation8 + $0x90] ss:$8 sps:$4 sm:$0xff]  }
 0x540   :  { %v3412_v61 = vpack.c.bf16 %v3408_v48, %v3408_v48  ;;  %v3411_v25 = vmax.f32 %v3407_v0, 0.0  ;;  %5306 = vrsqrt.f32 %v3398_v43  ;;  %v5229_v48 = vld [vmem:[#allocation7 + $0x1f0] ss:$8 sps:$4 sm:$0xff]   ;;  %v5262_v4 = vld [vmem:[#allocation8 + $0xa0] ss:$8 sps:$4 sm:$0xff]  }
 0x541   :  { %v3413_v49 = vpack.c.bf16 %v3409_v8, %v3409_v8  ;;  %v5250_v8 = vld [vmem:[#allocation8 + $0x60] ss:$8 sps:$4 sm:$0xff]   ;;  %v5267_v0 = vld [vmem:[#allocation8 + $0xb4] ss:$8 sps:$4 sm:$0xff]  }
 0x542   :  { %v3415_v29 = vpack.c.bf16 %v3411_v25, %v3411_v25  ;;  %4151 = vmatpush1.bf16.msra.mxu1 %v5250_v8  ;;  %v5273_v25 = vld [vmem:[#allocation8 + $0xd4] ss:$8 sps:$4 sm:$0xff]  }
 0x543   :  { %3832 = vmatprep.mubr.bf16.mxu0 %v3413_v49  ;;  %v5255_v49 = vld [vmem:[#allocation8 + $0x74] ss:$8 sps:$4 sm:$0xff]  }
 0x544   :  { %3833 = vmatmul.mubr.bf16.vlgmr.msra.gmra.mrb[16].mxu0 %v3412_v61  ;;  %4152 = vmatprep.subr.bf16.mxu1 %v5255_v49  ;;  %v5256_v61 = vld [vmem:[#allocation8 + $0x80] ss:$8 sps:$4 sm:$0xff]  }
 0x545   :  { %3842 = vmatpush1.bf16.msra.mxu0 %v5184_v23  ;;  %3873 = vmatprep.mubr.bf16.mxu0 %v3415_v29  ;;  %v5253_v23 = vld [vmem:[#allocation8 + $0x70] ss:$8 sps:$4 sm:$0xff]   ;;  %v5276_v29 = vld [vmem:[#allocation8 + $0xe4] ss:$8 sps:$4 sm:$0xff]  }
 0x546   :  { %3843 = vmatprep.subr.bf16.mxu0 %v5189_v37  ;;  %4153 = vmatpush1.bf16.msra.mxu1 %v5253_v23  ;;  %v5264_v37 = vld [vmem:[#allocation8 + $0xa4] ss:$8 sps:$4 sm:$0xff]  }
 0x547   :  { %4154 = vmatprep.subr.bf16.mxu1 %v5258_v28 }
 0x549   :  { %3844 = vmatpush1.bf16.msra.mxu0 %v5187_v57  ;;  %v5268_v57 = vld [vmem:[#allocation8 + $0xc0] ss:$8 sps:$4 sm:$0xff]  }
 0x54a   :  { %3845 = vmatprep.subr.bf16.mxu0 %v5192_v58  ;;  %v5307_v51 = vpop.eup %5306  ;;  %4155 = vmatpush1.bf16.msra.mxu1 %v5256_v61  ;;  %v5271_v58 = vld [vmem:[#allocation8 + $0xd0] ss:$8 sps:$4 sm:$0xff]  }
 0x54b   :  { %v3406_v17 = vmul.f32 %v5307_v51, %v3394_v46  ;;  %4156 = vmatprep.subr.bf16.mxu1 %v5261_v18 }
 0x54d   :  { %3846 = vmatpush1.bf16.msra.mxu0 %v5190_v22  ;;  %v3410_v33 = vmax.f32 %v3406_v17, 0.0  ;;  %v5277_v22 = vld [vmem:[#allocation8 + $0xf0] ss:$8 sps:$4 sm:$0xff]  }
 0x54e   :  { %3847 = vmatprep.subr.bf16.mxu0 %v5195_v31  ;;  %4157 = vmatpush1.bf16.msra.mxu1 %v5259_v2 }
 0x54f   :  { %v3414_v41 = vpack.c.bf16 %v3410_v33, %v3410_v33  ;;  %4158 = vmatprep.subr.bf16.mxu1 %v5264_v37 }
 0x551   :  { %3848 = vmatpush1.bf16.msra.mxu0 %v5193_v21 }
 0x552   :  { %3849 = vmatprep.subr.bf16.mxu0 %v5198_v3  ;;  %4159 = vmatpush1.bf16.msra.mxu1 %v5262_v4 }
 0x553   :  { %4160 = vmatprep.subr.bf16.mxu1 %v5267_v0 }
 0x555   :  { %3850 = vmatpush1.bf16.msra.mxu0 %v5196_v14 }
 0x556   :  { %3851 = vmatprep.subr.bf16.mxu0 %v5201_v11  ;;  %4161 = vmatpush1.bf16.msra.mxu1 %v5265_v15 }
 0x557   :  { %4162 = vmatprep.subr.bf16.mxu1 %v5270_v34  ;;  %v3968_v34 = vlaneseq }
 0x559   :  { %3852 = vmatpush1.bf16.msra.mxu0 %v5199_v9 }
 0x55a   :  { %3853 = vmatprep.subr.bf16.mxu0 %v5204_v12  ;;  %4163 = vmatpush1.bf16.msra.mxu1 %v5268_v57  ;;  %v4180_v57 = vand.u32 127, %v3968_v34 }
 0x55b   :  { %4164 = vmatprep.subr.bf16.mxu1 %v5273_v25 }
 0x55c   :  { %v4181_v25 = vadd.s32 128, %v4180_v57 }
 0x55d   :  { %3854 = vmatpush1.bf16.msra.mxu0 %v5202_v32 }
 0x55e   :  { %3855 = vmatprep.subr.bf16.mxu0 %v5207_v19  ;;  %4165 = vmatpush1.bf16.msra.mxu1 %v5271_v58 }
 0x55f   :  { %4166 = vmatprep.subr.bf16.mxu1 %v5276_v29  ;;  %v6068_v58 = vmul.u32.u64.low 4042322161, %v4180_v57  ;;  %v6069_v29 = vmul.u32.u64.high 4042322161, %v4180_v57, %v6068_v58 }
 0x561   :  { %3856 = vmatpush1.bf16.msra.mxu0 %v5205_v38 }
 0x562   :  { %3857 = vmatprep.subr.bf16.mxu0 %v5210_v55  ;;  %4167 = vmatpush1.bf16.msra.mxu1 %v5274_v47 }
 0x563   :  { %4168 = vmatprep.subr.bf16.mxu1 %v5279_v53  ;;  %v6071_v47 = vmul.u32.u64.low 4042322161, %v4181_v25  ;;  %v6072_v53 = vmul.u32.u64.high 4042322161, %v4181_v25, %v6071_v47 }
 0x565   :  { %3858 = vmatpush1.bf16.msra.mxu0 %v5208_v16 }
 0x566   :  { %3859 = vmatprep.subr.bf16.mxu0 %v5213_v52  ;;  %4169 = vmatpush1.bf16.msra.mxu1 %v5277_v22  ;;  %v4188_v22 = vshrl.u32 %v6069_v29, 4 }
 0x569   :  { %3860 = vmatpush1.bf16.msra.mxu0 %v5211_v42 }
 0x56a   :  { %3861 = vmatprep.subr.bf16.mxu0 %v5216_v39 }
 0x56d   :  { %3862 = vmatpush1.bf16.msra.mxu0 %v5214_v59 }
 0x56e   :  { %3863 = vmatprep.subr.bf16.mxu0 %v5219_v35 }
 0x571   :  { %3864 = vmatpush1.bf16.msra.mxu0 %v5217_v27 }
 0x572   :  { %3865 = vmatprep.subr.bf16.mxu0 %v5222_v63 }
 0x575   :  { %3866 = vmatpush1.bf16.msra.mxu0 %v5220_v1 }
 0x576   :  { %3867 = vmatprep.subr.bf16.mxu0 %v5225_v60 }
 0x579   :  { %3868 = vmatpush1.bf16.msra.mxu0 %v5223_v24 }
 0x57a   :  { %3869 = vmatprep.subr.bf16.mxu0 %v5228_v40 }
 0x57d   :  { %3870 = vmatpush1.bf16.msra.mxu0 %v5226_v62 }
 0x57e   :  { %3871 = vmatprep.subr.bf16.mxu0 %v5231_v5 }
 0x581   :  { %3872 = vmatpush1.bf16.msra.mxu0 %v5229_v48 }
 0x584   :  { %3874 = vmatmul.mubr.bf16.vlgmr.msra.gmra.mrb[16].mxu0 %v3414_v41 }
 0x657   :  { %v3875_v31 = vpop.f32.mrb[16].mxu0 }
 0x658   :  { %v3882_v44 = vsel %vm3311_vm3, %v3875_v31, 0.0  ;;  %v3896_v26 = vmul.f32 %v3875_v31, %v3875_v31  ;;  %v3877_v21 = vpop.f32.mrb[17].mxu0 }
 0x659   :  { %v3883_v3 = vrot.slane %v3882_v44, 4  ;;  %v3889_v20 = vsel %vm3311_vm3, %v3877_v21, 0.0  ;;  %v3897_v54 = vmul.f32 %v3877_v21, %v3877_v21  ;;  %v3879_v14 = vpop.f32.mrb[18].mxu0 }
 0x65a   :  { %v3898_v11 = vsel %vm3311_vm3, %v3896_v26, 0.0  ;;  %v3890_v6 = vrot.slane %v3889_v20, 4  ;;  %v3880_v13 = vpop.f32.mrb[19].mxu0 }
 0x65b   :  { %v3884_v9 = vadd.f32 %v3883_v3, %v3882_v44  ;;  %v3899_v12 = vrot.slane %v3898_v11, 4  ;;  %v3905_v30 = vsel %vm3311_vm3, %v3897_v54, 0.0  ;;  %v4189_v44 = vmul.u32 17, %v4188_v22 }
 0x65c   :  { %v3891_v45 = vadd.f32 %v3890_v6, %v3889_v20  ;;  %v3906_v32 = vrot.slane %v3905_v30, 4  ;;  %v3969_v20 = vshrl.u32 %v3968_v34, 7  ;;  %v3966_v6 = vld [vmem:[%s6098_s7] sm:$0x3]  ;;  %s5400_s7 = scalar_lea.vmem %s4239_s27, 64 }
 0x65d   :  { %v3885_v19 = vrot.slane %v3884_v9, 2  ;;  %v3900_v50 = vadd.f32 %v3899_v12, %v3898_v11  ;;  %p5401_p4 = scmp.ne.s32.totalorder %s4239_s27, %s5400_s7  ;;  %p5406_p6 = scmp.lt.s32.totalorder %s5400_s7, %s5400_s7 }
 0x65e   :  { %v3892_v7 = vrot.slane %v3891_v45, 2  ;;  %v3907_v38 = vadd.f32 %v3906_v32, %v3905_v30  ;;  %v3970_v11 = vsub.s32 0, %v3969_v20 }
 0x65f   :  { %v3886_v55 = vadd.f32 %v3885_v19, %v3884_v9  ;;  %v3901_v36 = vrot.slane %v3900_v50, 2  ;;  %v3974_v9 = vsub.s32 1, %v3969_v20  ;;  %v5441_v19 = vmov 0.0   ;;  %p5407_p7 = por %p5406_p6, %p5405_p5 }
 0x660   :  { %v3893_v16 = vadd.f32 %v3892_v7, %v3891_v45  ;;  %v3908_v52 = vrot.slane %v3907_v38, 2  ;;  %v3971_v30 = vrot.slane %v3966_v6, %v3970_v11 }
 0x661   :  { %v3887_v56 = vrot.slane %v3886_v55, 1  ;;  %v3902_v42 = vadd.f32 %v3901_v36, %v3900_v50  ;;  %v3975_v45 = vrot.slane %v3966_v6, %v3974_v9  ;;  %p5408_p8 = pnand %p5407_p7, %p5401_p4 }
 0x662   :  { %v3894_v39 = vrot.slane %v3893_v16, 1  ;;  %v3909_v43 = vadd.f32 %v3908_v52, %v3907_v38 }
 0x663   :  { %v3888_v59 = vadd.f32 %v3887_v56, %v3886_v55  ;;  %v3903_v35 = vrot.slane %v3902_v42, 1 }
 0x664   :  { %v3895_v27 = vadd.f32 %v3894_v39, %v3893_v16  ;;  %v3910_v63 = vrot.slane %v3909_v43, 1 }
 0x665   :  { %v3904_v1 = vadd.f32 %v3903_v35, %v3902_v42  ;;  %v3912_v60 = vmul.f32 0.5, %v3888_v59 }
 0x666   :  { %v3911_v24 = vadd.f32 %v3910_v63, %v3909_v43  ;;  %v3913_v40 = vmul.f32 0.5, %v3895_v27 }
 0x667   :  { %v3914_v51 = vmul.f32 0.5, %v3904_v1  ;;  %v3916_v46 = vmul.f32 %v3912_v60, %v3912_v60  ;;  %v3922_v49 = vsub.f32 %v3875_v31, %v3912_v60  ;;  %v4199_v31 = vshrl.u32 %v6072_v53, 4 }
 0x668   :  { %v3915_v62 = vmul.f32 0.5, %v3911_v24  ;;  %v3917_v17 = vmul.f32 %v3913_v40, %v3913_v40  ;;  %v3923_v28 = vsub.f32 %v3877_v21, %v3913_v40  ;;  %v4190_v21 = vsub.s32 %v4180_v57, %v4189_v44 }
 0x669   :  { %v3918_v5 = vsub.f32 %v3914_v51, %v3916_v46  ;;  %v4200_v26 = vmul.u32 17, %v4199_v31 }
 0x66a   :  { %v3919_v48 = vsub.f32 %v3915_v62, %v3917_v17  ;;  %vm4204_vm4 = vcmp.ne.s32.totalorder %v4190_v21, 0  ;;  %vm4206_vm5 = vcmp.lt.s32.totalorder %v4190_v21, 0  ;;  %v4210_v54 = vadd.s32 17, %v4190_v21 }
 0x66b   :  { %v3920_v33 = vmax.f32 %v3918_v5, 0.0  ;;  %v4201_v3 = vsub.s32 %v4181_v25, %v4200_v26  ;;  %vm4208_vm8 = vmand %vm4206_vm5, %vm4204_vm4 }
 0x66c   :  { %v3921_v41 = vmax.f32 %v3919_v48, 0.0  ;;  %v4212_v13 = vsel %vm4208_vm8, %v4210_v54, %v4190_v21 }
 0x66d   :  { %v3924_v8 = vadd.f32 1e-05, %v3920_v33  ;;  %vm4205_vm6 = vcmp.ne.s32.totalorder %v4201_v3, 0  ;;  %vm4207_vm7 = vcmp.lt.s32.totalorder %v4201_v3, 0  ;;  %v4211_v14 = vadd.s32 17, %v4201_v3 }
 0x66e   :  { %v3925_v10 = vadd.f32 1e-05, %v3921_v41  ;;  %vm4209_vm9 = vmand %vm4207_vm7, %vm4205_vm6  ;;  %vm4214_vm10 = vcmp.eq.s32.totalorder %v4212_v13, 0 }
 0x66f   :  { %5308 = vrsqrt.f32 %v3924_v8  ;;  %v4213_v12 = vsel %vm4209_vm9, %v4211_v14, %v4201_v3  ;;  %v4216_v50 = vsel %vm4214_vm10, 1.0, %v5441_v19 }
 0x670   :  { %5310 = vrsqrt.f32 %v3925_v10  ;;  %vm4215_vm11 = vcmp.eq.s32.totalorder %v4213_v12, 0 }
 0x671   :  { %v4217_v55 = vsel %vm4215_vm11, 1.0, %v5441_v19 }
 0x679   :  { %v5309_v23 = vpop.eup %5308 }
 0x67a   :  { %v5311_v61 = vpop.eup %5310  ;;  %v3928_v18 = vmul.f32 %v5309_v23, %v3922_v49 }
 0x67b   :  { %v3929_v2 = vmul.f32 %v5311_v61, %v3923_v28 }
 0x67c   :  { %v3930_v37 = vmax.f32 %v3928_v18, 0.0 }
 0x67d   :  { %v3931_v4 = vmax.f32 %v3929_v2, 0.0 }
 0x67e   :  { %v3932_v15 = vpack.c.bf16 %v3930_v37, %v3930_v37 }
 0x67f   :  { %v3933_v0 = vpack.c.bf16 %v3931_v4, %v3931_v4 }
 0x681   :  { %4170 = vmatprep.mubr.bf16.mxu1 %v3933_v0 }
 0x682   :  { %4171 = vmatmul.mubr.bf16.vlgmr.msra.gmra.mrb[32].mxu1 %v3932_v15 }
 0x755   :  { %v4172_v32 = vpop.f32.mrb[32].mxu1 }
 0x756   :  { %v4173_v7 = vadd.f32 %v4172_v32, %v3971_v30  ;;  %v4174_v38 = vpop.f32.mrb[33].mxu1 }
 0x757   :  { %v4175_v36 = vadd.f32 %v4174_v38, %v3975_v45  ;;  %v4176_v16 = vpop.f32.mrb[34].mxu1 }
 0x758   :  { %v4218_v52 = vadd.f32 %v4216_v50, %v4173_v7  ;;  %v4177_v56 = vpop.f32.mrb[35].mxu1 }
 0x759   :  { %v4219_v42 = vadd.f32 %v4217_v55, %v4175_v36 }
 0x75b   :  { %v4222_v39 = vcombine.low %v4218_v52, %v4219_v42 }
 0x75d   :  { %4674 = vst.sshfl [vmem:[#allocation10] sm:$0x33 pattern:$0x76325410] %v4222_v39 }
 0x75e   :  { %5411 = shalt.err (!%p5408_p8)
}
 0x75f   :  { %s5412_s28 = scalar_lea.hbm %s6099_s8, 64 }
 0x760   :  { %p5413_p9 = scmp.ne.s32.totalorder %s6099_s8, %s5412_s28  ;;  %p5416_p10 = scmp.lt.u32.totalorder %s5412_s28, %s6099_s8 }
 0x762   :  { %p5418_p11 = pnand %p5416_p10, %p5413_p9 }
 0x764   :  { %5421 = shalt.err (!%p5418_p11)
}
 0x765   :  { %4241 = dma.vmem_to_hbm [thread:$0]  %s4239_s27, 64, %s6099_s8, [#allocation4]  }
 0x766   :  { %5428 = dma.done.wait [#allocation4], 64  }
 0x767   :  { %5429 = vsyncadd [#allocation4], 4294967232 }
 0x768   :  { %4245 = vsyncpa [#allocation3], 1 }
 0x769   :  { %4246 = vsyncpa [#allocation6], 1 }
 0x76a   :  { %4247 = vsyncpa [#allocation9], 1 }
 0x76b   :  { %4248 = vsyncpa [#allocation4], 1 }

</bundles_post_ra>
